<compile_context>
chip_gen: v6e
topology: v6e:2x2x1
jax: 0.10.0
libtpu: 0.0.40
codegen_flags: <defaults>
</compile_context>

<pallas_src>
import numpy as np
import jax
import jax.numpy as jnp
from jax.experimental import pallas as pl
from jax.experimental.pallas import tpu as pltpu


def _pad128(n):
    return ((n + 127) // 128) * 128


def _decoder_kernel(
    use_tf_ref,   # SMEM (T+1,) int32 scalar-prefetch: 1 -> teacher forcing at step t
    y_ids_ref,    # (Tc, B, 1) int32 teacher token ids for this time chunk
    h0_ref,       # (1, B, Hp)  initial hidden (lane-padded)
    embc_ref,     # (Vp, Hp)    bf16: embedding fused with attn_combine x-part
    ccon_ref,     # (B, Hp)     f32: attn_combine(attn_x) + bias, lane-padded
    wihT_ref,     # (Hp, 3G)    bf16: GRU weight_ih.T, gates [r|z|n] at 128-lane stride
    bih_ref,      # (1, 3G)     f32
    whhT_ref,     # (Hp, 3G)    bf16: GRU weight_hh.T
    bhh_ref,      # (1, 3G)     f32
    woT_ref,      # (Hp, Vp)    bf16: out.weight.T (padded rows/cols zero)
    bo_ref,       # (1, Vp)     f32: out.bias (padded cols -1e30)
    out_ref,      # (Tc, B, Vp) f32: log-softmax outputs for this chunk
    hid_ref,      # (1, B, Hp)  f32: final hidden (resident accumulator)
    h_scr,        # VMEM (B, Hp) f32  hidden carry across chunks
    tok_scr,      # VMEM (B, 1)  int32 previous greedy token id
):
    c = pl.program_id(0)
    Tc = y_ids_ref.shape[0]
    B, Hp = h_scr.shape
    Vp = out_ref.shape[-1]
    G = Hp  # gate stride used when the fused GRU weights were laid out

    @pl.when(c == 0)
    def _():
        h_scr[...] = h0_ref[0]
        tok_scr[...] = y_ids_ref[0]   # x = y[:, 0] before the loop

    # ---- chunk-invariant loads (reused across the Tc inner steps) ----
    embc = embc_ref[...]
    ccon = ccon_ref[...]
    wihT = wihT_ref[...]
    bih = bih_ref[...]
    whhT = whhT_ref[...]
    bhh = bhh_ref[...]
    woT = woT_ref[...]
    bo = bo_ref[...]
    iota = jax.lax.broadcasted_iota(jnp.int32, (B, Vp), 1)   # hoisted broadcast

    h = h_scr[...]

    for tc in range(Tc):   # small static chunk; h carried as a value
        step = c * Tc + tc

        # ---- token selection: teacher-forced id vs previous greedy id ----
        sel = use_tf_ref[step]
        id_col = jnp.where(sel == 1, y_ids_ref[tc], tok_scr[...])      # (B, 1) int32
        onehot = (iota == id_col).astype(jnp.bfloat16)                 # (B, Vp)

        # ---- fused embedding + attn_combine + relu (dropout == identity) ----
        # Attention weights are identically 1 (softmax over a size-1 axis); the
        # attn_x-dependent part of attn_combine is the precomputed `ccon`.
        comb = jnp.dot(onehot, embc, preferred_element_type=jnp.float32) + ccon
        comb = jnp.maximum(comb, 0.0)                                   # (B, Hp)

        # ---- single-step GRU, fused gate matmuls (PyTorch gate order r, z, n) ----
        gi = jnp.dot(comb.astype(jnp.bfloat16), wihT,
                     preferred_element_type=jnp.float32) + bih          # (B, 3G)
        gh = jnp.dot(h.astype(jnp.bfloat16), whhT,
                     preferred_element_type=jnp.float32) + bhh          # (B, 3G)
        r = jax.nn.sigmoid(gi[:, 0 * G:1 * G] + gh[:, 0 * G:1 * G])
        z = jax.nn.sigmoid(gi[:, 1 * G:2 * G] + gh[:, 1 * G:2 * G])
        n = jnp.tanh(gi[:, 2 * G:3 * G] + r * gh[:, 2 * G:3 * G])
        h = (1.0 - z) * n + z * h                                       # (B, Hp), pads stay 0

        # ---- output projection; stash raw logits (normalized once after loop) ----
        logits = jnp.dot(h.astype(jnp.bfloat16), woT,
                         preferred_element_type=jnp.float32) + bo       # (B, Vp)
        out_ref[tc] = logits

        # ---- greedy top-1 only if the NEXT step consumes the prediction ----
        # (argmax on raw logits is tie-equivalent to argmax on log-softmax)
        @pl.when(use_tf_ref[step + 1] == 0)
        def _(logits=logits):
            pmax = jnp.max(logits, axis=-1, keepdims=True)
            idx = jnp.min(jnp.where(logits == pmax, iota, Vp),
                          axis=-1, keepdims=True)
            tok_scr[...] = idx

    h_scr[...] = h
    hid_ref[0] = h

    # ---- one vectorized log-softmax over the whole chunk (off the serial chain) ----
    raw = out_ref[...]                                                  # (Tc, B, Vp)
    m = jnp.max(raw, axis=-1, keepdims=True)
    lse = m + jnp.log(jnp.sum(jnp.exp(raw - m), axis=-1, keepdims=True))
    out_ref[...] = raw - lse


def make_params(key, hidden_size, output_size):
    """Deterministic parameters with PyTorch-convention shapes."""
    H, V = hidden_size, output_size
    ks = jax.random.split(key, 14)

    def u(k, shape, fan_in):
        b = 1.0 / np.sqrt(fan_in)
        return jax.random.uniform(k, shape, jnp.float32, -b, b)

    return dict(
        emb=jax.random.normal(ks[0], (V, H), jnp.float32),        # embedding.weight
        attn_fc_w=u(ks[1], (1, H), H),   attn_fc_b=u(ks[2], (1,), H),
        attn_fc1_w=u(ks[3], (H, 2 * H), 2 * H),                   # no bias (dead path)
        attn_fc2_w=u(ks[4], (H, H), H),                           # no bias (dead path)
        attn_comb_w=u(ks[5], (H, 2 * H), 2 * H), attn_comb_b=u(ks[6], (H,), 2 * H),
        w_ih=u(ks[7], (3 * H, H), H),   b_ih=u(ks[8], (3 * H,), H),
        w_hh=u(ks[9], (3 * H, H), H),   b_hh=u(ks[10], (3 * H,), H),
        out_w=u(ks[11], (V, H), H),     b_out=u(ks[12], (V,), H),
    )


def attn_decoder_forward(params, encoder_out, hidden, y, *,
                         max_output_length, teacher_forcing=True, ratio=0.5,
                         seed=0, time_chunk=None, materialize_attn=True):
    B, S, H = encoder_out.shape
    V = params["emb"].shape[0]
    T = max_output_length
    Vp = _pad128(V)                    # lane-dense padded vocab
    Hp = _pad128(H)                    # lane-padded hidden
    G = Hp                             # gate stride in fused GRU weights

    Tc = time_chunk if time_chunk is not None else T
    assert T % Tc == 0, "time_chunk must divide max_output_length"

    if hidden is None:
        hidden = jnp.zeros((1, B, H), jnp.float32)

    # host-side teacher-forcing coin flips (np.random.rand() < ratio)
    rng = np.random.RandomState(seed)
    if teacher_forcing:
        use_tf = (rng.rand(T) < ratio).astype(np.int32)
    else:
        use_tf = np.zeros((T,), np.int32)
    # trailing 1 so step T-1 skips the (unused) greedy argmax and [step+1] stays in bounds
    use_tf = jnp.asarray(np.concatenate([use_tf, np.ones((1,), np.int32)]))

    # teacher token ids, time-major (T, B, 1) int32
    y_ids = jnp.transpose(y[:, :T].astype(jnp.int32), (1, 0))[:, :, None]

    # ---- time-invariant precompute, hoisted out of the kernel ----
    # softmax over a size-1 axis => attention weights are identically 1.0, so
    # attn_x = sum_s(encoder_out) is constant and attn_fc/attn_fc1/attn_fc2 are dead.
    attn_x = jnp.sum(encoder_out.astype(jnp.float32), axis=1)            # (B, H)
    wc = params["attn_comb_w"]                                           # (H, 2H) = [x | attn_x]
    ccon = attn_x @ wc[:, H:].T + params["attn_comb_b"][None, :]         # (B, H)
    ccon_p = jnp.zeros((B, Hp), jnp.float32).at[:, :H].set(ccon)

    # fuse embedding into attn_combine x-part: (V,H) @ (H,H) -> (V,H), pad, bf16
    emb_comb = params["emb"] @ wc[:, :H].T
    embc_p = (jnp.zeros((Vp, Hp), jnp.float32)
              .at[:V, :H].set(emb_comb)).astype(jnp.bfloat16)

    # fused GRU weights, gates [r|z|n] laid out at a 128-lane stride so gate
    # slices in the kernel are vreg-aligned; padded rows/cols are zero.
    def pad_gru(wT, b):   # wT (H, 3H), b (3H,)
        wp = jnp.zeros((Hp, 3 * G), jnp.float32)
        bp = jnp.zeros((1, 3 * G), jnp.float32)
        for g in range(3):
            wp = wp.at[:H, g * G:g * G + H].set(wT[:, g * H:(g + 1) * H])
            bp = bp.at[0, g * G:g * G + H].set(b[g * H:(g + 1) * H])
        return wp.astype(jnp.bfloat16), bp

    wihT_p, bih_p = pad_gru(params["w_ih"].T, params["b_ih"])
    whhT_p, bhh_p = pad_gru(params["w_hh"].T, params["b_hh"])

    # output projection: zero-padded weight, -1e30 bias on padded logits
    woT_p = (jnp.zeros((Hp, Vp), jnp.float32)
             .at[:H, :V].set(params["out_w"].T)).astype(jnp.bfloat16)
    bo_p = jnp.full((1, Vp), -1e30, jnp.float32).at[0, :V].set(params["b_out"])

    # lane-padded initial hidden
    h0_p = jnp.zeros((1, B, Hp), jnp.float32).at[:, :, :H].set(
        hidden.astype(jnp.float32))

    inputs = (use_tf, y_ids, h0_p, embc_p, ccon_p,
              wihT_p, bih_p, whhT_p, bhh_p, woT_p, bo_p)

    def full_spec(shape):
        return pl.BlockSpec(shape, lambda *_: (0,) * len(shape))

    in_specs = [
        pl.BlockSpec((Tc, B, 1), lambda c, *_: (c, 0, 0)),      # y_ids (per time chunk)
        full_spec((1, B, Hp)),
        full_spec((Vp, Hp)),
        full_spec((B, Hp)),
        full_spec((Hp, 3 * G)),
        full_spec((1, 3 * G)),
        full_spec((Hp, 3 * G)),
        full_spec((1, 3 * G)),
        full_spec((Hp, Vp)),
        full_spec((1, Vp)),
    ]
    out_specs = [
        pl.BlockSpec((Tc, B, Vp), lambda c, *_: (c, 0, 0)),
        pl.BlockSpec((1, B, Hp), lambda c, *_: (0, 0, 0)),
    ]
    out_shape = (
        jax.ShapeDtypeStruct((T, B, Vp), jnp.float32),
        jax.ShapeDtypeStruct((1, B, Hp), jnp.float32),
    )

    out_tbv, hidden_out = pl.pallas_call(
        _decoder_kernel,
        out_shape=out_shape,
        grid_spec=pltpu.PrefetchScalarGridSpec(
            num_scalar_prefetch=1,
            grid=(T // Tc,),
            in_specs=in_specs,
            out_specs=out_specs,
            scratch_shapes=[
                pltpu.VMEM((B, Hp), jnp.float32),   # hidden carry
                pltpu.VMEM((B, 1), jnp.int32),      # previous greedy token id
            ],
        ),
        compiler_params=pltpu.CompilerParams(
            dimension_semantics=("arbitrary",),     # sequential carry over time
        ),
    )(*inputs)

    out = jnp.transpose(out_tbv, (1, 2, 0))[:, :V, :]            # (B, V, T)
    hidden_final = hidden_out[:, :, :H]                          # (1, B, H)

    # attention weights are identically 1.0 (softmax over a size-1 axis); the
    # consumer should treat them as a known constant — only materialize on demand.
    if materialize_attn:
        attn = jnp.ones((B, T * S, H), jnp.float32)
    else:
        attn = None
    return out, hidden_final, attn


if __name__ == "__main__":
    B, S, H, V, T = 2, 8, 32, 16, 6   # batch, enc seq, hidden_size, output_size, max_output_length

    key = jax.random.PRNGKey(0)
    k_enc, k_y, k_p = jax.random.split(key, 3)
    encoder_out = jax.random.normal(k_enc, (B, S, H), jnp.float32)
    y = jax.random.randint(k_y, (B, T), 0, V, jnp.int32)
    hidden0 = jnp.zeros((1, B, H), jnp.float32)
    params = make_params(k_p, H, V)

    out, hidden, attn = attn_decoder_forward(
        params, encoder_out, hidden0, y,
        max_output_length=T, teacher_forcing=True, ratio=0.5, seed=0)

    jax.block_until_ready((out, hidden, attn))
    assert out.shape == (B, V, T)
    assert hidden.shape == (1, B, H)
    assert attn.shape == (B, T * S, H)
    assert bool(jnp.all(jnp.isfinite(out)))
    print("KERNEL_OK")
</pallas_src>

<mosaic_0001>
module attributes {stable_mosaic.version = 11 : i64} {
  func.func @_decoder_kernel(%arg0: i32, %arg1: memref<7xi32, #tpu.memory_space<smem>>, %arg2: memref<6x2x1xi32, #tpu.memory_space<vmem>>, %arg3: memref<1x2x128xf32, #tpu.memory_space<vmem>>, %arg4: memref<128x128xbf16, #tpu.memory_space<vmem>>, %arg5: memref<2x128xf32, #tpu.memory_space<vmem>>, %arg6: memref<128x384xbf16, #tpu.memory_space<vmem>>, %arg7: memref<1x384xf32, #tpu.memory_space<vmem>>, %arg8: memref<128x384xbf16, #tpu.memory_space<vmem>>, %arg9: memref<1x384xf32, #tpu.memory_space<vmem>>, %arg10: memref<128x128xbf16, #tpu.memory_space<vmem>>, %arg11: memref<1x128xf32, #tpu.memory_space<vmem>>, %arg12: memref<6x2x128xf32, #tpu.memory_space<vmem>>, %arg13: memref<1x2x128xf32, #tpu.memory_space<vmem>>, %arg14: memref<2x128xf32, #tpu.memory_space<vmem>>, %arg15: memref<2x1xi32, #tpu.memory_space<vmem>>) attributes {dimension_semantics = [#tpu.dimension_semantics<arbitrary>], iteration_bounds = array<i64: 1>, scalar_prefetch = 1 : i64, scratch_operands = 2 : i64, tpu.core_type = #tpu.core_type<tc>, window_params = [{transform_indices = @transform_0, window_bounds = array<i64: 6, 2, 1>}, {pipeline_mode = #tpu.pipeline_mode<synchronous>, transform_indices = @transform_1, window_bounds = array<i64: 1, 2, 128>}, {pipeline_mode = #tpu.pipeline_mode<synchronous>, transform_indices = @transform_2, window_bounds = array<i64: 128, 128>}, {pipeline_mode = #tpu.pipeline_mode<synchronous>, transform_indices = @transform_3, window_bounds = array<i64: 2, 128>}, {pipeline_mode = #tpu.pipeline_mode<synchronous>, transform_indices = @transform_4, window_bounds = array<i64: 128, 384>}, {pipeline_mode = #tpu.pipeline_mode<synchronous>, transform_indices = @transform_5, window_bounds = array<i64: 1, 384>}, {pipeline_mode = #tpu.pipeline_mode<synchronous>, transform_indices = @transform_6, window_bounds = array<i64: 128, 384>}, {pipeline_mode = #tpu.pipeline_mode<synchronous>, transform_indices = @transform_7, window_bounds = array<i64: 1, 384>}, {pipeline_mode = #tpu.pipeline_mode<synchronous>, transform_indices = @transform_8, window_bounds = array<i64: 128, 128>}, {pipeline_mode = #tpu.pipeline_mode<synchronous>, transform_indices = @transform_9, window_bounds = array<i64: 1, 128>}, {transform_indices = @transform_10, window_bounds = array<i64: 6, 2, 128>}, {pipeline_mode = #tpu.pipeline_mode<synchronous>, transform_indices = @transform_11, window_bounds = array<i64: 1, 2, 128>}]} {
    %c0_i32 = arith.constant 0 : i32
    %0 = arith.cmpi eq, %arg0, %c0_i32 : i32
    %1 = arith.extui %0 : i1 to i32
    %c0_i32_0 = arith.constant 0 : i32
    %2 = arith.cmpi ne, %1, %c0_i32_0 : i32
    scf.if %2 {
      %c0_151 = arith.constant 0 : index
      %c0_152 = arith.constant 0 : index
      %c0_153 = arith.constant 0 : index
      %420 = vector.load %arg3[%c0_151, %c0_152, %c0_153] : memref<1x2x128xf32, #tpu.memory_space<vmem>>, vector<1x2x128xf32>
      %421 = vector.shape_cast %420 : vector<1x2x128xf32> to vector<2x128xf32>
      %c0_154 = arith.constant 0 : index
      %c0_155 = arith.constant 0 : index
      %422 = vector.load %arg14[%c0_154, %c0_155] : memref<2x128xf32, #tpu.memory_space<vmem>>, vector<2x128xf32>
      tpu.vector_store %arg14[%c0_154, %c0_155], %421 {strides = array<i32>} : memref<2x128xf32, #tpu.memory_space<vmem>>, vector<2x128xf32>,
      %c0_156 = arith.constant 0 : index
      %c0_157 = arith.constant 0 : index
      %c0_158 = arith.constant 0 : index
      %423 = vector.load %arg2[%c0_156, %c0_157, %c0_158] : memref<6x2x1xi32, #tpu.memory_space<vmem>>, vector<1x2x1xi32>
      %424 = vector.shape_cast %423 : vector<1x2x1xi32> to vector<2x1xi32>
      %c0_159 = arith.constant 0 : index
      %c0_160 = arith.constant 0 : index
      %425 = vector.load %arg15[%c0_159, %c0_160] : memref<2x1xi32, #tpu.memory_space<vmem>>, vector<2x1xi32>
      tpu.vector_store %arg15[%c0_159, %c0_160], %424 {strides = array<i32>} : memref<2x1xi32, #tpu.memory_space<vmem>>, vector<2x1xi32>,
    } else {
    }
    %c0 = arith.constant 0 : index
    %c0_1 = arith.constant 0 : index
    %3 = vector.load %arg4[%c0, %c0_1] : memref<128x128xbf16, #tpu.memory_space<vmem>>, vector<128x128xbf16>
    %c0_2 = arith.constant 0 : index
    %c0_3 = arith.constant 0 : index
    %4 = vector.load %arg5[%c0_2, %c0_3] : memref<2x128xf32, #tpu.memory_space<vmem>>, vector<2x128xf32>
    %c0_4 = arith.constant 0 : index
    %c0_5 = arith.constant 0 : index
    %5 = vector.load %arg6[%c0_4, %c0_5] : memref<128x384xbf16, #tpu.memory_space<vmem>>, vector<128x384xbf16>
    %c0_6 = arith.constant 0 : index
    %c0_7 = arith.constant 0 : index
    %6 = vector.load %arg7[%c0_6, %c0_7] : memref<1x384xf32, #tpu.memory_space<vmem>>, vector<1x384xf32>
    %c0_8 = arith.constant 0 : index
    %c0_9 = arith.constant 0 : index
    %7 = vector.load %arg8[%c0_8, %c0_9] : memref<128x384xbf16, #tpu.memory_space<vmem>>, vector<128x384xbf16>
    %c0_10 = arith.constant 0 : index
    %c0_11 = arith.constant 0 : index
    %8 = vector.load %arg9[%c0_10, %c0_11] : memref<1x384xf32, #tpu.memory_space<vmem>>, vector<1x384xf32>
    %c0_12 = arith.constant 0 : index
    %c0_13 = arith.constant 0 : index
    %9 = vector.load %arg10[%c0_12, %c0_13] : memref<128x128xbf16, #tpu.memory_space<vmem>>, vector<128x128xbf16>
    %c0_14 = arith.constant 0 : index
    %c0_15 = arith.constant 0 : index
    %10 = vector.load %arg11[%c0_14, %c0_15] : memref<1x128xf32, #tpu.memory_space<vmem>>, vector<1x128xf32>
    %11 = tpu.iota {dimensions = array<i32: 1>} : vector<2x128xi32>
    %c0_16 = arith.constant 0 : index
    %c0_17 = arith.constant 0 : index
    %12 = vector.load %arg14[%c0_16, %c0_17] : memref<2x128xf32, #tpu.memory_space<vmem>>, vector<2x128xf32>
    %c6_i32 = arith.constant 6 : i32
    %13 = arith.muli %arg0, %c6_i32 : i32
    %c0_i32_18 = arith.constant 0 : i32
    %14 = arith.addi %13, %c0_i32_18 : i32
    %15 = arith.index_cast %14 : i32 to index
    %16 = memref.load %arg1[%15] : memref<7xi32, #tpu.memory_space<smem>>
    %c1_i32 = arith.constant 1 : i32
    %17 = arith.cmpi eq, %16, %c1_i32 : i32
    %c0_19 = arith.constant 0 : index
    %c0_20 = arith.constant 0 : index
    %c0_21 = arith.constant 0 : index
    %18 = vector.load %arg2[%c0_19, %c0_20, %c0_21] : memref<6x2x1xi32, #tpu.memory_space<vmem>>, vector<1x2x1xi32>
    %19 = vector.shape_cast %18 : vector<1x2x1xi32> to vector<2x1xi32>
    %c0_22 = arith.constant 0 : index
    %c0_23 = arith.constant 0 : index
    %20 = vector.load %arg15[%c0_22, %c0_23] : memref<2x1xi32, #tpu.memory_space<vmem>>, vector<2x1xi32>
    %21 = arith.select %17, %19, %20 : vector<2x1xi32>
    %22 = vector.broadcast %21 : vector<2x1xi32> to vector<2x128xi32>
    %23 = arith.cmpi eq, %11, %22 : vector<2x128xi32>
    %24 = arith.extui %23 : vector<2x128xi1> to vector<2x128xi32>
    %25 = arith.sitofp %24 : vector<2x128xi32> to vector<2x128xf32>
    %26 = arith.truncf %25 : vector<2x128xf32> to vector<2x128xbf16>
    %cst = arith.constant dense<0.000000e+00> : vector<2x128xf32>
    %27 = tpu.matmul %26, %3, %cst {dimension_numbers = #tpu.dot_dimension_numbers<[1], [0], [0], [1], [0, 0, 1, 1], [], []>} : vector<2x128xbf16>, vector<128x128xbf16>, vector<2x128xf32> -> vector<2x128xf32>
    %28 = arith.addf %27, %4 : vector<2x128xf32>
    %cst_24 = arith.constant 0.000000e+00 : f32
    %29 = vector.broadcast %cst_24 : f32 to vector<2x128xf32>
    %30 = arith.maximumf %28, %29 : vector<2x128xf32>
    %31 = arith.truncf %30 : vector<2x128xf32> to vector<2x128xbf16>
    %cst_25 = arith.constant dense<0.000000e+00> : vector<2x384xf32>
    %32 = tpu.matmul %31, %5, %cst_25 {dimension_numbers = #tpu.dot_dimension_numbers<[1], [0], [0], [1], [0, 0, 1, 1], [], []>} : vector<2x128xbf16>, vector<128x384xbf16>, vector<2x384xf32> -> vector<2x384xf32>
    %33 = vector.broadcast %6 : vector<1x384xf32> to vector<2x384xf32>
    %34 = arith.addf %32, %33 : vector<2x384xf32>
    %35 = arith.truncf %12 : vector<2x128xf32> to vector<2x128xbf16>
    %cst_26 = arith.constant dense<0.000000e+00> : vector<2x384xf32>
    %36 = tpu.matmul %35, %7, %cst_26 {dimension_numbers = #tpu.dot_dimension_numbers<[1], [0], [0], [1], [0, 0, 1, 1], [], []>} : vector<2x128xbf16>, vector<128x384xbf16>, vector<2x384xf32> -> vector<2x384xf32>
    %37 = vector.broadcast %8 : vector<1x384xf32> to vector<2x384xf32>
    %38 = arith.addf %36, %37 : vector<2x384xf32>
    %39 = vector.extract_strided_slice %34 {offsets = [0, 0], sizes = [2, 128], strides = [1, 1]} : vector<2x384xf32> to vector<2x128xf32>
    %40 = vector.extract_strided_slice %38 {offsets = [0, 0], sizes = [2, 128], strides = [1, 1]} : vector<2x384xf32> to vector<2x128xf32>
    %41 = arith.addf %39, %40 : vector<2x128xf32>
    %42 = arith.negf %41 : vector<2x128xf32>
    %43 = math.exp %42 : vector<2x128xf32>
    %cst_27 = arith.constant 1.000000e+00 : f32
    %44 = vector.broadcast %cst_27 : f32 to vector<2x128xf32>
    %45 = arith.addf %44, %43 : vector<2x128xf32>
    %46 = arith.divf %44, %45 : vector<2x128xf32>
    %47 = vector.extract_strided_slice %34 {offsets = [0, 128], sizes = [2, 128], strides = [1, 1]} : vector<2x384xf32> to vector<2x128xf32>
    %48 = vector.extract_strided_slice %38 {offsets = [0, 128], sizes = [2, 128], strides = [1, 1]} : vector<2x384xf32> to vector<2x128xf32>
    %49 = arith.addf %47, %48 : vector<2x128xf32>
    %50 = arith.negf %49 : vector<2x128xf32>
    %51 = math.exp %50 : vector<2x128xf32>
    %cst_28 = arith.constant 1.000000e+00 : f32
    %52 = vector.broadcast %cst_28 : f32 to vector<2x128xf32>
    %53 = arith.addf %52, %51 : vector<2x128xf32>
    %54 = arith.divf %52, %53 : vector<2x128xf32>
    %55 = vector.extract_strided_slice %34 {offsets = [0, 256], sizes = [2, 128], strides = [1, 1]} : vector<2x384xf32> to vector<2x128xf32>
    %56 = vector.extract_strided_slice %38 {offsets = [0, 256], sizes = [2, 128], strides = [1, 1]} : vector<2x384xf32> to vector<2x128xf32>
    %57 = arith.mulf %46, %56 : vector<2x128xf32>
    %58 = arith.addf %55, %57 : vector<2x128xf32>
    %59 = math.tanh %58 : vector<2x128xf32>
    %cst_29 = arith.constant 1.000000e+00 : f32
    %60 = vector.broadcast %cst_29 : f32 to vector<2x128xf32>
    %61 = arith.subf %60, %54 : vector<2x128xf32>
    %62 = arith.mulf %61, %59 : vector<2x128xf32>
    %63 = arith.mulf %54, %12 : vector<2x128xf32>
    %64 = arith.addf %62, %63 : vector<2x128xf32>
    %65 = arith.truncf %64 : vector<2x128xf32> to vector<2x128xbf16>
    %cst_30 = arith.constant dense<0.000000e+00> : vector<2x128xf32>
    %66 = tpu.matmul %65, %9, %cst_30 {dimension_numbers = #tpu.dot_dimension_numbers<[1], [0], [0], [1], [0, 0, 1, 1], [], []>} : vector<2x128xbf16>, vector<128x128xbf16>, vector<2x128xf32> -> vector<2x128xf32>
    %67 = vector.broadcast %10 : vector<1x128xf32> to vector<2x128xf32>
    %68 = arith.addf %66, %67 : vector<2x128xf32>
    %c0_31 = arith.constant 0 : index
    %c0_32 = arith.constant 0 : index
    %c0_33 = arith.constant 0 : index
    %69 = vector.load %arg12[%c0_31, %c0_32, %c0_33] : memref<6x2x128xf32, #tpu.memory_space<vmem>>, vector<1x2x128xf32>
    %70 = vector.shape_cast %69 : vector<1x2x128xf32> to vector<2x128xf32>
    %71 = vector.shape_cast %68 : vector<2x128xf32> to vector<1x2x128xf32>
    tpu.vector_store %arg12[%c0_31, %c0_32, %c0_33], %71 {strides = array<i32>} : memref<6x2x128xf32, #tpu.memory_space<vmem>>, vector<1x2x128xf32>,
    %c1_i32_34 = arith.constant 1 : i32
    %72 = arith.addi %14, %c1_i32_34 : i32
    %73 = arith.index_cast %72 : i32 to index
    %74 = memref.load %arg1[%73] : memref<7xi32, #tpu.memory_space<smem>>
    %c0_i32_35 = arith.constant 0 : i32
    %75 = arith.cmpi eq, %74, %c0_i32_35 : i32
    %76 = arith.extui %75 : i1 to i32
    %c0_i32_36 = arith.constant 0 : i32
    %77 = arith.cmpi ne, %76, %c0_i32_36 : i32
    scf.if %77 {
      %cst_151 = arith.constant dense<0xFF800000> : vector<2xf32>
      %420 = vector.multi_reduction <maximumf>, %68, %cst_151 [1] : vector<2x128xf32> to vector<2xf32>
      %421 = vector.shape_cast %420 : vector<2xf32> to vector<2x1xf32>
      %422 = vector.broadcast %421 : vector<2x1xf32> to vector<2x128xf32>
      %423 = arith.cmpf oeq, %68, %422 : vector<2x128xf32>
      %c128_i32 = arith.constant 128 : i32
      %424 = vector.broadcast %c128_i32 : i32 to vector<2x128xi32>
      %425 = arith.select %423, %11, %424 : vector<2x128xi1>, vector<2x128xi32>
      %cst_152 = arith.constant dense<2147483647> : vector<2xi32>
      %426 = vector.multi_reduction <minsi>, %425, %cst_152 [1] : vector<2x128xi32> to vector<2xi32>
      %427 = vector.shape_cast %426 : vector<2xi32> to vector<2x1xi32>
      %c0_153 = arith.constant 0 : index
      %c0_154 = arith.constant 0 : index
      %428 = vector.load %arg15[%c0_153, %c0_154] : memref<2x1xi32, #tpu.memory_space<vmem>>, vector<2x1xi32>
      tpu.vector_store %arg15[%c0_153, %c0_154], %427 {strides = array<i32>} : memref<2x1xi32, #tpu.memory_space<vmem>>, vector<2x1xi32>,
    } else {
    }
    %c6_i32_37 = arith.constant 6 : i32
    %78 = arith.muli %arg0, %c6_i32_37 : i32
    %c1_i32_38 = arith.constant 1 : i32
    %79 = arith.addi %78, %c1_i32_38 : i32
    %80 = arith.index_cast %79 : i32 to index
    %81 = memref.load %arg1[%80] : memref<7xi32, #tpu.memory_space<smem>>
    %c1_i32_39 = arith.constant 1 : i32
    %82 = arith.cmpi eq, %81, %c1_i32_39 : i32
    %c1 = arith.constant 1 : index
    %c0_40 = arith.constant 0 : index
    %c0_41 = arith.constant 0 : index
    %83 = vector.load %arg2[%c1, %c0_40, %c0_41] : memref<6x2x1xi32, #tpu.memory_space<vmem>>, vector<1x2x1xi32>
    %84 = vector.shape_cast %83 : vector<1x2x1xi32> to vector<2x1xi32>
    %c0_42 = arith.constant 0 : index
    %c0_43 = arith.constant 0 : index
    %85 = vector.load %arg15[%c0_42, %c0_43] : memref<2x1xi32, #tpu.memory_space<vmem>>, vector<2x1xi32>
    %86 = arith.select %82, %84, %85 : vector<2x1xi32>
    %87 = vector.broadcast %86 : vector<2x1xi32> to vector<2x128xi32>
    %88 = arith.cmpi eq, %11, %87 : vector<2x128xi32>
    %89 = arith.extui %88 : vector<2x128xi1> to vector<2x128xi32>
    %90 = arith.sitofp %89 : vector<2x128xi32> to vector<2x128xf32>
    %91 = arith.truncf %90 : vector<2x128xf32> to vector<2x128xbf16>
    %cst_44 = arith.constant dense<0.000000e+00> : vector<2x128xf32>
    %92 = tpu.matmul %91, %3, %cst_44 {dimension_numbers = #tpu.dot_dimension_numbers<[1], [0], [0], [1], [0, 0, 1, 1], [], []>} : vector<2x128xbf16>, vector<128x128xbf16>, vector<2x128xf32> -> vector<2x128xf32>
    %93 = arith.addf %92, %4 : vector<2x128xf32>
    %cst_45 = arith.constant 0.000000e+00 : f32
    %94 = vector.broadcast %cst_45 : f32 to vector<2x128xf32>
    %95 = arith.maximumf %93, %94 : vector<2x128xf32>
    %96 = arith.truncf %95 : vector<2x128xf32> to vector<2x128xbf16>
    %cst_46 = arith.constant dense<0.000000e+00> : vector<2x384xf32>
    %97 = tpu.matmul %96, %5, %cst_46 {dimension_numbers = #tpu.dot_dimension_numbers<[1], [0], [0], [1], [0, 0, 1, 1], [], []>} : vector<2x128xbf16>, vector<128x384xbf16>, vector<2x384xf32> -> vector<2x384xf32>
    %98 = vector.broadcast %6 : vector<1x384xf32> to vector<2x384xf32>
    %99 = arith.addf %97, %98 : vector<2x384xf32>
    %100 = arith.truncf %64 : vector<2x128xf32> to vector<2x128xbf16>
    %cst_47 = arith.constant dense<0.000000e+00> : vector<2x384xf32>
    %101 = tpu.matmul %100, %7, %cst_47 {dimension_numbers = #tpu.dot_dimension_numbers<[1], [0], [0], [1], [0, 0, 1, 1], [], []>} : vector<2x128xbf16>, vector<128x384xbf16>, vector<2x384xf32> -> vector<2x384xf32>
    %102 = vector.broadcast %8 : vector<1x384xf32> to vector<2x384xf32>
    %103 = arith.addf %101, %102 : vector<2x384xf32>
    %104 = vector.extract_strided_slice %99 {offsets = [0, 0], sizes = [2, 128], strides = [1, 1]} : vector<2x384xf32> to vector<2x128xf32>
    %105 = vector.extract_strided_slice %103 {offsets = [0, 0], sizes = [2, 128], strides = [1, 1]} : vector<2x384xf32> to vector<2x128xf32>
    %106 = arith.addf %104, %105 : vector<2x128xf32>
    %107 = arith.negf %106 : vector<2x128xf32>
    %108 = math.exp %107 : vector<2x128xf32>
    %cst_48 = arith.constant 1.000000e+00 : f32
    %109 = vector.broadcast %cst_48 : f32 to vector<2x128xf32>
    %110 = arith.addf %109, %108 : vector<2x128xf32>
    %111 = arith.divf %109, %110 : vector<2x128xf32>
    %112 = vector.extract_strided_slice %99 {offsets = [0, 128], sizes = [2, 128], strides = [1, 1]} : vector<2x384xf32> to vector<2x128xf32>
    %113 = vector.extract_strided_slice %103 {offsets = [0, 128], sizes = [2, 128], strides = [1, 1]} : vector<2x384xf32> to vector<2x128xf32>
    %114 = arith.addf %112, %113 : vector<2x128xf32>
    %115 = arith.negf %114 : vector<2x128xf32>
    %116 = math.exp %115 : vector<2x128xf32>
    %cst_49 = arith.constant 1.000000e+00 : f32
    %117 = vector.broadcast %cst_49 : f32 to vector<2x128xf32>
    %118 = arith.addf %117, %116 : vector<2x128xf32>
    %119 = arith.divf %117, %118 : vector<2x128xf32>
    %120 = vector.extract_strided_slice %99 {offsets = [0, 256], sizes = [2, 128], strides = [1, 1]} : vector<2x384xf32> to vector<2x128xf32>
    %121 = vector.extract_strided_slice %103 {offsets = [0, 256], sizes = [2, 128], strides = [1, 1]} : vector<2x384xf32> to vector<2x128xf32>
    %122 = arith.mulf %111, %121 : vector<2x128xf32>
    %123 = arith.addf %120, %122 : vector<2x128xf32>
    %124 = math.tanh %123 : vector<2x128xf32>
    %cst_50 = arith.constant 1.000000e+00 : f32
    %125 = vector.broadcast %cst_50 : f32 to vector<2x128xf32>
    %126 = arith.subf %125, %119 : vector<2x128xf32>
    %127 = arith.mulf %126, %124 : vector<2x128xf32>
    %128 = arith.mulf %119, %64 : vector<2x128xf32>
    %129 = arith.addf %127, %128 : vector<2x128xf32>
    %130 = arith.truncf %129 : vector<2x128xf32> to vector<2x128xbf16>
    %cst_51 = arith.constant dense<0.000000e+00> : vector<2x128xf32>
    %131 = tpu.matmul %130, %9, %cst_51 {dimension_numbers = #tpu.dot_dimension_numbers<[1], [0], [0], [1], [0, 0, 1, 1], [], []>} : vector<2x128xbf16>, vector<128x128xbf16>, vector<2x128xf32> -> vector<2x128xf32>
    %132 = vector.broadcast %10 : vector<1x128xf32> to vector<2x128xf32>
    %133 = arith.addf %131, %132 : vector<2x128xf32>
    %c1_52 = arith.constant 1 : index
    %c0_53 = arith.constant 0 : index
    %c0_54 = arith.constant 0 : index
    %134 = vector.load %arg12[%c1_52, %c0_53, %c0_54] : memref<6x2x128xf32, #tpu.memory_space<vmem>>, vector<1x2x128xf32>
    %135 = vector.shape_cast %134 : vector<1x2x128xf32> to vector<2x128xf32>
    %136 = vector.shape_cast %133 : vector<2x128xf32> to vector<1x2x128xf32>
    tpu.vector_store %arg12[%c1_52, %c0_53, %c0_54], %136 {strides = array<i32>} : memref<6x2x128xf32, #tpu.memory_space<vmem>>, vector<1x2x128xf32>,
    %c1_i32_55 = arith.constant 1 : i32
    %137 = arith.addi %79, %c1_i32_55 : i32
    %138 = arith.index_cast %137 : i32 to index
    %139 = memref.load %arg1[%138] : memref<7xi32, #tpu.memory_space<smem>>
    %c0_i32_56 = arith.constant 0 : i32
    %140 = arith.cmpi eq, %139, %c0_i32_56 : i32
    %141 = arith.extui %140 : i1 to i32
    %c0_i32_57 = arith.constant 0 : i32
    %142 = arith.cmpi ne, %141, %c0_i32_57 : i32
    scf.if %142 {
      %cst_151 = arith.constant dense<0xFF800000> : vector<2xf32>
      %420 = vector.multi_reduction <maximumf>, %133, %cst_151 [1] : vector<2x128xf32> to vector<2xf32>
      %421 = vector.shape_cast %420 : vector<2xf32> to vector<2x1xf32>
      %422 = vector.broadcast %421 : vector<2x1xf32> to vector<2x128xf32>
      %423 = arith.cmpf oeq, %133, %422 : vector<2x128xf32>
      %c128_i32 = arith.constant 128 : i32
      %424 = vector.broadcast %c128_i32 : i32 to vector<2x128xi32>
      %425 = arith.select %423, %11, %424 : vector<2x128xi1>, vector<2x128xi32>
      %cst_152 = arith.constant dense<2147483647> : vector<2xi32>
      %426 = vector.multi_reduction <minsi>, %425, %cst_152 [1] : vector<2x128xi32> to vector<2xi32>
      %427 = vector.shape_cast %426 : vector<2xi32> to vector<2x1xi32>
      %c0_153 = arith.constant 0 : index
      %c0_154 = arith.constant 0 : index
      %428 = vector.load %arg15[%c0_153, %c0_154] : memref<2x1xi32, #tpu.memory_space<vmem>>, vector<2x1xi32>
      tpu.vector_store %arg15[%c0_153, %c0_154], %427 {strides = array<i32>} : memref<2x1xi32, #tpu.memory_space<vmem>>, vector<2x1xi32>,
    } else {
    }
    %c6_i32_58 = arith.constant 6 : i32
    %143 = arith.muli %arg0, %c6_i32_58 : i32
    %c2_i32 = arith.constant 2 : i32
    %144 = arith.addi %143, %c2_i32 : i32
    %145 = arith.index_cast %144 : i32 to index
    %146 = memref.load %arg1[%145] : memref<7xi32, #tpu.memory_space<smem>>
    %c1_i32_59 = arith.constant 1 : i32
    %147 = arith.cmpi eq, %146, %c1_i32_59 : i32
    %c2 = arith.constant 2 : index
    %c0_60 = arith.constant 0 : index
    %c0_61 = arith.constant 0 : index
    %148 = vector.load %arg2[%c2, %c0_60, %c0_61] : memref<6x2x1xi32, #tpu.memory_space<vmem>>, vector<1x2x1xi32>
    %149 = vector.shape_cast %148 : vector<1x2x1xi32> to vector<2x1xi32>
    %c0_62 = arith.constant 0 : index
    %c0_63 = arith.constant 0 : index
    %150 = vector.load %arg15[%c0_62, %c0_63] : memref<2x1xi32, #tpu.memory_space<vmem>>, vector<2x1xi32>
    %151 = arith.select %147, %149, %150 : vector<2x1xi32>
    %152 = vector.broadcast %151 : vector<2x1xi32> to vector<2x128xi32>
    %153 = arith.cmpi eq, %11, %152 : vector<2x128xi32>
    %154 = arith.extui %153 : vector<2x128xi1> to vector<2x128xi32>
    %155 = arith.sitofp %154 : vector<2x128xi32> to vector<2x128xf32>
    %156 = arith.truncf %155 : vector<2x128xf32> to vector<2x128xbf16>
    %cst_64 = arith.constant dense<0.000000e+00> : vector<2x128xf32>
    %157 = tpu.matmul %156, %3, %cst_64 {dimension_numbers = #tpu.dot_dimension_numbers<[1], [0], [0], [1], [0, 0, 1, 1], [], []>} : vector<2x128xbf16>, vector<128x128xbf16>, vector<2x128xf32> -> vector<2x128xf32>
    %158 = arith.addf %157, %4 : vector<2x128xf32>
    %cst_65 = arith.constant 0.000000e+00 : f32
    %159 = vector.broadcast %cst_65 : f32 to vector<2x128xf32>
    %160 = arith.maximumf %158, %159 : vector<2x128xf32>
    %161 = arith.truncf %160 : vector<2x128xf32> to vector<2x128xbf16>
    %cst_66 = arith.constant dense<0.000000e+00> : vector<2x384xf32>
    %162 = tpu.matmul %161, %5, %cst_66 {dimension_numbers = #tpu.dot_dimension_numbers<[1], [0], [0], [1], [0, 0, 1, 1], [], []>} : vector<2x128xbf16>, vector<128x384xbf16>, vector<2x384xf32> -> vector<2x384xf32>
    %163 = vector.broadcast %6 : vector<1x384xf32> to vector<2x384xf32>
    %164 = arith.addf %162, %163 : vector<2x384xf32>
    %165 = arith.truncf %129 : vector<2x128xf32> to vector<2x128xbf16>
    %cst_67 = arith.constant dense<0.000000e+00> : vector<2x384xf32>
    %166 = tpu.matmul %165, %7, %cst_67 {dimension_numbers = #tpu.dot_dimension_numbers<[1], [0], [0], [1], [0, 0, 1, 1], [], []>} : vector<2x128xbf16>, vector<128x384xbf16>, vector<2x384xf32> -> vector<2x384xf32>
    %167 = vector.broadcast %8 : vector<1x384xf32> to vector<2x384xf32>
    %168 = arith.addf %166, %167 : vector<2x384xf32>
    %169 = vector.extract_strided_slice %164 {offsets = [0, 0], sizes = [2, 128], strides = [1, 1]} : vector<2x384xf32> to vector<2x128xf32>
    %170 = vector.extract_strided_slice %168 {offsets = [0, 0], sizes = [2, 128], strides = [1, 1]} : vector<2x384xf32> to vector<2x128xf32>
    %171 = arith.addf %169, %170 : vector<2x128xf32>
    %172 = arith.negf %171 : vector<2x128xf32>
    %173 = math.exp %172 : vector<2x128xf32>
    %cst_68 = arith.constant 1.000000e+00 : f32
    %174 = vector.broadcast %cst_68 : f32 to vector<2x128xf32>
    %175 = arith.addf %174, %173 : vector<2x128xf32>
    %176 = arith.divf %174, %175 : vector<2x128xf32>
    %177 = vector.extract_strided_slice %164 {offsets = [0, 128], sizes = [2, 128], strides = [1, 1]} : vector<2x384xf32> to vector<2x128xf32>
    %178 = vector.extract_strided_slice %168 {offsets = [0, 128], sizes = [2, 128], strides = [1, 1]} : vector<2x384xf32> to vector<2x128xf32>
    %179 = arith.addf %177, %178 : vector<2x128xf32>
    %180 = arith.negf %179 : vector<2x128xf32>
    %181 = math.exp %180 : vector<2x128xf32>
    %cst_69 = arith.constant 1.000000e+00 : f32
    %182 = vector.broadcast %cst_69 : f32 to vector<2x128xf32>
    %183 = arith.addf %182, %181 : vector<2x128xf32>
    %184 = arith.divf %182, %183 : vector<2x128xf32>
    %185 = vector.extract_strided_slice %164 {offsets = [0, 256], sizes = [2, 128], strides = [1, 1]} : vector<2x384xf32> to vector<2x128xf32>
    %186 = vector.extract_strided_slice %168 {offsets = [0, 256], sizes = [2, 128], strides = [1, 1]} : vector<2x384xf32> to vector<2x128xf32>
    %187 = arith.mulf %176, %186 : vector<2x128xf32>
    %188 = arith.addf %185, %187 : vector<2x128xf32>
    %189 = math.tanh %188 : vector<2x128xf32>
    %cst_70 = arith.constant 1.000000e+00 : f32
    %190 = vector.broadcast %cst_70 : f32 to vector<2x128xf32>
    %191 = arith.subf %190, %184 : vector<2x128xf32>
    %192 = arith.mulf %191, %189 : vector<2x128xf32>
    %193 = arith.mulf %184, %129 : vector<2x128xf32>
    %194 = arith.addf %192, %193 : vector<2x128xf32>
    %195 = arith.truncf %194 : vector<2x128xf32> to vector<2x128xbf16>
    %cst_71 = arith.constant dense<0.000000e+00> : vector<2x128xf32>
    %196 = tpu.matmul %195, %9, %cst_71 {dimension_numbers = #tpu.dot_dimension_numbers<[1], [0], [0], [1], [0, 0, 1, 1], [], []>} : vector<2x128xbf16>, vector<128x128xbf16>, vector<2x128xf32> -> vector<2x128xf32>
    %197 = vector.broadcast %10 : vector<1x128xf32> to vector<2x128xf32>
    %198 = arith.addf %196, %197 : vector<2x128xf32>
    %c2_72 = arith.constant 2 : index
    %c0_73 = arith.constant 0 : index
    %c0_74 = arith.constant 0 : index
    %199 = vector.load %arg12[%c2_72, %c0_73, %c0_74] : memref<6x2x128xf32, #tpu.memory_space<vmem>>, vector<1x2x128xf32>
    %200 = vector.shape_cast %199 : vector<1x2x128xf32> to vector<2x128xf32>
    %201 = vector.shape_cast %198 : vector<2x128xf32> to vector<1x2x128xf32>
    tpu.vector_store %arg12[%c2_72, %c0_73, %c0_74], %201 {strides = array<i32>} : memref<6x2x128xf32, #tpu.memory_space<vmem>>, vector<1x2x128xf32>,
    %c1_i32_75 = arith.constant 1 : i32
    %202 = arith.addi %144, %c1_i32_75 : i32
    %203 = arith.index_cast %202 : i32 to index
    %204 = memref.load %arg1[%203] : memref<7xi32, #tpu.memory_space<smem>>
    %c0_i32_76 = arith.constant 0 : i32
    %205 = arith.cmpi eq, %204, %c0_i32_76 : i32
    %206 = arith.extui %205 : i1 to i32
    %c0_i32_77 = arith.constant 0 : i32
    %207 = arith.cmpi ne, %206, %c0_i32_77 : i32
    scf.if %207 {
      %cst_151 = arith.constant dense<0xFF800000> : vector<2xf32>
      %420 = vector.multi_reduction <maximumf>, %198, %cst_151 [1] : vector<2x128xf32> to vector<2xf32>
      %421 = vector.shape_cast %420 : vector<2xf32> to vector<2x1xf32>
      %422 = vector.broadcast %421 : vector<2x1xf32> to vector<2x128xf32>
      %423 = arith.cmpf oeq, %198, %422 : vector<2x128xf32>
      %c128_i32 = arith.constant 128 : i32
      %424 = vector.broadcast %c128_i32 : i32 to vector<2x128xi32>
      %425 = arith.select %423, %11, %424 : vector<2x128xi1>, vector<2x128xi32>
      %cst_152 = arith.constant dense<2147483647> : vector<2xi32>
      %426 = vector.multi_reduction <minsi>, %425, %cst_152 [1] : vector<2x128xi32> to vector<2xi32>
      %427 = vector.shape_cast %426 : vector<2xi32> to vector<2x1xi32>
      %c0_153 = arith.constant 0 : index
      %c0_154 = arith.constant 0 : index
      %428 = vector.load %arg15[%c0_153, %c0_154] : memref<2x1xi32, #tpu.memory_space<vmem>>, vector<2x1xi32>
      tpu.vector_store %arg15[%c0_153, %c0_154], %427 {strides = array<i32>} : memref<2x1xi32, #tpu.memory_space<vmem>>, vector<2x1xi32>,
    } else {
    }
    %c6_i32_78 = arith.constant 6 : i32
    %208 = arith.muli %arg0, %c6_i32_78 : i32
    %c3_i32 = arith.constant 3 : i32
    %209 = arith.addi %208, %c3_i32 : i32
    %210 = arith.index_cast %209 : i32 to index
    %211 = memref.load %arg1[%210] : memref<7xi32, #tpu.memory_space<smem>>
    %c1_i32_79 = arith.constant 1 : i32
    %212 = arith.cmpi eq, %211, %c1_i32_79 : i32
    %c3 = arith.constant 3 : index
    %c0_80 = arith.constant 0 : index
    %c0_81 = arith.constant 0 : index
    %213 = vector.load %arg2[%c3, %c0_80, %c0_81] : memref<6x2x1xi32, #tpu.memory_space<vmem>>, vector<1x2x1xi32>
    %214 = vector.shape_cast %213 : vector<1x2x1xi32> to vector<2x1xi32>
    %c0_82 = arith.constant 0 : index
    %c0_83 = arith.constant 0 : index
    %215 = vector.load %arg15[%c0_82, %c0_83] : memref<2x1xi32, #tpu.memory_space<vmem>>, vector<2x1xi32>
    %216 = arith.select %212, %214, %215 : vector<2x1xi32>
    %217 = vector.broadcast %216 : vector<2x1xi32> to vector<2x128xi32>
    %218 = arith.cmpi eq, %11, %217 : vector<2x128xi32>
    %219 = arith.extui %218 : vector<2x128xi1> to vector<2x128xi32>
    %220 = arith.sitofp %219 : vector<2x128xi32> to vector<2x128xf32>
    %221 = arith.truncf %220 : vector<2x128xf32> to vector<2x128xbf16>
    %cst_84 = arith.constant dense<0.000000e+00> : vector<2x128xf32>
    %222 = tpu.matmul %221, %3, %cst_84 {dimension_numbers = #tpu.dot_dimension_numbers<[1], [0], [0], [1], [0, 0, 1, 1], [], []>} : vector<2x128xbf16>, vector<128x128xbf16>, vector<2x128xf32> -> vector<2x128xf32>
    %223 = arith.addf %222, %4 : vector<2x128xf32>
    %cst_85 = arith.constant 0.000000e+00 : f32
    %224 = vector.broadcast %cst_85 : f32 to vector<2x128xf32>
    %225 = arith.maximumf %223, %224 : vector<2x128xf32>
    %226 = arith.truncf %225 : vector<2x128xf32> to vector<2x128xbf16>
    %cst_86 = arith.constant dense<0.000000e+00> : vector<2x384xf32>
    %227 = tpu.matmul %226, %5, %cst_86 {dimension_numbers = #tpu.dot_dimension_numbers<[1], [0], [0], [1], [0, 0, 1, 1], [], []>} : vector<2x128xbf16>, vector<128x384xbf16>, vector<2x384xf32> -> vector<2x384xf32>
    %228 = vector.broadcast %6 : vector<1x384xf32> to vector<2x384xf32>
    %229 = arith.addf %227, %228 : vector<2x384xf32>
    %230 = arith.truncf %194 : vector<2x128xf32> to vector<2x128xbf16>
    %cst_87 = arith.constant dense<0.000000e+00> : vector<2x384xf32>
    %231 = tpu.matmul %230, %7, %cst_87 {dimension_numbers = #tpu.dot_dimension_numbers<[1], [0], [0], [1], [0, 0, 1, 1], [], []>} : vector<2x128xbf16>, vector<128x384xbf16>, vector<2x384xf32> -> vector<2x384xf32>
    %232 = vector.broadcast %8 : vector<1x384xf32> to vector<2x384xf32>
    %233 = arith.addf %231, %232 : vector<2x384xf32>
    %234 = vector.extract_strided_slice %229 {offsets = [0, 0], sizes = [2, 128], strides = [1, 1]} : vector<2x384xf32> to vector<2x128xf32>
    %235 = vector.extract_strided_slice %233 {offsets = [0, 0], sizes = [2, 128], strides = [1, 1]} : vector<2x384xf32> to vector<2x128xf32>
    %236 = arith.addf %234, %235 : vector<2x128xf32>
    %237 = arith.negf %236 : vector<2x128xf32>
    %238 = math.exp %237 : vector<2x128xf32>
    %cst_88 = arith.constant 1.000000e+00 : f32
    %239 = vector.broadcast %cst_88 : f32 to vector<2x128xf32>
    %240 = arith.addf %239, %238 : vector<2x128xf32>
    %241 = arith.divf %239, %240 : vector<2x128xf32>
    %242 = vector.extract_strided_slice %229 {offsets = [0, 128], sizes = [2, 128], strides = [1, 1]} : vector<2x384xf32> to vector<2x128xf32>
    %243 = vector.extract_strided_slice %233 {offsets = [0, 128], sizes = [2, 128], strides = [1, 1]} : vector<2x384xf32> to vector<2x128xf32>
    %244 = arith.addf %242, %243 : vector<2x128xf32>
    %245 = arith.negf %244 : vector<2x128xf32>
    %246 = math.exp %245 : vector<2x128xf32>
    %cst_89 = arith.constant 1.000000e+00 : f32
    %247 = vector.broadcast %cst_89 : f32 to vector<2x128xf32>
    %248 = arith.addf %247, %246 : vector<2x128xf32>
    %249 = arith.divf %247, %248 : vector<2x128xf32>
    %250 = vector.extract_strided_slice %229 {offsets = [0, 256], sizes = [2, 128], strides = [1, 1]} : vector<2x384xf32> to vector<2x128xf32>
    %251 = vector.extract_strided_slice %233 {offsets = [0, 256], sizes = [2, 128], strides = [1, 1]} : vector<2x384xf32> to vector<2x128xf32>
    %252 = arith.mulf %241, %251 : vector<2x128xf32>
    %253 = arith.addf %250, %252 : vector<2x128xf32>
    %254 = math.tanh %253 : vector<2x128xf32>
    %cst_90 = arith.constant 1.000000e+00 : f32
    %255 = vector.broadcast %cst_90 : f32 to vector<2x128xf32>
    %256 = arith.subf %255, %249 : vector<2x128xf32>
    %257 = arith.mulf %256, %254 : vector<2x128xf32>
    %258 = arith.mulf %249, %194 : vector<2x128xf32>
    %259 = arith.addf %257, %258 : vector<2x128xf32>
    %260 = arith.truncf %259 : vector<2x128xf32> to vector<2x128xbf16>
    %cst_91 = arith.constant dense<0.000000e+00> : vector<2x128xf32>
    %261 = tpu.matmul %260, %9, %cst_91 {dimension_numbers = #tpu.dot_dimension_numbers<[1], [0], [0], [1], [0, 0, 1, 1], [], []>} : vector<2x128xbf16>, vector<128x128xbf16>, vector<2x128xf32> -> vector<2x128xf32>
    %262 = vector.broadcast %10 : vector<1x128xf32> to vector<2x128xf32>
    %263 = arith.addf %261, %262 : vector<2x128xf32>
    %c3_92 = arith.constant 3 : index
    %c0_93 = arith.constant 0 : index
    %c0_94 = arith.constant 0 : index
    %264 = vector.load %arg12[%c3_92, %c0_93, %c0_94] : memref<6x2x128xf32, #tpu.memory_space<vmem>>, vector<1x2x128xf32>
    %265 = vector.shape_cast %264 : vector<1x2x128xf32> to vector<2x128xf32>
    %266 = vector.shape_cast %263 : vector<2x128xf32> to vector<1x2x128xf32>
    tpu.vector_store %arg12[%c3_92, %c0_93, %c0_94], %266 {strides = array<i32>} : memref<6x2x128xf32, #tpu.memory_space<vmem>>, vector<1x2x128xf32>,
    %c1_i32_95 = arith.constant 1 : i32
    %267 = arith.addi %209, %c1_i32_95 : i32
    %268 = arith.index_cast %267 : i32 to index
    %269 = memref.load %arg1[%268] : memref<7xi32, #tpu.memory_space<smem>>
    %c0_i32_96 = arith.constant 0 : i32
    %270 = arith.cmpi eq, %269, %c0_i32_96 : i32
    %271 = arith.extui %270 : i1 to i32
    %c0_i32_97 = arith.constant 0 : i32
    %272 = arith.cmpi ne, %271, %c0_i32_97 : i32
    scf.if %272 {
      %cst_151 = arith.constant dense<0xFF800000> : vector<2xf32>
      %420 = vector.multi_reduction <maximumf>, %263, %cst_151 [1] : vector<2x128xf32> to vector<2xf32>
      %421 = vector.shape_cast %420 : vector<2xf32> to vector<2x1xf32>
      %422 = vector.broadcast %421 : vector<2x1xf32> to vector<2x128xf32>
      %423 = arith.cmpf oeq, %263, %422 : vector<2x128xf32>
      %c128_i32 = arith.constant 128 : i32
      %424 = vector.broadcast %c128_i32 : i32 to vector<2x128xi32>
      %425 = arith.select %423, %11, %424 : vector<2x128xi1>, vector<2x128xi32>
      %cst_152 = arith.constant dense<2147483647> : vector<2xi32>
      %426 = vector.multi_reduction <minsi>, %425, %cst_152 [1] : vector<2x128xi32> to vector<2xi32>
      %427 = vector.shape_cast %426 : vector<2xi32> to vector<2x1xi32>
      %c0_153 = arith.constant 0 : index
      %c0_154 = arith.constant 0 : index
      %428 = vector.load %arg15[%c0_153, %c0_154] : memref<2x1xi32, #tpu.memory_space<vmem>>, vector<2x1xi32>
      tpu.vector_store %arg15[%c0_153, %c0_154], %427 {strides = array<i32>} : memref<2x1xi32, #tpu.memory_space<vmem>>, vector<2x1xi32>,
    } else {
    }
    %c6_i32_98 = arith.constant 6 : i32
    %273 = arith.muli %arg0, %c6_i32_98 : i32
    %c4_i32 = arith.constant 4 : i32
    %274 = arith.addi %273, %c4_i32 : i32
    %275 = arith.index_cast %274 : i32 to index
    %276 = memref.load %arg1[%275] : memref<7xi32, #tpu.memory_space<smem>>
    %c1_i32_99 = arith.constant 1 : i32
    %277 = arith.cmpi eq, %276, %c1_i32_99 : i32
    %c4 = arith.constant 4 : index
    %c0_100 = arith.constant 0 : index
    %c0_101 = arith.constant 0 : index
    %278 = vector.load %arg2[%c4, %c0_100, %c0_101] : memref<6x2x1xi32, #tpu.memory_space<vmem>>, vector<1x2x1xi32>
    %279 = vector.shape_cast %278 : vector<1x2x1xi32> to vector<2x1xi32>
    %c0_102 = arith.constant 0 : index
    %c0_103 = arith.constant 0 : index
    %280 = vector.load %arg15[%c0_102, %c0_103] : memref<2x1xi32, #tpu.memory_space<vmem>>, vector<2x1xi32>
    %281 = arith.select %277, %279, %280 : vector<2x1xi32>
    %282 = vector.broadcast %281 : vector<2x1xi32> to vector<2x128xi32>
    %283 = arith.cmpi eq, %11, %282 : vector<2x128xi32>
    %284 = arith.extui %283 : vector<2x128xi1> to vector<2x128xi32>
    %285 = arith.sitofp %284 : vector<2x128xi32> to vector<2x128xf32>
    %286 = arith.truncf %285 : vector<2x128xf32> to vector<2x128xbf16>
    %cst_104 = arith.constant dense<0.000000e+00> : vector<2x128xf32>
    %287 = tpu.matmul %286, %3, %cst_104 {dimension_numbers = #tpu.dot_dimension_numbers<[1], [0], [0], [1], [0, 0, 1, 1], [], []>} : vector<2x128xbf16>, vector<128x128xbf16>, vector<2x128xf32> -> vector<2x128xf32>
    %288 = arith.addf %287, %4 : vector<2x128xf32>
    %cst_105 = arith.constant 0.000000e+00 : f32
    %289 = vector.broadcast %cst_105 : f32 to vector<2x128xf32>
    %290 = arith.maximumf %288, %289 : vector<2x128xf32>
    %291 = arith.truncf %290 : vector<2x128xf32> to vector<2x128xbf16>
    %cst_106 = arith.constant dense<0.000000e+00> : vector<2x384xf32>
    %292 = tpu.matmul %291, %5, %cst_106 {dimension_numbers = #tpu.dot_dimension_numbers<[1], [0], [0], [1], [0, 0, 1, 1], [], []>} : vector<2x128xbf16>, vector<128x384xbf16>, vector<2x384xf32> -> vector<2x384xf32>
    %293 = vector.broadcast %6 : vector<1x384xf32> to vector<2x384xf32>
    %294 = arith.addf %292, %293 : vector<2x384xf32>
    %295 = arith.truncf %259 : vector<2x128xf32> to vector<2x128xbf16>
    %cst_107 = arith.constant dense<0.000000e+00> : vector<2x384xf32>
    %296 = tpu.matmul %295, %7, %cst_107 {dimension_numbers = #tpu.dot_dimension_numbers<[1], [0], [0], [1], [0, 0, 1, 1], [], []>} : vector<2x128xbf16>, vector<128x384xbf16>, vector<2x384xf32> -> vector<2x384xf32>
    %297 = vector.broadcast %8 : vector<1x384xf32> to vector<2x384xf32>
    %298 = arith.addf %296, %297 : vector<2x384xf32>
    %299 = vector.extract_strided_slice %294 {offsets = [0, 0], sizes = [2, 128], strides = [1, 1]} : vector<2x384xf32> to vector<2x128xf32>
    %300 = vector.extract_strided_slice %298 {offsets = [0, 0], sizes = [2, 128], strides = [1, 1]} : vector<2x384xf32> to vector<2x128xf32>
    %301 = arith.addf %299, %300 : vector<2x128xf32>
    %302 = arith.negf %301 : vector<2x128xf32>
    %303 = math.exp %302 : vector<2x128xf32>
    %cst_108 = arith.constant 1.000000e+00 : f32
    %304 = vector.broadcast %cst_108 : f32 to vector<2x128xf32>
    %305 = arith.addf %304, %303 : vector<2x128xf32>
    %306 = arith.divf %304, %305 : vector<2x128xf32>
    %307 = vector.extract_strided_slice %294 {offsets = [0, 128], sizes = [2, 128], strides = [1, 1]} : vector<2x384xf32> to vector<2x128xf32>
    %308 = vector.extract_strided_slice %298 {offsets = [0, 128], sizes = [2, 128], strides = [1, 1]} : vector<2x384xf32> to vector<2x128xf32>
    %309 = arith.addf %307, %308 : vector<2x128xf32>
    %310 = arith.negf %309 : vector<2x128xf32>
    %311 = math.exp %310 : vector<2x128xf32>
    %cst_109 = arith.constant 1.000000e+00 : f32
    %312 = vector.broadcast %cst_109 : f32 to vector<2x128xf32>
    %313 = arith.addf %312, %311 : vector<2x128xf32>
    %314 = arith.divf %312, %313 : vector<2x128xf32>
    %315 = vector.extract_strided_slice %294 {offsets = [0, 256], sizes = [2, 128], strides = [1, 1]} : vector<2x384xf32> to vector<2x128xf32>
    %316 = vector.extract_strided_slice %298 {offsets = [0, 256], sizes = [2, 128], strides = [1, 1]} : vector<2x384xf32> to vector<2x128xf32>
    %317 = arith.mulf %306, %316 : vector<2x128xf32>
    %318 = arith.addf %315, %317 : vector<2x128xf32>
    %319 = math.tanh %318 : vector<2x128xf32>
    %cst_110 = arith.constant 1.000000e+00 : f32
    %320 = vector.broadcast %cst_110 : f32 to vector<2x128xf32>
    %321 = arith.subf %320, %314 : vector<2x128xf32>
    %322 = arith.mulf %321, %319 : vector<2x128xf32>
    %323 = arith.mulf %314, %259 : vector<2x128xf32>
    %324 = arith.addf %322, %323 : vector<2x128xf32>
    %325 = arith.truncf %324 : vector<2x128xf32> to vector<2x128xbf16>
    %cst_111 = arith.constant dense<0.000000e+00> : vector<2x128xf32>
    %326 = tpu.matmul %325, %9, %cst_111 {dimension_numbers = #tpu.dot_dimension_numbers<[1], [0], [0], [1], [0, 0, 1, 1], [], []>} : vector<2x128xbf16>, vector<128x128xbf16>, vector<2x128xf32> -> vector<2x128xf32>
    %327 = vector.broadcast %10 : vector<1x128xf32> to vector<2x128xf32>
    %328 = arith.addf %326, %327 : vector<2x128xf32>
    %c4_112 = arith.constant 4 : index
    %c0_113 = arith.constant 0 : index
    %c0_114 = arith.constant 0 : index
    %329 = vector.load %arg12[%c4_112, %c0_113, %c0_114] : memref<6x2x128xf32, #tpu.memory_space<vmem>>, vector<1x2x128xf32>
    %330 = vector.shape_cast %329 : vector<1x2x128xf32> to vector<2x128xf32>
    %331 = vector.shape_cast %328 : vector<2x128xf32> to vector<1x2x128xf32>
    tpu.vector_store %arg12[%c4_112, %c0_113, %c0_114], %331 {strides = array<i32>} : memref<6x2x128xf32, #tpu.memory_space<vmem>>, vector<1x2x128xf32>,
    %c1_i32_115 = arith.constant 1 : i32
    %332 = arith.addi %274, %c1_i32_115 : i32
    %333 = arith.index_cast %332 : i32 to index
    %334 = memref.load %arg1[%333] : memref<7xi32, #tpu.memory_space<smem>>
    %c0_i32_116 = arith.constant 0 : i32
    %335 = arith.cmpi eq, %334, %c0_i32_116 : i32
    %336 = arith.extui %335 : i1 to i32
    %c0_i32_117 = arith.constant 0 : i32
    %337 = arith.cmpi ne, %336, %c0_i32_117 : i32
    scf.if %337 {
      %cst_151 = arith.constant dense<0xFF800000> : vector<2xf32>
      %420 = vector.multi_reduction <maximumf>, %328, %cst_151 [1] : vector<2x128xf32> to vector<2xf32>
      %421 = vector.shape_cast %420 : vector<2xf32> to vector<2x1xf32>
      %422 = vector.broadcast %421 : vector<2x1xf32> to vector<2x128xf32>
      %423 = arith.cmpf oeq, %328, %422 : vector<2x128xf32>
      %c128_i32 = arith.constant 128 : i32
      %424 = vector.broadcast %c128_i32 : i32 to vector<2x128xi32>
      %425 = arith.select %423, %11, %424 : vector<2x128xi1>, vector<2x128xi32>
      %cst_152 = arith.constant dense<2147483647> : vector<2xi32>
      %426 = vector.multi_reduction <minsi>, %425, %cst_152 [1] : vector<2x128xi32> to vector<2xi32>
      %427 = vector.shape_cast %426 : vector<2xi32> to vector<2x1xi32>
      %c0_153 = arith.constant 0 : index
      %c0_154 = arith.constant 0 : index
      %428 = vector.load %arg15[%c0_153, %c0_154] : memref<2x1xi32, #tpu.memory_space<vmem>>, vector<2x1xi32>
      tpu.vector_store %arg15[%c0_153, %c0_154], %427 {strides = array<i32>} : memref<2x1xi32, #tpu.memory_space<vmem>>, vector<2x1xi32>,
    } else {
    }
    %c6_i32_118 = arith.constant 6 : i32
    %338 = arith.muli %arg0, %c6_i32_118 : i32
    %c5_i32 = arith.constant 5 : i32
    %339 = arith.addi %338, %c5_i32 : i32
    %340 = arith.index_cast %339 : i32 to index
    %341 = memref.load %arg1[%340] : memref<7xi32, #tpu.memory_space<smem>>
    %c1_i32_119 = arith.constant 1 : i32
    %342 = arith.cmpi eq, %341, %c1_i32_119 : i32
    %c5 = arith.constant 5 : index
    %c0_120 = arith.constant 0 : index
    %c0_121 = arith.constant 0 : index
    %343 = vector.load %arg2[%c5, %c0_120, %c0_121] : memref<6x2x1xi32, #tpu.memory_space<vmem>>, vector<1x2x1xi32>
    %344 = vector.shape_cast %343 : vector<1x2x1xi32> to vector<2x1xi32>
    %c0_122 = arith.constant 0 : index
    %c0_123 = arith.constant 0 : index
    %345 = vector.load %arg15[%c0_122, %c0_123] : memref<2x1xi32, #tpu.memory_space<vmem>>, vector<2x1xi32>
    %346 = arith.select %342, %344, %345 : vector<2x1xi32>
    %347 = vector.broadcast %346 : vector<2x1xi32> to vector<2x128xi32>
    %348 = arith.cmpi eq, %11, %347 : vector<2x128xi32>
    %349 = arith.extui %348 : vector<2x128xi1> to vector<2x128xi32>
    %350 = arith.sitofp %349 : vector<2x128xi32> to vector<2x128xf32>
    %351 = arith.truncf %350 : vector<2x128xf32> to vector<2x128xbf16>
    %cst_124 = arith.constant dense<0.000000e+00> : vector<2x128xf32>
    %352 = tpu.matmul %351, %3, %cst_124 {dimension_numbers = #tpu.dot_dimension_numbers<[1], [0], [0], [1], [0, 0, 1, 1], [], []>} : vector<2x128xbf16>, vector<128x128xbf16>, vector<2x128xf32> -> vector<2x128xf32>
    %353 = arith.addf %352, %4 : vector<2x128xf32>
    %cst_125 = arith.constant 0.000000e+00 : f32
    %354 = vector.broadcast %cst_125 : f32 to vector<2x128xf32>
    %355 = arith.maximumf %353, %354 : vector<2x128xf32>
    %356 = arith.truncf %355 : vector<2x128xf32> to vector<2x128xbf16>
    %cst_126 = arith.constant dense<0.000000e+00> : vector<2x384xf32>
    %357 = tpu.matmul %356, %5, %cst_126 {dimension_numbers = #tpu.dot_dimension_numbers<[1], [0], [0], [1], [0, 0, 1, 1], [], []>} : vector<2x128xbf16>, vector<128x384xbf16>, vector<2x384xf32> -> vector<2x384xf32>
    %358 = vector.broadcast %6 : vector<1x384xf32> to vector<2x384xf32>
    %359 = arith.addf %357, %358 : vector<2x384xf32>
    %360 = arith.truncf %324 : vector<2x128xf32> to vector<2x128xbf16>
    %cst_127 = arith.constant dense<0.000000e+00> : vector<2x384xf32>
    %361 = tpu.matmul %360, %7, %cst_127 {dimension_numbers = #tpu.dot_dimension_numbers<[1], [0], [0], [1], [0, 0, 1, 1], [], []>} : vector<2x128xbf16>, vector<128x384xbf16>, vector<2x384xf32> -> vector<2x384xf32>
    %362 = vector.broadcast %8 : vector<1x384xf32> to vector<2x384xf32>
    %363 = arith.addf %361, %362 : vector<2x384xf32>
    %364 = vector.extract_strided_slice %359 {offsets = [0, 0], sizes = [2, 128], strides = [1, 1]} : vector<2x384xf32> to vector<2x128xf32>
    %365 = vector.extract_strided_slice %363 {offsets = [0, 0], sizes = [2, 128], strides = [1, 1]} : vector<2x384xf32> to vector<2x128xf32>
    %366 = arith.addf %364, %365 : vector<2x128xf32>
    %367 = arith.negf %366 : vector<2x128xf32>
    %368 = math.exp %367 : vector<2x128xf32>
    %cst_128 = arith.constant 1.000000e+00 : f32
    %369 = vector.broadcast %cst_128 : f32 to vector<2x128xf32>
    %370 = arith.addf %369, %368 : vector<2x128xf32>
    %371 = arith.divf %369, %370 : vector<2x128xf32>
    %372 = vector.extract_strided_slice %359 {offsets = [0, 128], sizes = [2, 128], strides = [1, 1]} : vector<2x384xf32> to vector<2x128xf32>
    %373 = vector.extract_strided_slice %363 {offsets = [0, 128], sizes = [2, 128], strides = [1, 1]} : vector<2x384xf32> to vector<2x128xf32>
    %374 = arith.addf %372, %373 : vector<2x128xf32>
    %375 = arith.negf %374 : vector<2x128xf32>
    %376 = math.exp %375 : vector<2x128xf32>
    %cst_129 = arith.constant 1.000000e+00 : f32
    %377 = vector.broadcast %cst_129 : f32 to vector<2x128xf32>
    %378 = arith.addf %377, %376 : vector<2x128xf32>
    %379 = arith.divf %377, %378 : vector<2x128xf32>
    %380 = vector.extract_strided_slice %359 {offsets = [0, 256], sizes = [2, 128], strides = [1, 1]} : vector<2x384xf32> to vector<2x128xf32>
    %381 = vector.extract_strided_slice %363 {offsets = [0, 256], sizes = [2, 128], strides = [1, 1]} : vector<2x384xf32> to vector<2x128xf32>
    %382 = arith.mulf %371, %381 : vector<2x128xf32>
    %383 = arith.addf %380, %382 : vector<2x128xf32>
    %384 = math.tanh %383 : vector<2x128xf32>
    %cst_130 = arith.constant 1.000000e+00 : f32
    %385 = vector.broadcast %cst_130 : f32 to vector<2x128xf32>
    %386 = arith.subf %385, %379 : vector<2x128xf32>
    %387 = arith.mulf %386, %384 : vector<2x128xf32>
    %388 = arith.mulf %379, %324 : vector<2x128xf32>
    %389 = arith.addf %387, %388 : vector<2x128xf32>
    %390 = arith.truncf %389 : vector<2x128xf32> to vector<2x128xbf16>
    %cst_131 = arith.constant dense<0.000000e+00> : vector<2x128xf32>
    %391 = tpu.matmul %390, %9, %cst_131 {dimension_numbers = #tpu.dot_dimension_numbers<[1], [0], [0], [1], [0, 0, 1, 1], [], []>} : vector<2x128xbf16>, vector<128x128xbf16>, vector<2x128xf32> -> vector<2x128xf32>
    %392 = vector.broadcast %10 : vector<1x128xf32> to vector<2x128xf32>
    %393 = arith.addf %391, %392 : vector<2x128xf32>
    %c5_132 = arith.constant 5 : index
    %c0_133 = arith.constant 0 : index
    %c0_134 = arith.constant 0 : index
    %394 = vector.load %arg12[%c5_132, %c0_133, %c0_134] : memref<6x2x128xf32, #tpu.memory_space<vmem>>, vector<1x2x128xf32>
    %395 = vector.shape_cast %394 : vector<1x2x128xf32> to vector<2x128xf32>
    %396 = vector.shape_cast %393 : vector<2x128xf32> to vector<1x2x128xf32>
    tpu.vector_store %arg12[%c5_132, %c0_133, %c0_134], %396 {strides = array<i32>} : memref<6x2x128xf32, #tpu.memory_space<vmem>>, vector<1x2x128xf32>,
    %c1_i32_135 = arith.constant 1 : i32
    %397 = arith.addi %339, %c1_i32_135 : i32
    %398 = arith.index_cast %397 : i32 to index
    %399 = memref.load %arg1[%398] : memref<7xi32, #tpu.memory_space<smem>>
    %c0_i32_136 = arith.constant 0 : i32
    %400 = arith.cmpi eq, %399, %c0_i32_136 : i32
    %401 = arith.extui %400 : i1 to i32
    %c0_i32_137 = arith.constant 0 : i32
    %402 = arith.cmpi ne, %401, %c0_i32_137 : i32
    scf.if %402 {
      %cst_151 = arith.constant dense<0xFF800000> : vector<2xf32>
      %420 = vector.multi_reduction <maximumf>, %393, %cst_151 [1] : vector<2x128xf32> to vector<2xf32>
      %421 = vector.shape_cast %420 : vector<2xf32> to vector<2x1xf32>
      %422 = vector.broadcast %421 : vector<2x1xf32> to vector<2x128xf32>
      %423 = arith.cmpf oeq, %393, %422 : vector<2x128xf32>
      %c128_i32 = arith.constant 128 : i32
      %424 = vector.broadcast %c128_i32 : i32 to vector<2x128xi32>
      %425 = arith.select %423, %11, %424 : vector<2x128xi1>, vector<2x128xi32>
      %cst_152 = arith.constant dense<2147483647> : vector<2xi32>
      %426 = vector.multi_reduction <minsi>, %425, %cst_152 [1] : vector<2x128xi32> to vector<2xi32>
      %427 = vector.shape_cast %426 : vector<2xi32> to vector<2x1xi32>
      %c0_153 = arith.constant 0 : index
      %c0_154 = arith.constant 0 : index
      %428 = vector.load %arg15[%c0_153, %c0_154] : memref<2x1xi32, #tpu.memory_space<vmem>>, vector<2x1xi32>
      tpu.vector_store %arg15[%c0_153, %c0_154], %427 {strides = array<i32>} : memref<2x1xi32, #tpu.memory_space<vmem>>, vector<2x1xi32>,
    } else {
    }
    %c0_138 = arith.constant 0 : index
    %c0_139 = arith.constant 0 : index
    %403 = vector.load %arg14[%c0_138, %c0_139] : memref<2x128xf32, #tpu.memory_space<vmem>>, vector<2x128xf32>
    tpu.vector_store %arg14[%c0_138, %c0_139], %389 {strides = array<i32>} : memref<2x128xf32, #tpu.memory_space<vmem>>, vector<2x128xf32>,
    %c0_140 = arith.constant 0 : index
    %c0_141 = arith.constant 0 : index
    %c0_142 = arith.constant 0 : index
    %404 = vector.load %arg13[%c0_140, %c0_141, %c0_142] : memref<1x2x128xf32, #tpu.memory_space<vmem>>, vector<1x2x128xf32>
    %405 = vector.shape_cast %404 : vector<1x2x128xf32> to vector<2x128xf32>
    %406 = vector.shape_cast %389 : vector<2x128xf32> to vector<1x2x128xf32>
    tpu.vector_store %arg13[%c0_140, %c0_141, %c0_142], %406 {strides = array<i32>} : memref<1x2x128xf32, #tpu.memory_space<vmem>>, vector<1x2x128xf32>,
    %c0_143 = arith.constant 0 : index
    %c0_144 = arith.constant 0 : index
    %c0_145 = arith.constant 0 : index
    %407 = vector.load %arg12[%c0_143, %c0_144, %c0_145] : memref<6x2x128xf32, #tpu.memory_space<vmem>>, vector<6x2x128xf32>
    %cst_146 = arith.constant dense<0xFF800000> : vector<6x2xf32>
    %408 = vector.multi_reduction <maximumf>, %407, %cst_146 [2] : vector<6x2x128xf32> to vector<6x2xf32>
    %409 = vector.shape_cast %408 : vector<6x2xf32> to vector<6x2x1xf32>
    %410 = vector.broadcast %409 : vector<6x2x1xf32> to vector<6x2x128xf32>
    %411 = arith.subf %407, %410 : vector<6x2x128xf32>
    %412 = math.exp %411 : vector<6x2x128xf32>
    %cst_147 = arith.constant dense<0.000000e+00> : vector<6x2xf32>
    %413 = vector.multi_reduction <add>, %412, %cst_147 [2] : vector<6x2x128xf32> to vector<6x2xf32>
    %414 = vector.shape_cast %413 : vector<6x2xf32> to vector<6x2x1xf32>
    %415 = math.log %414 : vector<6x2x1xf32>
    %416 = arith.addf %409, %415 : vector<6x2x1xf32>
    %417 = vector.broadcast %416 : vector<6x2x1xf32> to vector<6x2x128xf32>
    %418 = arith.subf %407, %417 : vector<6x2x128xf32>
    %c0_148 = arith.constant 0 : index
    %c0_149 = arith.constant 0 : index
    %c0_150 = arith.constant 0 : index
    %419 = vector.load %arg12[%c0_148, %c0_149, %c0_150] : memref<6x2x128xf32, #tpu.memory_space<vmem>>, vector<6x2x128xf32>
    tpu.vector_store %arg12[%c0_148, %c0_149, %c0_150], %418 {strides = array<i32>} : memref<6x2x128xf32, #tpu.memory_space<vmem>>, vector<6x2x128xf32>,
    return
  }
  func.func @transform_0(%arg0: i32, %arg1: memref<7xi32, #tpu.memory_space<smem>>) -> (i32, i32, i32) {
    %c0_i32 = arith.constant 0 : i32
    %c0_i32_0 = arith.constant 0 : i32
    %c0_i32_1 = arith.constant 0 : i32
    return %arg0, %c0_i32, %c0_i32_0 : i32, i32, i32
  }
  func.func @transform_1(%arg0: i32, %arg1: memref<7xi32, #tpu.memory_space<smem>>) -> (i32, i32, i32) {
    %c0_i32 = arith.constant 0 : i32
    %c0_i32_0 = arith.constant 0 : i32
    %c0_i32_1 = arith.constant 0 : i32
    %c0_i32_2 = arith.constant 0 : i32
    return %c0_i32, %c0_i32_0, %c0_i32_1 : i32, i32, i32
  }
  func.func @transform_2(%arg0: i32, %arg1: memref<7xi32, #tpu.memory_space<smem>>) -> (i32, i32) {
    %c0_i32 = arith.constant 0 : i32
    %c0_i32_0 = arith.constant 0 : i32
    %c0_i32_1 = arith.constant 0 : i32
    return %c0_i32, %c0_i32_0 : i32, i32
  }
  func.func @transform_3(%arg0: i32, %arg1: memref<7xi32, #tpu.memory_space<smem>>) -> (i32, i32) {
    %c0_i32 = arith.constant 0 : i32
    %c0_i32_0 = arith.constant 0 : i32
    %c0_i32_1 = arith.constant 0 : i32
    return %c0_i32, %c0_i32_0 : i32, i32
  }
  func.func @transform_4(%arg0: i32, %arg1: memref<7xi32, #tpu.memory_space<smem>>) -> (i32, i32) {
    %c0_i32 = arith.constant 0 : i32
    %c0_i32_0 = arith.constant 0 : i32
    %c0_i32_1 = arith.constant 0 : i32
    return %c0_i32, %c0_i32_0 : i32, i32
  }
  func.func @transform_5(%arg0: i32, %arg1: memref<7xi32, #tpu.memory_space<smem>>) -> (i32, i32) {
    %c0_i32 = arith.constant 0 : i32
    %c0_i32_0 = arith.constant 0 : i32
    %c0_i32_1 = arith.constant 0 : i32
    return %c0_i32, %c0_i32_0 : i32, i32
  }
  func.func @transform_6(%arg0: i32, %arg1: memref<7xi32, #tpu.memory_space<smem>>) -> (i32, i32) {
    %c0_i32 = arith.constant 0 : i32
    %c0_i32_0 = arith.constant 0 : i32
    %c0_i32_1 = arith.constant 0 : i32
    return %c0_i32, %c0_i32_0 : i32, i32
  }
  func.func @transform_7(%arg0: i32, %arg1: memref<7xi32, #tpu.memory_space<smem>>) -> (i32, i32) {
    %c0_i32 = arith.constant 0 : i32
    %c0_i32_0 = arith.constant 0 : i32
    %c0_i32_1 = arith.constant 0 : i32
    return %c0_i32, %c0_i32_0 : i32, i32
  }
  func.func @transform_8(%arg0: i32, %arg1: memref<7xi32, #tpu.memory_space<smem>>) -> (i32, i32) {
    %c0_i32 = arith.constant 0 : i32
    %c0_i32_0 = arith.constant 0 : i32
    %c0_i32_1 = arith.constant 0 : i32
    return %c0_i32, %c0_i32_0 : i32, i32
  }
  func.func @transform_9(%arg0: i32, %arg1: memref<7xi32, #tpu.memory_space<smem>>) -> (i32, i32) {
    %c0_i32 = arith.constant 0 : i32
    %c0_i32_0 = arith.constant 0 : i32
    %c0_i32_1 = arith.constant 0 : i32
    return %c0_i32, %c0_i32_0 : i32, i32
  }
  func.func @transform_10(%arg0: i32, %arg1: memref<7xi32, #tpu.memory_space<smem>>) -> (i32, i32, i32) {
    %c0_i32 = arith.constant 0 : i32
    %c0_i32_0 = arith.constant 0 : i32
    %c0_i32_1 = arith.constant 0 : i32
    return %arg0, %c0_i32, %c0_i32_0 : i32, i32, i32
  }
  func.func @transform_11(%arg0: i32, %arg1: memref<7xi32, #tpu.memory_space<smem>>) -> (i32, i32, i32) {
    %c0_i32 = arith.constant 0 : i32
    %c0_i32_0 = arith.constant 0 : i32
    %c0_i32_1 = arith.constant 0 : i32
    %c0_i32_2 = arith.constant 0 : i32
    return %c0_i32, %c0_i32_0, %c0_i32_1 : i32, i32, i32
  }
}

</mosaic_0001>

<bundles_post_ra>
// kernel: tpu_custom_call.1
= control target key start
LH: loop header
LB: loop body
LE: loop exit
PB: predicated region body
PF: predicated region fallthrough
CT: control target
= control target key end

     0   :  { %s4884_s0 = inlined_call_operand.vmem [shape: s32[7], index: 0, kind: input, shape index: {}]   ;;  %s4885_s1 = inlined_call_operand.vmem [shape: s32[6,2,1], index: 1, kind: input, shape index: {}]   ;;  %s4886_s2 = inlined_call_operand.vmem [shape: f32[1,2,128], index: 2, kind: input, shape index: {}]   ;;  %s4887_s3 = inlined_call_operand.hbm [shape: bf16[128,128], index: 3, kind: input, shape index: {}]   ;;  %s4888_s4 = inlined_call_operand.vmem [shape: f32[2,128], index: 4, kind: input, shape index: {}]   ;;  %s4889_s5 = inlined_call_operand.hbm [shape: bf16[128,384], index: 5, kind: input, shape index: {}]   ;;  %s4890_s6 = inlined_call_operand.vmem [shape: f32[1,384], index: 6, kind: input, shape index: {}]   ;;  %s4891_s7 = inlined_call_operand.hbm [shape: bf16[128,384], index: 7, kind: input, shape index: {}]   ;;  %s4892_s8 = inlined_call_operand.vmem [shape: f32[1,384], index: 8, kind: input, shape index: {}]   ;;  %s4893_s9 = inlined_call_operand.hbm [shape: bf16[128,128], index: 9, kind: input, shape index: {}]   ;;  %s4894_s10 = inlined_call_operand.vmem [shape: f32[1,128], index: 10, kind: input, shape index: {}]   ;;  %s4895_s11 = inlined_call_operand.hbm [shape: f32[6,2,128], index: 11, kind: output, shape index: {0}]   ;;  %s4896_s12 = inlined_call_operand.hbm [shape: f32[1,2,128], index: 12, kind: output, shape index: {1}]  }
   0x1   :  { %s18_s23 = sshll.u32 %s4884_s0, 4  ;;  %s19_s23 = int_to_ptr.vmem [resolvable:$true] %s18_s23 }
   0x2   :  { %s3608_s24 = scalar_lea.vmem %s19_s23, 16  ;;  %p3613_p1 = scmp.lt.s32.totalorder %s19_s23, %s19_s23 }
   0x3   :  { %p3609_p0 = scmp.ne.s32.totalorder %s19_s23, %s3608_s24  ;;  %p3614_p2 = scmp.lt.s32.totalorder %s3608_s24, %s3608_s24 }
   0x5   :  { %p3615_p3 = por %p3614_p2, %p3613_p1 }
   0x7   :  { %p3616_p4 = pnand %p3615_p3, %p3609_p0 }
   0x9   :  { %3619 = shalt.err (!%p3616_p4)  }
   0xa   :  { %s3752_s25 = smov [#allocation5]  }
   0xb   :  { %21 = dma.vmem_to_smem %s19_s23, 16, %s3752_s25, [#allocation4] }
   0xc   :  { %3740 = dma.done.wait [#allocation4], 16 }
   0xd   :  { %3741 = vsyncadd [#allocation4], 4294967280 }
   0xe   :  { %23 = sfence }
   0xf   :  { %24 = vsyncpa [#allocation7], 0 }
  0x10   :  { %25 = vsyncpa [#allocation10], 0 }
  0x11   :  { %26 = vsyncpa [#allocation13], 0 }
  0x12   :  { %27 = vsyncpa [#allocation8], 0 }
  0x13   :  { %28 = vsyncpa [#allocation16], 0  ;;  %s3753_s26 = smov [#allocation9]  }
  0x14   :  { %s52_s0 = sshll.u32 %s3753_s26, 4  ;;  %s53_s0 = int_to_ptr.vmem [resolvable:$true] %s52_s0 }
  0x15   :  { %s3628_s27 = scalar_lea.vmem %s53_s0, 3072  ;;  %p3633_p6 = scmp.lt.s32.totalorder %s53_s0, %s53_s0 }
  0x16   :  { %p3629_p5 = scmp.ne.s32.totalorder %s53_s0, %s3628_s27  ;;  %p3634_p7 = scmp.lt.s32.totalorder %s3628_s27, %s3628_s27 }
  0x18   :  { %p3635_p8 = por %p3634_p7, %p3633_p6 }
  0x1a   :  { %p3636_p9 = pnand %p3635_p8, %p3629_p5 }
  0x1c   :  { %3639 = shalt.err (!%p3636_p9)
}
  0x1d   :  { %s3754_s28 = smov 192   ;;  %s3755_s29 = smov 12  }
  0x1e   :  { %58 = dma.hbm_to_vmem [thread:$0]  %s4889_s5, 3072, %s53_s0, [#allocation10], %s3754_s28, %s3754_s28, %s3755_s29  }
  0x1f   :  { %s3756_s14 = smov [#allocation6]  }
  0x20   :  { %s38_s15 = sshll.u32 %s3756_s14, 4  ;;  %s39_s15 = int_to_ptr.vmem [resolvable:$true] %s38_s15 }
  0x21   :  { %s3648_s16 = scalar_lea.vmem %s39_s15, 1024  ;;  %p3653_p11 = scmp.lt.s32.totalorder %s39_s15, %s39_s15 }
  0x22   :  { %p3649_p10 = scmp.ne.s32.totalorder %s39_s15, %s3648_s16  ;;  %p3654_p12 = scmp.lt.s32.totalorder %s3648_s16, %s3648_s16 }
  0x24   :  { %p3655_p13 = por %p3654_p12, %p3653_p11 }
  0x26   :  { %p3656_p0 = pnand %p3655_p13, %p3649_p10 }
  0x28   :  { %3659 = shalt.err (!%p3656_p0)
}
  0x29   :  { %s3757_s17 = smov 64   ;;  %s3758_s18 = smov 4  }
  0x2a   :  { %44 = dma.hbm_to_vmem [thread:$0]  %s4887_s3, 1024, %s39_s15, [#allocation7], %s3757_s17, %s3757_s17, %s3758_s18  }
  0x2b   :  { %s3759_s21 = smov [#allocation11]   ;;  %s3760_s23 = smov [#allocation12]  }
  0x2c   :  { %s66_s22 = sshll.u32 %s3759_s21, 4  ;;  %s80_s5 = sshll.u32 %s3760_s23, 4  ;;  %s67_s22 = int_to_ptr.vmem [resolvable:$true] %s66_s22  ;;  %s81_s5 = int_to_ptr.vmem [resolvable:$true] %s80_s5 }
  0x2d   :  { %s3668_s24 = scalar_lea.vmem %s67_s22, 3072  ;;  %p3673_p2 = scmp.lt.s32.totalorder %s67_s22, %s67_s22 }
  0x2e   :  { %p3669_p1 = scmp.ne.s32.totalorder %s67_s22, %s3668_s24  ;;  %p3674_p3 = scmp.lt.s32.totalorder %s3668_s24, %s3668_s24 }
  0x30   :  { %p3675_p4 = por %p3674_p3, %p3673_p2 }
  0x32   :  { %p3676_p5 = pnand %p3675_p4, %p3669_p1 }
  0x34   :  { %3679 = shalt.err (!%p3676_p5)
}
  0x35   :  { %72 = dma.hbm_to_vmem [thread:$0]  %s4891_s7, 3072, %s67_s22, [#allocation10], %s3754_s28, %s3754_s28, %s3755_s29  }
  0x36   :  { %s3688_s3 = scalar_lea.vmem %s81_s5, 1024  ;;  %p3693_p7 = scmp.lt.s32.totalorder %s81_s5, %s81_s5 }
  0x37   :  { %p3689_p6 = scmp.ne.s32.totalorder %s81_s5, %s3688_s3  ;;  %p3694_p8 = scmp.lt.s32.totalorder %s3688_s3, %s3688_s3 }
  0x39   :  { %p3695_p9 = por %p3694_p8, %p3693_p7 }
  0x3b   :  { %p3696_p10 = pnand %p3695_p9, %p3689_p6 }
  0x3d   :  { %3699 = shalt.err (!%p3696_p10)
}
  0x3e   :  { %86 = dma.hbm_to_vmem [thread:$0]  %s4893_s9, 1024, %s81_s5, [#allocation13], %s3757_s17, %s3757_s17, %s3758_s18  }
  0x3f   :  { %3742 = dma.done.wait [#allocation7], 1024  }
  0x40   :  { %3743 = vsyncadd [#allocation7], 4294966272 }
  0x41   :  { %3744 = dma.done.wait [#allocation10], 6144  }
  0x42   :  { %3745 = vsyncadd [#allocation10], 4294961152 }
  0x43   :  { %3746 = dma.done.wait [#allocation13], 1024  }
  0x44   :  { %3747 = vsyncadd [#allocation13], 4294966272  ;;  %s3855_s30 = sld [smem:[#allocation5 + $0x1]]  ;;  %v4898_v0 = vmov 0   ;;  %v4921_v1 = vmov 0.0   ;;  %vm109_vm0 = vcmask 1024   ;;  %v4904_v29 = vlaneseq }
  0x45   :  { %3438 = vset.pattern.permute.xlu0 %v4898_v0  ;;  %2941 = vmatprep.subr.bf16.mxu0 %v4921_v1  ;;  %s215_s7 = sld [smem:[#allocation5]]  ;;  %v108_v2 = vld [vmem:[%s4885_s1] sm:$0x3]  ;;  %v3867_v4 = vld [vmem:[#allocation6 + $0x30] sm:$0xff]   ;;  %v3874_v7 = vld [vmem:[#allocation6 + $0x28] sm:$0xff]   ;;  %vm3763_vm2 = vmmov 0  }
  0x46   :  { %496 = vmatprep.mubr.bf16.mxu1 %v4898_v0  ;;  %110 = vst.msk [vmem:[#allocation3] sm:$0x3] %vm109_vm0, %v108_v2  ;;  %v3864_v3 = vld [vmem:[#allocation6 + $0x38] sm:$0xff]   ;;  %2957 = vmatprep.mubr.msk.bf16.mxu0 %vm3763_vm2, %v4921_v1  ;;  %v3881_v11 = vld [vmem:[#allocation9 + $0xa8] ss:$12 sps:$4 sm:$0xff]   ;;  %v3884_v12 = vld [vmem:[#allocation6 + $0x20] sm:$0xff]  }
  0x47   :  { %2942 = vmatpush3.bf16.msra.mxu0 %v3864_v3  ;;  %v217_v5 = vld [vmem:[%s4885_s1] sm:$0x3]  ;;  %v3879_v10 = vld [vmem:[#allocation9 + $0xac] ss:$12 sps:$4 sm:$0xff]   ;;  %v3889_v13 = vld [vmem:[#allocation9 + $0x94] ss:$12 sps:$4 sm:$0xff]  }
  0x48   :  { %2943 = vmatprep.subr.bf16.mxu0 %v4921_v1  ;;  %464 = vmatprep.subr.bf16.mxu1 %v3879_v10  ;;  %v3891_v14 = vld [vmem:[#allocation9 + $0x90] ss:$12 sps:$4 sm:$0xff]   ;;  %v3899_v17 = vld [vmem:[#allocation9 + $0x78] ss:$12 sps:$4 sm:$0xff]   ;;  %v3908_v20 = vld [vmem:[#allocation9 + $0x60] ss:$12 sps:$4 sm:$0xff]  }
  0x49   :  { %465 = vmatpush1.bf16.msra.mxu1 %v3881_v11  ;;  %v3893_v15 = vld [vmem:[#allocation6 + $0x18] sm:$0xff]   ;;  %v3903_v18 = vld [vmem:[#allocation6 + $0x10] sm:$0xff]   ;;  %v3913_v21 = vld [vmem:[#allocation6 + $0x8] sm:$0xff]   ;;  %v3944_v30 = vand.u32 127, %v4904_v29  ;;  %v4897_v33 = vmov 1.0|1.0  }
  0x4a   :  { %466 = vmatprep.subr.bf16.mxu1 %v3889_v13  ;;  %v3896_v16 = vld [vmem:[#allocation9 + $0x7c] ss:$12 sps:$4 sm:$0xff]   ;;  %v3906_v19 = vld [vmem:[#allocation9 + $0x64] ss:$12 sps:$4 sm:$0xff]   ;;  %v3916_v22 = vld [vmem:[#allocation9 + $0x4c] ss:$12 sps:$4 sm:$0xff]  }
  0x4b   :  { %p216_p11 = scmp.eq.s32.totalorder %s215_s7, 1  ;;  %2944 = vmatpush3.bf16.msra.mxu0 %v3867_v4  ;;  %v3918_v23 = vld [vmem:[#allocation9 + $0x48] ss:$12 sps:$4 sm:$0xff]   ;;  %v3923_v24 = vld [vmem:[#allocation6] sm:$0xff]   ;;  %v3928_v26 = vld [vmem:[#allocation9 + $0x30] ss:$12 sps:$4 sm:$0xff]  }
  0x4c   :  { %2945 = vmatprep.subr.bf16.mxu0 %v4921_v1  ;;  %v3926_v25 = vld [vmem:[#allocation9 + $0x34] ss:$12 sps:$4 sm:$0xff]   ;;  %v3934_v27 = vld [vmem:[#allocation9 + $0x1c] ss:$12 sps:$4 sm:$0xff]   ;;  %v3936_v28 = vld [vmem:[#allocation9 + $0x18] ss:$12 sps:$4 sm:$0xff]  }
  0x4d   :  { %s219_s29 = scalar_select %p216_p11, 1, 0  ;;  %v218_v8 = vld [vmem:[#allocation3] sm:$0x3]  ;;  %467 = vmatpush1.bf16.msra.mxu1 %v3891_v14  ;;  %v3951_v34 = vld [vmem:[#allocation9 + $0x98] ss:$12 sps:$4 sm:$0xff]  }
  0x4e   :  { %468 = vmatprep.subr.bf16.mxu1 %v3896_v16  ;;  %v3946_v32 = vld [vmem:[#allocation9 + $0xb0] ss:$12 sps:$4 sm:$0xff]   ;;  %v3957_v35 = vld [vmem:[#allocation9 + $0x80] ss:$12 sps:$4 sm:$0xff]   ;;  %v3961_v36 = vld [vmem:[#allocation9 + $0x68] ss:$12 sps:$4 sm:$0xff]  }
  0x4f   :  { %v220_v6 = vstv %s219_s29  ;;  %2946 = vmatpush3.bf16.msra.mxu0 %v3874_v7  ;;  %v3965_v37 = vld [vmem:[#allocation9 + $0x50] ss:$12 sps:$4 sm:$0xff]   ;;  %v3969_v38 = vld [vmem:[#allocation9 + $0x38] ss:$12 sps:$4 sm:$0xff]   ;;  %v3974_v39 = vld [vmem:[#allocation9 + $0x20] ss:$12 sps:$4 sm:$0xff]  }
  0x50   :  { %vm221_vm1 = vcmp.eq.s32.totalorder %v220_v6, 1  ;;  %2947 = vmatprep.subr.bf16.mxu0 %v4921_v1  ;;  %v3977_v40 = vld [vmem:[#allocation9 + $0x4] ss:$12 sps:$4 sm:$0xff]   ;;  %v3979_v41 = vld [vmem:[#allocation9] ss:$12 sps:$4 sm:$0xff]   ;;  %p2679_p12 = scmp.ne.s32.totalorder %s3855_s30, 0 }
  0x51   :  { %v222_v9 = vsel %vm221_vm1, %v217_v5, %v218_v8  ;;  %469 = vmatpush1.bf16.msra.mxu1 %v3899_v17  ;;  %v3983_v42 = vld [vmem:[#allocation9 + $0x8] ss:$12 sps:$4 sm:$0xff]   ;;  %v3987_v43 = vld [vmem:[#allocation11 + $0xac] ss:$12 sps:$4 sm:$0xff]   ;;  %v106_v44 = vld [vmem:[%s4886_s2] sm:$0x3] }
  0x52   :  { %224 = vperm.xlu0 %3438, %v222_v9   ;;  %470 = vmatprep.subr.bf16.mxu1 %v3906_v19  ;;  %107 = vst [vmem:[#allocation2] sm:$0x3] %v106_v44  ;;  %v3997_v45 = vld [vmem:[%s4888_s4] sm:$0x3]  ;;  %v4000_v51 = vld [vmem:[#allocation11 + $0xa8] ss:$12 sps:$4 sm:$0xff]  }
  0x53   :  { %2948 = vmatpush3.bf16.msra.mxu0 %v3884_v12  ;;  %v4002_v52 = vld [vmem:[#allocation11 + $0xb0] ss:$12 sps:$4 sm:$0xff]   ;;  %v4004_v54 = vld [vmem:[#allocation11 + $0x94] ss:$12 sps:$4 sm:$0xff]   ;;  %v4010_v57 = vld [vmem:[#allocation11 + $0x98] ss:$12 sps:$4 sm:$0xff]  }
  0x54   :  { %2949 = vmatprep.subr.bf16.mxu0 %v4921_v1  ;;  %4943 = vst [vmem:[#allocation23_spill] sm:$0xff] %v4004_v54  ;;  %v4007_v56 = vld [vmem:[#allocation11 + $0x90] ss:$12 sps:$4 sm:$0xff]   ;;  %4945 = vst [vmem:[#allocation25_spill] sm:$0xff] %v4010_v57  ;;  %v4020_v59 = vld [vmem:[#allocation11 + $0x78] ss:$12 sps:$4 sm:$0xff]  }
  0x55   :  { %471 = vmatpush1.bf16.msra.mxu1 %v3908_v20  ;;  %4944 = vst [vmem:[#allocation24_spill] sm:$0xff] %v4007_v56  ;;  %v4013_v58 = vld [vmem:[#allocation11 + $0x7c] ss:$12 sps:$4 sm:$0xff]   ;;  %4947 = vst [vmem:[#allocation27_spill] sm:$0xff] %v4020_v59  ;;  %v4023_v60 = vld [vmem:[#allocation11 + $0x80] ss:$12 sps:$4 sm:$0xff]  }
  0x56   :  { %472 = vmatprep.subr.bf16.mxu1 %v3916_v22  ;;  %4946 = vst [vmem:[#allocation26_spill] sm:$0xff] %v4013_v58  ;;  %4948 = vst [vmem:[#allocation28_spill] sm:$0xff] %v4023_v60  ;;  %v4026_v61 = vld [vmem:[#allocation11 + $0x64] ss:$12 sps:$4 sm:$0xff]   ;;  %v4030_v62 = vld [vmem:[#allocation11 + $0x60] ss:$12 sps:$4 sm:$0xff]  }
  0x57   :  { %2950 = vmatpush3.bf16.msra.mxu0 %v3893_v15  ;;  %4949 = vst [vmem:[#allocation29_spill] sm:$0xff] %v4026_v61  ;;  %4950 = vst [vmem:[#allocation30_spill] sm:$0xff] %v4030_v62  ;;  %v4033_v63 = vld [vmem:[#allocation11 + $0x68] ss:$12 sps:$4 sm:$0xff]   ;;  %v4036_v2 = vld [vmem:[#allocation11 + $0x4c] ss:$12 sps:$4 sm:$0xff]  }
  0x58   :  { %2951 = vmatprep.subr.bf16.mxu0 %v4921_v1  ;;  %4951 = vst [vmem:[#allocation31_spill] sm:$0xff] %v4033_v63  ;;  %4952 = vst [vmem:[#allocation32_spill] sm:$0xff] %v4036_v2  ;;  %v4040_v5 = vld [vmem:[#allocation11 + $0x48] ss:$12 sps:$4 sm:$0xff]   ;;  %v4043_v6 = vld [vmem:[#allocation11 + $0x50] ss:$12 sps:$4 sm:$0xff]  }
  0x59   :  { %473 = vmatpush1.bf16.msra.mxu1 %v3918_v23  ;;  %4953 = vst [vmem:[#allocation33_spill] sm:$0xff] %v4040_v5  ;;  %4954 = vst [vmem:[#allocation34_spill] sm:$0xff] %v4043_v6  ;;  %v4046_v8 = vld [vmem:[#allocation11 + $0x34] ss:$12 sps:$4 sm:$0xff]   ;;  %v4050_v9 = vld [vmem:[#allocation11 + $0x30] ss:$12 sps:$4 sm:$0xff]  }
  0x5a   :  { %474 = vmatprep.subr.bf16.mxu1 %v3926_v25  ;;  %4955 = vst [vmem:[#allocation35_spill] sm:$0xff] %v4046_v8  ;;  %4956 = vst [vmem:[#allocation36_spill] sm:$0xff] %v4050_v9  ;;  %v4056_v44 = vld [vmem:[#allocation11 + $0x1c] ss:$12 sps:$4 sm:$0xff]  }
  0x5b   :  { %2952 = vmatpush3.bf16.msra.mxu0 %v3903_v18  ;;  %4958 = vst [vmem:[#allocation38_spill] sm:$0xff] %v4056_v44  ;;  %v4094_v29 = vld [vmem:[#allocation12 + $0x28] sm:$0xff]  }
  0x5c   :  { %2953 = vmatprep.subr.bf16.mxu0 %v4921_v1  ;;  %4966 = vst [vmem:[#allocation46_spill] sm:$0xff] %v4094_v29 }
  0x5d   :  { %475 = vmatpush1.bf16.msra.mxu1 %v3928_v26 }
  0x5e   :  { %476 = vmatprep.subr.bf16.mxu1 %v3934_v27 }
  0x5f   :  { %2954 = vmatpush3.bf16.msra.mxu0 %v3913_v21 }
  0x60   :  { %2955 = vmatprep.subr.bf16.mxu0 %v4921_v1 }
  0x61   :  { %477 = vmatpush1.bf16.msra.mxu1 %v3936_v28 }
  0x62   :  { %478 = vmatprep.subr.bf16.mxu1 %v3977_v40 }
  0x63   :  { %2956 = vmatpush3.bf16.msra.mxu0 %v3923_v24 }
  0x64   :  { %2961 = vmatprep.subr.bf16.mxu0 %v4921_v1 }
  0x65   :  { %479 = vmatpush1.bf16.msra.mxu1 %v3979_v41 }
  0x66   :  { %690 = vmatprep.subr.bf16.mxu1 %v3987_v43 }
  0xcd   :  { %v225_v31 = vpop.permute.xlu0 %224 }
  0xce   :  { %vm226_vm3 = vcmp.eq.s32.totalorder %v3944_v30, %v225_v31  ;;  %v4053_v31 = vld [vmem:[#allocation11 + $0x38] ss:$12 sps:$4 sm:$0xff]  }
  0xcf   :  { %vm2617_vm4 = vmpackc.low %vm226_vm3, %vm226_vm3  ;;  %4957 = vst [vmem:[#allocation37_spill] sm:$0xff] %v4053_v31 }
  0xd0   :  { %2958 = vmatmul.mubr.msk.bf16.vlgmr.msra.gmra.mxu0 %vm2617_vm4, %v4897_v33  ;;  %v4086_v33 = vld [vmem:[#allocation12 + $0x38] sm:$0xff]  }
  0xd1   :  { %2962 = vmatpush3.bf16.msra.mxu0 %v3946_v32  ;;  %2977 = vmatprep.mubr.msk.bf16.mxu0 %vm3763_vm2, %v4921_v1  ;;  %4964 = vst [vmem:[#allocation44_spill] sm:$0xff] %v4086_v33 }
  0xd2   :  { %2963 = vmatprep.subr.bf16.mxu0 %v4921_v1 }
  0xd5   :  { %2964 = vmatpush3.bf16.msra.mxu0 %v3951_v34 }
  0xd6   :  { %2965 = vmatprep.subr.bf16.mxu0 %v4921_v1 }
  0xd9   :  { %2966 = vmatpush3.bf16.msra.mxu0 %v3957_v35 }
  0xda   :  { %2967 = vmatprep.subr.bf16.mxu0 %v4921_v1 }
  0xdd   :  { %2968 = vmatpush3.bf16.msra.mxu0 %v3961_v36 }
  0xde   :  { %2969 = vmatprep.subr.bf16.mxu0 %v4921_v1 }
  0xe1   :  { %2970 = vmatpush3.bf16.msra.mxu0 %v3965_v37 }
  0xe2   :  { %2971 = vmatprep.subr.bf16.mxu0 %v4921_v1 }
  0xe5   :  { %2972 = vmatpush3.bf16.msra.mxu0 %v3969_v38 }
  0xe6   :  { %2973 = vmatprep.subr.bf16.mxu0 %v4921_v1 }
  0xe9   :  { %2974 = vmatpush3.bf16.msra.mxu0 %v3974_v39 }
  0xea   :  { %2975 = vmatprep.subr.bf16.mxu0 %v4921_v1 }
  0xed   :  { %2976 = vmatpush3.bf16.msra.mxu0 %v3983_v42 }
  0xee   :  { %2981 = vmatprep.subr.bf16.mxu0 %v4921_v1 }
 0x190   :  { %v312_v46 = vpop.f32.mrf.mxu0 }
 0x191   :  { %v313_v47 = vadd.f32 %v312_v46, %v3997_v45  ;;  %v4060_v46 = vld [vmem:[#allocation11 + $0x18] ss:$12 sps:$4 sm:$0xff]  }
 0x192   :  { %v2959_v48 = vpop.f32.mrf.mxu0  ;;  %4959 = vst [vmem:[#allocation39_spill] sm:$0xff] %v4060_v46 }
 0x193   :  { %v318_v49 = vmax.f32 %v313_v47, 0.0  ;;  %v4063_v47 = vld [vmem:[#allocation11 + $0x20] ss:$12 sps:$4 sm:$0xff]   ;;  %v4066_v48 = vld [vmem:[#allocation11 + $0x4] ss:$12 sps:$4 sm:$0xff]  }
 0x194   :  { %v315_v50 = vpop.f32.mrf.mxu0  ;;  %4960 = vst [vmem:[#allocation40_spill] sm:$0xff] %v4063_v47  ;;  %4961 = vst [vmem:[#allocation41_spill] sm:$0xff] %v4066_v48 }
 0x195   :  { %v319_v53 = vpack.c.bf16 %v318_v49, %v318_v49  ;;  %v4070_v49 = vld [vmem:[#allocation11] ss:$12 sps:$4 sm:$0xff]   ;;  %v4072_v50 = vld [vmem:[#allocation2] sm:$0x3] }
 0x196   :  { %v2960_v55 = vpop.f32.mrf.mxu0  ;;  %4962 = vst [vmem:[#allocation42_spill] sm:$0xff] %v4070_v49 }
 0x197   :  { %497 = vmatmul.mubr.bf16.vlgmr.msra.gmra.mxu1 %v319_v53  ;;  %2978 = vmatmul.mubr.bf16.vlgmr.msra.gmra.mxu0 %v319_v53  ;;  %v4075_v53 = vld [vmem:[#allocation11 + $0x8] ss:$12 sps:$4 sm:$0xff]   ;;  %v545_v55 = vpack.c.bf16 %v4072_v50, %v4072_v50 }
 0x198   :  { %691 = vmatpush1.bf16.msra.mxu1 %v4000_v51  ;;  %2982 = vmatpush3.bf16.msra.mxu0 %v4002_v52  ;;  %4963 = vst [vmem:[#allocation43_spill] sm:$0xff] %v4075_v53 }
 0x199   :  { %692 = vmatprep.subr.bf16.mxu1 %v4004_v54  ;;  %722 = vmatprep.mubr.bf16.mxu1 %v4898_v0  ;;  %v4090_v0 = vld [vmem:[#allocation12 + $0x30] sm:$0xff]  }
 0x19a   :  { %2983 = vmatprep.subr.bf16.mxu0 %v4921_v1  ;;  %2997 = vmatprep.mubr.msk.bf16.mxu0 %vm3763_vm2, %v4921_v1  ;;  %4965 = vst [vmem:[#allocation45_spill] sm:$0xff] %v4090_v0 }
 0x19c   :  { %693 = vmatpush1.bf16.msra.mxu1 %v4007_v56  ;;  %2984 = vmatpush3.bf16.msra.mxu0 %v4010_v57 }
 0x19d   :  { %694 = vmatprep.subr.bf16.mxu1 %v4013_v58  ;;  %2985 = vmatprep.subr.bf16.mxu0 %v4921_v1 }
 0x1a0   :  { %695 = vmatpush1.bf16.msra.mxu1 %v4020_v59  ;;  %2986 = vmatpush3.bf16.msra.mxu0 %v4023_v60 }
 0x1a1   :  { %696 = vmatprep.subr.bf16.mxu1 %v4026_v61  ;;  %2987 = vmatprep.subr.bf16.mxu0 %v4921_v1 }
 0x1a4   :  { %697 = vmatpush1.bf16.msra.mxu1 %v4030_v62  ;;  %2988 = vmatpush3.bf16.msra.mxu0 %v4033_v63 }
 0x1a5   :  { %698 = vmatprep.subr.bf16.mxu1 %v4036_v2  ;;  %2989 = vmatprep.subr.bf16.mxu0 %v4921_v1 }
 0x1a8   :  { %699 = vmatpush1.bf16.msra.mxu1 %v4040_v5  ;;  %2990 = vmatpush3.bf16.msra.mxu0 %v4043_v6 }
 0x1a9   :  { %700 = vmatprep.subr.bf16.mxu1 %v4046_v8  ;;  %2991 = vmatprep.subr.bf16.mxu0 %v4921_v1 }
 0x1ac   :  { %701 = vmatpush1.bf16.msra.mxu1 %v4050_v9  ;;  %2992 = vmatpush3.bf16.msra.mxu0 %v4053_v31 }
 0x1ad   :  { %702 = vmatprep.subr.bf16.mxu1 %v4056_v44  ;;  %2993 = vmatprep.subr.bf16.mxu0 %v4921_v1 }
 0x1b0   :  { %703 = vmatpush1.bf16.msra.mxu1 %v4060_v46  ;;  %2994 = vmatpush3.bf16.msra.mxu0 %v4063_v47 }
 0x1b1   :  { %704 = vmatprep.subr.bf16.mxu1 %v4066_v48  ;;  %2995 = vmatprep.subr.bf16.mxu0 %v4921_v1  ;;  %v160_v48 = vld [vmem:[%s4890_s6] sm:$0x7] }
 0x1b4   :  { %705 = vmatpush1.bf16.msra.mxu1 %v4070_v49  ;;  %2996 = vmatpush3.bf16.msra.mxu0 %v4075_v53  ;;  %v4101_v53 = vld [vmem:[#allocation12 + $0x18] sm:$0xff]  }
 0x1b5   :  { %3001 = vmatprep.subr.bf16.mxu1 %v4921_v1  ;;  %4968 = vst [vmem:[#allocation48_spill] sm:$0xff] %v4101_v53 }
 0x1b7   :  { %723 = vmatmul.mubr.bf16.vlgmr.msra.gmra.mxu1 %v545_v55  ;;  %2998 = vmatmul.mubr.bf16.vlgmr.msra.gmra.mxu0 %v545_v55  ;;  %v4098_v55 = vld [vmem:[#allocation12 + $0x20] sm:$0xff]  }
 0x1b8   :  { %3017 = vmatprep.mubr.msk.bf16.mxu1 %vm3763_vm2, %v4921_v1  ;;  %3002 = vmatpush3.bf16.msra.mxu1 %v4086_v33  ;;  %4967 = vst [vmem:[#allocation47_spill] sm:$0xff] %v4098_v55  ;;  %v4105_v33 = vld [vmem:[#allocation12 + $0x10] sm:$0xff]  }
 0x1b9   :  { %3003 = vmatprep.subr.bf16.mxu1 %v4921_v1  ;;  %4969 = vst [vmem:[#allocation49_spill] sm:$0xff] %v4105_v33 }
 0x1bc   :  { %3004 = vmatpush3.bf16.msra.mxu1 %v4090_v0  ;;  %v4109_v0 = vld [vmem:[#allocation12 + $0x8] sm:$0xff]  }
 0x1bd   :  { %3005 = vmatprep.subr.bf16.mxu1 %v4921_v1  ;;  %4970 = vst [vmem:[#allocation50_spill] sm:$0xff] %v4109_v0 }
 0x1c0   :  { %3006 = vmatpush3.bf16.msra.mxu1 %v4094_v29  ;;  %v4113_v29 = vld [vmem:[#allocation12] sm:$0xff]  }
 0x1c1   :  { %3007 = vmatprep.subr.bf16.mxu1 %v4921_v1  ;;  %4971 = vst [vmem:[#allocation51_spill] sm:$0xff] %v4113_v29 }
 0x1c4   :  { %3008 = vmatpush3.bf16.msra.mxu1 %v4098_v55  ;;  %v4972_v55 = vlaneseq }
 0x1c5   :  { %3009 = vmatprep.subr.bf16.mxu1 %v4921_v1 }
 0x1c8   :  { %3010 = vmatpush3.bf16.msra.mxu1 %v4101_v53  ;;  %v322_v53 = vshrl.u32 %v4972_v55, 7  ;;  %v193_v55 = vld [vmem:[%s4892_s8] sm:$0x7] }
 0x1c9   :  { %3011 = vmatprep.subr.bf16.mxu1 %v4921_v1 }
 0x1ca   :  { %v331_v49 = vsub.s32 2, %v322_v53  ;;  %v327_v63 = vsub.s32 1, %v322_v53 }
 0x1cc   :  { %3012 = vmatpush3.bf16.msra.mxu1 %v4105_v33  ;;  %v4121_v33 = vrot.slane %v160_v48, %v331_v49 }
 0x1cd   :  { %3013 = vmatprep.subr.bf16.mxu1 %v4921_v1 }
 0x1ce   :  { %4973 = vst [vmem:[#allocation52_spill] sm:$0xff] %v4121_v33 }
 0x1d0   :  { %3014 = vmatpush3.bf16.msra.mxu1 %v4109_v0 }
 0x1d1   :  { %3015 = vmatprep.subr.bf16.mxu1 %v4921_v1 }
 0x1d4   :  { %3016 = vmatpush3.bf16.msra.mxu1 %v4113_v29  ;;  %v323_v29 = vsub.s32 0, %v322_v53 }
 0x1d6   :  { %v4127_v5 = vrot.slane %v160_v48, %v323_v29  ;;  %v4129_v2 = vrot.slane %v193_v55, %v323_v29 }
 0x1d8   :  { %4974 = vst [vmem:[#allocation53_spill] sm:$0xff] %v4127_v5  ;;  %4975 = vst [vmem:[#allocation54_spill] sm:$0xff] %v4129_v2 }
 0x257   :  { %v498_v47 = vpop.f32.mrf.mxu1  ;;  %v539_v46 = vpop.f32.mrf.mxu0 }
 0x258   :  { %v540_v44 = vadd.f32 %v539_v46, %v4121_v33  ;;  %v499_v46 = vadd.f32 %v498_v47, %v4127_v5 }
 0x259   :  { %v500_v0 = vpop.f32.mrf.mxu1  ;;  %v2979_v31 = vpop.f32.mrf.mxu0 }
 0x25b   :  { %v502_v9 = vpop.f32.mrf.mxu1  ;;  %v542_v8 = vpop.f32.mrf.mxu0 }
 0x25c   :  { %v4133_v9 = vrot.slane %v193_v55, %v327_v63  ;;  %v4135_v8 = vrot.slane %v160_v48, %v327_v63 }
 0x25d   :  { %v503_v1 = vpop.f32.mrf.mxu1  ;;  %v2980_v6 = vpop.f32.mrf.mxu0 }
 0x25e   :  { %v501_v56 = vadd.f32 %v500_v0, %v4135_v8 }
 0x277   :  { %v724_v62 = vpop.f32.mrf.mxu1  ;;  %v765_v61 = vpop.f32.mrf.mxu0 }
 0x278   :  { %v725_v31 = vadd.f32 %v724_v62, %v4129_v2 }
 0x279   :  { %v726_v1 = vpop.f32.mrf.mxu1  ;;  %v2999_v6 = vpop.f32.mrf.mxu0 }
 0x27a   :  { %v771_v33 = vadd.f32 %v725_v31, %v499_v46  ;;  %v727_v29 = vadd.f32 %v726_v1, %v4133_v9  ;;  %v4139_v6 = vrot.slane %v193_v55, %v331_v49 }
 0x27b   :  { %v728_v60 = vpop.f32.mrf.mxu1  ;;  %v768_v59 = vpop.f32.mrf.mxu0 }
 0x27c   :  { %v2667_v58 = vmul.f32 -1.442695, %v771_v33  ;;  %v778_v47 = vadd.f32 %v727_v29, %v501_v56  ;;  %v766_v59 = vadd.f32 %v765_v61, %v4139_v6  ;;  %v4153_v61 = vld [vmem:[%s4894_s10] ss:$0 sm:$0xff] }
 0x27d   :  { %v729_v57 = vpop.f32.mrf.mxu1  ;;  %v3000_v53 = vpop.f32.mrf.mxu0 }
 0x27e   :  { %3519 = vpow2.f32 %v2667_v58  ;;  %v2668_v5 = vmul.f32 -1.442695, %v778_v47 }
 0x280   :  { %3521 = vpow2.f32 %v2668_v5 }
 0x28b   :  { %v3520_v62 = vpop.eup %3519 }
 0x28c   :  { %v775_v2 = vadd.f32 1.0, %v3520_v62 }
 0x28d   :  { %v3522_v63 = vpop.eup %3521 }
 0x28e   :  { %3523 = vrcp.f32 %v775_v2  ;;  %v782_v48 = vadd.f32 1.0, %v3522_v63 }
 0x290   :  { %3525 = vrcp.f32 %v782_v48 }
 0x29b   :  { %v3524_v33 = vpop.eup %3523 }
 0x29c   :  { %v785_v60 = vmul.f32 %v3524_v33, %v766_v59 }
 0x29d   :  { %v3526_v46 = vpop.eup %3525 }
 0x29e   :  { %v786_v57 = vadd.f32 %v785_v60, %v540_v44  ;;  %v788_v0 = vsub.f32 1.0, %v3526_v46  ;;  %v790_v5 = vmul.f32 %v3526_v46, %v4072_v50 }
 0x2a0   :  { %3527 = vtanh.f32 %v786_v57 }
 0x2ad   :  { %v3528_v58 = vpop.eup %3527 }
 0x2ae   :  { %v789_v56 = vmul.f32 %v3528_v58, %v788_v0 }
 0x2b0   :  { %v4143_v31 = vadd.f32 %v790_v5, %v789_v56 }
 0x2b2   :  { %v4147_v2 = vpack.c.bf16 %v4143_v31, %v4143_v31 }
 0x2b4   :  { %3018 = vmatmul.mubr.bf16.vlgmr.msra.gmra.mxu1 %v4147_v2 }
 0x374   :  { %v881_v44 = vpop.f32.mrf.mxu1 }
 0x375   :  { %v882_v49 = vadd.f32 %v4153_v61, %v881_v44 }
 0x376   :  { %v3019_v55 = vpop.f32.mrf.mxu1  ;;  %893 = sbr.rel (%p2679_p12) target bundleno = 1321 (0x529), region = 65 }
 0x377   :  { %887 = vst [vmem:[#allocation14] sm:$0x3] %v882_v49 }
 0x378   :  { %v884_v1 = vpop.f32.mrf.mxu1 }
 0x37a   :  { %v3020_v50 = vpop.f32.mrf.mxu1 }
 0x37b   :  { %vm894_vm5 = vcmask 1041408  }
 0x37c   :  { %v895_v29 = vsel %vm894_vm5, %v882_v49, -inf }
 0x37d   :  { %896 = vmax.xlane.f32.xlu0 %v895_v29 }
 0x406   :  { %v897_v53 = vpop.xlane.xlu0 %896 }
 0x407   :  { %vm898_vm6 = vcmp.eq.f32.partialorder %v882_v49, %v897_v53 }
 0x408   :  { %v899_v47 = vsel %vm898_vm6, %v3944_v30, 128 }
 0x409   :  { %v900_v62 = vsel %vm894_vm5, %v899_v47, 2147483647 }
 0x40a   :  { %v902_v63 = vshra.s32 %v900_v62, 16  ;;  %v901_v59 = vand.u32 65535, %v900_v62 }
 0x40c   :  { %v904_v48 = vcvt.s32.f32 %v902_v63  ;;  %v903_v60 = vcvt.s32.f32 %v901_v59 }
 0x40e   :  { %905 = vmin.xlane.f32.xlu0 %v904_v48 }
 0x497   :  { %v906_v33 = vpop.xlane.xlu0 %905 }
 0x498   :  { %vm907_vm7 = vcmp.eq.f32.partialorder %v904_v48, %v906_v33  ;;  %v912_v46 = vcvt.f32.s32 %v906_v33 }
 0x499   :  { %v908_v57 = vsel %vm907_vm7, %v903_v60, inf }
 0x49a   :  { %909 = vmin.xlane.f32.xlu1 %v908_v57  ;;  %v913_v58 = vshll.u32 %v912_v46, 16 }
 0x523   :  { %v910_v0 = vpop.xlane.xlu1 %909 }
 0x524   :  { %v911_v56 = vcvt.f32.s32 %v910_v0 }
 0x526   :  { %v914_v5 = vadd.s32 %v913_v58, %v911_v56 }
 0x528   :  { %916 = vst.msk [vmem:[#allocation3] sm:$0x3] %vm109_vm0, %v914_v5 }
 0x529 PF:  { %v4976_v44 = vmov 0   ;;  %s2680_s10 = sld [smem:[#allocation5 + $0x1]]  ;;  %v4977_v49 = vmov 0.0   ;;  %975 = vmatprep.subr.bf16.mxu1 %v3879_v10  ;;  %v2681_v55 = vld [vmem:[%s4885_s1 + $0x2] sm:$0x3]  ;;  %v4979_v46 = vld [vmem:[#allocation24_spill] sm:$0xff] }
 0x52a   :  { %3529 = vset.pattern.permute.xlu0 %v4976_v44  ;;  %3021 = vmatprep.subr.bf16.mxu0 %v4977_v49  ;;  %v4978_v47 = vmov 1.0|1.0   ;;  %v4980_v0 = vld [vmem:[#allocation25_spill] sm:$0xff]  ;;  %v4981_v58 = vld [vmem:[#allocation26_spill] sm:$0xff]  ;;  %v4982_v56 = vld [vmem:[#allocation27_spill] sm:$0xff]  ;;  %s2687_s5 = sld [smem:[#allocation5 + $0x2]] }
 0x52b   :  { %3022 = vmatpush3.bf16.msra.mxu0 %v3864_v3  ;;  %3037 = vmatprep.mubr.msk.bf16.mxu0 %vm3763_vm2, %v4977_v49  ;;  %v4983_v5 = vld [vmem:[#allocation28_spill] sm:$0xff] }
 0x52c   :  { %3023 = vmatprep.subr.bf16.mxu0 %v4977_v49  ;;  %976 = vmatpush1.bf16.msra.mxu1 %v3881_v11 }
 0x52d   :  { %1007 = vmatprep.mubr.bf16.mxu1 %v4976_v44  ;;  %977 = vmatprep.subr.bf16.mxu1 %v3889_v13 }
 0x52f   :  { %3024 = vmatpush3.bf16.msra.mxu0 %v3867_v4  ;;  %p918_p13 = scmp.eq.s32.totalorder %s2680_s10, 1  ;;  %v921_v1 = vld [vmem:[#allocation3] sm:$0x3] }
 0x530   :  { %3025 = vmatprep.subr.bf16.mxu0 %v4977_v49  ;;  %978 = vmatpush1.bf16.msra.mxu1 %v3891_v14  ;;  %p2688_p0 = scmp.ne.s32.totalorder %s2687_s5, 0 }
 0x531   :  { %s922_s21 = scalar_select %p918_p13, 1, 0  ;;  %979 = vmatprep.subr.bf16.mxu1 %v3896_v16 }
 0x533   :  { %3026 = vmatpush3.bf16.msra.mxu0 %v3874_v7  ;;  %v923_v50 = vstv %s922_s21 }
 0x534   :  { %3027 = vmatprep.subr.bf16.mxu0 %v4977_v49  ;;  %vm924_vm8 = vcmp.eq.s32.totalorder %v923_v50, 1  ;;  %980 = vmatpush1.bf16.msra.mxu1 %v3899_v17  ;;  %v4987_v50 = vld [vmem:[#allocation32_spill] sm:$0xff] }
 0x535   :  { %v925_v29 = vsel %vm924_vm8, %v2681_v55, %v921_v1  ;;  %981 = vmatprep.subr.bf16.mxu1 %v3906_v19  ;;  %v4984_v55 = vld [vmem:[#allocation29_spill] sm:$0xff]  ;;  %v4986_v1 = vld [vmem:[#allocation31_spill] sm:$0xff] }
 0x536   :  { %927 = vperm.xlu0 %3529, %v925_v29   ;;  %v4988_v29 = vld [vmem:[#allocation33_spill] sm:$0xff] }
 0x537   :  { %3028 = vmatpush3.bf16.msra.mxu0 %v3884_v12 }
 0x538   :  { %3029 = vmatprep.subr.bf16.mxu0 %v4977_v49  ;;  %982 = vmatpush1.bf16.msra.mxu1 %v3908_v20 }
 0x539   :  { %983 = vmatprep.subr.bf16.mxu1 %v3916_v22 }
 0x53b   :  { %3030 = vmatpush3.bf16.msra.mxu0 %v3893_v15 }
 0x53c   :  { %3031 = vmatprep.subr.bf16.mxu0 %v4977_v49  ;;  %984 = vmatpush1.bf16.msra.mxu1 %v3918_v23 }
 0x53d   :  { %985 = vmatprep.subr.bf16.mxu1 %v3926_v25 }
 0x53f   :  { %3032 = vmatpush3.bf16.msra.mxu0 %v3903_v18 }
 0x540   :  { %3033 = vmatprep.subr.bf16.mxu0 %v4977_v49  ;;  %986 = vmatpush1.bf16.msra.mxu1 %v3928_v26 }
 0x541   :  { %987 = vmatprep.subr.bf16.mxu1 %v3934_v27 }
 0x543   :  { %3034 = vmatpush3.bf16.msra.mxu0 %v3913_v21 }
 0x544   :  { %3035 = vmatprep.subr.bf16.mxu0 %v4977_v49  ;;  %988 = vmatpush1.bf16.msra.mxu1 %v3936_v28 }
 0x545   :  { %989 = vmatprep.subr.bf16.mxu1 %v3977_v40 }
 0x547   :  { %3036 = vmatpush3.bf16.msra.mxu0 %v3923_v24 }
 0x548   :  { %3041 = vmatprep.subr.bf16.mxu0 %v4977_v49  ;;  %990 = vmatpush1.bf16.msra.mxu1 %v3979_v41 }
 0x549   :  { %1056 = vmatprep.subr.bf16.mxu1 %v3987_v43 }
 0x5b1   :  { %v928_v53 = vpop.permute.xlu0 %927 }
 0x5b2   :  { %vm929_vm9 = vcmp.eq.s32.totalorder %v3944_v30, %v928_v53  ;;  %v4989_v53 = vld [vmem:[#allocation34_spill] sm:$0xff] }
 0x5b3   :  { %vm2683_vm10 = vmpackc.low %vm929_vm9, %vm929_vm9 }
 0x5b4   :  { %3038 = vmatmul.mubr.msk.bf16.vlgmr.msra.gmra.mxu0 %vm2683_vm10, %v4978_v47  ;;  %v4990_v47 = vld [vmem:[#allocation35_spill] sm:$0xff] }
 0x5b5   :  { %3042 = vmatpush3.bf16.msra.mxu0 %v3946_v32  ;;  %3057 = vmatprep.mubr.msk.bf16.mxu0 %vm3763_vm2, %v4977_v49 }
 0x5b6   :  { %3043 = vmatprep.subr.bf16.mxu0 %v4977_v49 }
 0x5b9   :  { %3044 = vmatpush3.bf16.msra.mxu0 %v3951_v34 }
 0x5ba   :  { %3045 = vmatprep.subr.bf16.mxu0 %v4977_v49 }
 0x5bd   :  { %3046 = vmatpush3.bf16.msra.mxu0 %v3957_v35 }
 0x5be   :  { %3047 = vmatprep.subr.bf16.mxu0 %v4977_v49 }
 0x5c1   :  { %3048 = vmatpush3.bf16.msra.mxu0 %v3961_v36 }
 0x5c2   :  { %3049 = vmatprep.subr.bf16.mxu0 %v4977_v49 }
 0x5c5   :  { %3050 = vmatpush3.bf16.msra.mxu0 %v3965_v37 }
 0x5c6   :  { %3051 = vmatprep.subr.bf16.mxu0 %v4977_v49 }
 0x5c9   :  { %3052 = vmatpush3.bf16.msra.mxu0 %v3969_v38 }
 0x5ca   :  { %3053 = vmatprep.subr.bf16.mxu0 %v4977_v49 }
 0x5cd   :  { %3054 = vmatpush3.bf16.msra.mxu0 %v3974_v39 }
 0x5ce   :  { %3055 = vmatprep.subr.bf16.mxu0 %v4977_v49 }
 0x5d1   :  { %3056 = vmatpush3.bf16.msra.mxu0 %v3983_v42 }
 0x5d2   :  { %3061 = vmatprep.subr.bf16.mxu0 %v4977_v49 }
 0x674   :  { %v967_v62 = vpop.f32.mrf.mxu0 }
 0x675   :  { %v968_v63 = vadd.f32 %v967_v62, %v3997_v45  ;;  %v4991_v62 = vld [vmem:[#allocation36_spill] sm:$0xff] }
 0x676   :  { %v3039_v48 = vpop.f32.mrf.mxu0 }
 0x677   :  { %v973_v59 = vmax.f32 %v968_v63, 0.0  ;;  %v4992_v63 = vld [vmem:[#allocation37_spill] sm:$0xff]  ;;  %v4993_v48 = vld [vmem:[#allocation38_spill] sm:$0xff] }
 0x678   :  { %v970_v33 = vpop.f32.mrf.mxu0 }
 0x679   :  { %v974_v60 = vpack.c.bf16 %v973_v59, %v973_v59  ;;  %v4994_v59 = vld [vmem:[#allocation39_spill] sm:$0xff]  ;;  %v4995_v33 = vld [vmem:[#allocation40_spill] sm:$0xff] }
 0x67a   :  { %v3040_v57 = vpop.f32.mrf.mxu0 }
 0x67b   :  { %1008 = vmatmul.mubr.bf16.vlgmr.msra.gmra.mxu1 %v974_v60  ;;  %3058 = vmatmul.mubr.bf16.vlgmr.msra.gmra.mxu0 %v974_v60  ;;  %v4996_v60 = vld [vmem:[#allocation41_spill] sm:$0xff]  ;;  %v4997_v57 = vld [vmem:[#allocation42_spill] sm:$0xff] }
 0x67c   :  { %1057 = vmatpush1.bf16.msra.mxu1 %v4000_v51  ;;  %3062 = vmatpush3.bf16.msra.mxu0 %v4002_v52 }
 0x67d   :  { %1058 = vmatprep.subr.bf16.mxu1 %v4004_v54  ;;  %1088 = vmatprep.mubr.bf16.mxu1 %v4976_v44  ;;  %v4985_v44 = vld [vmem:[#allocation30_spill] sm:$0xff] }
 0x67e   :  { %3063 = vmatprep.subr.bf16.mxu0 %v4977_v49  ;;  %3077 = vmatprep.mubr.msk.bf16.mxu0 %vm3763_vm2, %v4977_v49 }
 0x680   :  { %1059 = vmatpush1.bf16.msra.mxu1 %v4979_v46  ;;  %3064 = vmatpush3.bf16.msra.mxu0 %v4980_v0  ;;  %v4998_v46 = vld [vmem:[#allocation43_spill] sm:$0xff]  ;;  %v4999_v0 = vld [vmem:[#allocation44_spill] sm:$0xff] }
 0x681   :  { %1060 = vmatprep.subr.bf16.mxu1 %v4981_v58  ;;  %3065 = vmatprep.subr.bf16.mxu0 %v4977_v49  ;;  %v5000_v58 = vld [vmem:[#allocation45_spill] sm:$0xff] }
 0x684   :  { %1061 = vmatpush1.bf16.msra.mxu1 %v4982_v56  ;;  %3066 = vmatpush3.bf16.msra.mxu0 %v4983_v5  ;;  %v5001_v56 = vld [vmem:[#allocation46_spill] sm:$0xff]  ;;  %v5002_v5 = vld [vmem:[#allocation47_spill] sm:$0xff] }
 0x685   :  { %1062 = vmatprep.subr.bf16.mxu1 %v4984_v55  ;;  %3067 = vmatprep.subr.bf16.mxu0 %v4977_v49  ;;  %v5004_v55 = vld [vmem:[#allocation49_spill] sm:$0xff] }
 0x688   :  { %1063 = vmatpush1.bf16.msra.mxu1 %v4985_v44  ;;  %3068 = vmatpush3.bf16.msra.mxu0 %v4986_v1  ;;  %v5005_v44 = vld [vmem:[#allocation50_spill] sm:$0xff]  ;;  %v5006_v1 = vld [vmem:[#allocation51_spill] sm:$0xff] }
 0x689   :  { %1064 = vmatprep.subr.bf16.mxu1 %v4987_v50  ;;  %3069 = vmatprep.subr.bf16.mxu0 %v4977_v49 }
 0x68c   :  { %1065 = vmatpush1.bf16.msra.mxu1 %v4988_v29  ;;  %3070 = vmatpush3.bf16.msra.mxu0 %v4989_v53 }
 0x68d   :  { %1066 = vmatprep.subr.bf16.mxu1 %v4990_v47  ;;  %3071 = vmatprep.subr.bf16.mxu0 %v4977_v49 }
 0x690   :  { %1067 = vmatpush1.bf16.msra.mxu1 %v4991_v62  ;;  %3072 = vmatpush3.bf16.msra.mxu0 %v4992_v63 }
 0x691   :  { %1068 = vmatprep.subr.bf16.mxu1 %v4993_v48  ;;  %3073 = vmatprep.subr.bf16.mxu0 %v4977_v49 }
 0x694   :  { %1069 = vmatpush1.bf16.msra.mxu1 %v4994_v59  ;;  %3074 = vmatpush3.bf16.msra.mxu0 %v4995_v33 }
 0x695   :  { %1070 = vmatprep.subr.bf16.mxu1 %v4996_v60  ;;  %3075 = vmatprep.subr.bf16.mxu0 %v4977_v49 }
 0x698   :  { %1071 = vmatpush1.bf16.msra.mxu1 %v4997_v57  ;;  %3076 = vmatpush3.bf16.msra.mxu0 %v4998_v46  ;;  %v5007_v57 = vld [vmem:[#allocation53_spill] sm:$0xff] }
 0x699   :  { %3081 = vmatprep.subr.bf16.mxu1 %v4977_v49 }
 0x69b   :  { %1089 = vmatmul.mubr.bf16.vlgmr.msra.gmra.mxu1 %v4147_v2  ;;  %3078 = vmatmul.mubr.bf16.vlgmr.msra.gmra.mxu0 %v4147_v2  ;;  %v5003_v2 = vld [vmem:[#allocation48_spill] sm:$0xff] }
 0x69c   :  { %3082 = vmatpush3.bf16.msra.mxu1 %v4999_v0  ;;  %3097 = vmatprep.mubr.msk.bf16.mxu1 %vm3763_vm2, %v4977_v49  ;;  %v5008_v0 = vld [vmem:[#allocation54_spill] sm:$0xff] }
 0x69d   :  { %3083 = vmatprep.subr.bf16.mxu1 %v4977_v49 }
 0x6a0   :  { %3084 = vmatpush3.bf16.msra.mxu1 %v5000_v58 }
 0x6a1   :  { %3085 = vmatprep.subr.bf16.mxu1 %v4977_v49 }
 0x6a4   :  { %3086 = vmatpush3.bf16.msra.mxu1 %v5001_v56 }
 0x6a5   :  { %3087 = vmatprep.subr.bf16.mxu1 %v4977_v49 }
 0x6a8   :  { %3088 = vmatpush3.bf16.msra.mxu1 %v5002_v5 }
 0x6a9   :  { %3089 = vmatprep.subr.bf16.mxu1 %v4977_v49 }
 0x6ac   :  { %3090 = vmatpush3.bf16.msra.mxu1 %v5003_v2 }
 0x6ad   :  { %3091 = vmatprep.subr.bf16.mxu1 %v4977_v49 }
 0x6b0   :  { %3092 = vmatpush3.bf16.msra.mxu1 %v5004_v55 }
 0x6b1   :  { %3093 = vmatprep.subr.bf16.mxu1 %v4977_v49 }
 0x6b4   :  { %3094 = vmatpush3.bf16.msra.mxu1 %v5005_v44 }
 0x6b5   :  { %3095 = vmatprep.subr.bf16.mxu1 %v4977_v49 }
 0x6b8   :  { %3096 = vmatpush3.bf16.msra.mxu1 %v5006_v1 }
 0x73b   :  { %v1009_v50 = vpop.f32.mrf.mxu1  ;;  %v1050_v29 = vpop.f32.mrf.mxu0 }
 0x73c   :  { %v1010_v46 = vadd.f32 %v1009_v50, %v5007_v57 }
 0x73d   :  { %v1011_v53 = vpop.f32.mrf.mxu1  ;;  %v3059_v47 = vpop.f32.mrf.mxu0 }
 0x73f   :  { %v1013_v62 = vpop.f32.mrf.mxu1  ;;  %v1053_v63 = vpop.f32.mrf.mxu0 }
 0x740   :  { %v1012_v62 = vadd.f32 %v1011_v53, %v4135_v8 }
 0x741   :  { %v1014_v48 = vpop.f32.mrf.mxu1  ;;  %v3060_v59 = vpop.f32.mrf.mxu0 }
 0x75b   :  { %v1090_v33 = vpop.f32.mrf.mxu1  ;;  %v1131_v60 = vpop.f32.mrf.mxu0 }
 0x75c   :  { %v1091_v58 = vadd.f32 %v1090_v33, %v5008_v0 }
 0x75d   :  { %v1092_v56 = vpop.f32.mrf.mxu1  ;;  %v3079_v5 = vpop.f32.mrf.mxu0 }
 0x75e   :  { %v1137_v2 = vadd.f32 %v1091_v58, %v1010_v46  ;;  %v1093_v1 = vadd.f32 %v1092_v56, %v4133_v9  ;;  %v1132_v46 = vadd.f32 %v1131_v60, %v4139_v6  ;;  %v5009_v58 = vld [vmem:[#allocation52_spill] sm:$0xff] }
 0x75f   :  { %v1094_v49 = vpop.f32.mrf.mxu1  ;;  %v1134_v55 = vpop.f32.mrf.mxu0  ;;  %v1051_v5 = vadd.f32 %v1050_v29, %v5009_v58 }
 0x760   :  { %v2685_v44 = vmul.f32 -1.442695, %v1137_v2  ;;  %v1144_v63 = vadd.f32 %v1093_v1, %v1012_v62 }
 0x761   :  { %v1095_v54 = vpop.f32.mrf.mxu1  ;;  %v3080_v47 = vpop.f32.mrf.mxu0 }
 0x762   :  { %3530 = vpow2.f32 %v2685_v44  ;;  %v2686_v48 = vmul.f32 -1.442695, %v1144_v63 }
 0x764   :  { %3532 = vpow2.f32 %v2686_v48 }
 0x76f   :  { %v3531_v59 = vpop.eup %3530 }
 0x770   :  { %v1141_v50 = vadd.f32 1.0, %v3531_v59 }
 0x771   :  { %v3533_v33 = vpop.eup %3532 }
 0x772   :  { %3534 = vrcp.f32 %v1141_v50  ;;  %v1148_v57 = vadd.f32 1.0, %v3533_v33 }
 0x774   :  { %3536 = vrcp.f32 %v1148_v57 }
 0x77f   :  { %v3535_v0 = vpop.eup %3534 }
 0x780   :  { %v1151_v56 = vmul.f32 %v3535_v0, %v1132_v46 }
 0x781   :  { %v3537_v2 = vpop.eup %3536 }
 0x782   :  { %v1152_v54 = vadd.f32 %v1151_v56, %v1051_v5  ;;  %v1154_v53 = vsub.f32 1.0, %v3537_v2  ;;  %v1156_v44 = vmul.f32 %v3537_v2, %v4143_v31 }
 0x784   :  { %3538 = vtanh.f32 %v1152_v54 }
 0x791   :  { %v3539_v49 = vpop.eup %3538 }
 0x792   :  { %v1155_v55 = vmul.f32 %v3539_v49, %v1154_v53 }
 0x794   :  { %v4281_v1 = vadd.f32 %v1156_v44, %v1155_v55 }
 0x796   :  { %v4285_v47 = vpack.c.bf16 %v4281_v1, %v4281_v1 }
 0x798   :  { %3098 = vmatmul.mubr.bf16.vlgmr.msra.gmra.mxu1 %v4285_v47 }
 0x858   :  { %v1193_v29 = vpop.f32.mrf.mxu1 }
 0x859   :  { %v1194_v60 = vadd.f32 %v4153_v61, %v1193_v29 }
 0x85a   :  { %v3099_v62 = vpop.f32.mrf.mxu1  ;;  %1206 = sbr.rel (%p2688_p0) target bundleno = 2573 (0xa0d), region = 69 }
 0x85b   :  { %1200 = vst [vmem:[#allocation14 + $0x2] sm:$0x3] %v1194_v60 }
 0x85c   :  { %v1196_v63 = vpop.f32.mrf.mxu1 }
 0x85e   :  { %v3100_v48 = vpop.f32.mrf.mxu1 }
 0x85f   :  { %vm1207_vm11 = vcmask 1041408  }
 0x860   :  { %v1208_v31 = vsel %vm1207_vm11, %v1194_v60, -inf }
 0x861   :  { %1209 = vmax.xlane.f32.xlu0 %v1208_v31 }
 0x8ea   :  { %v1210_v59 = vpop.xlane.xlu0 %1209 }
 0x8eb   :  { %vm1211_vm12 = vcmp.eq.f32.partialorder %v1194_v60, %v1210_v59 }
 0x8ec   :  { %v1212_v50 = vsel %vm1211_vm12, %v3944_v30, 128 }
 0x8ed   :  { %v1213_v33 = vsel %vm1207_vm11, %v1212_v50, 2147483647 }
 0x8ee   :  { %v1215_v57 = vshra.s32 %v1213_v33, 16  ;;  %v1214_v0 = vand.u32 65535, %v1213_v33 }
 0x8f0   :  { %v1217_v46 = vcvt.s32.f32 %v1215_v57  ;;  %v1216_v5 = vcvt.s32.f32 %v1214_v0 }
 0x8f2   :  { %1218 = vmin.xlane.f32.xlu0 %v1217_v46 }
 0x97b   :  { %v1219_v58 = vpop.xlane.xlu0 %1218 }
 0x97c   :  { %vm1220_vm13 = vcmp.eq.f32.partialorder %v1217_v46, %v1219_v58  ;;  %v1225_v54 = vcvt.f32.s32 %v1219_v58 }
 0x97d   :  { %v1221_v56 = vsel %vm1220_vm13, %v1216_v5, inf }
 0x97e   :  { %1222 = vmin.xlane.f32.xlu1 %v1221_v56  ;;  %v1226_v53 = vshll.u32 %v1225_v54, 16 }
 0xa07   :  { %v1223_v2 = vpop.xlane.xlu1 %1222 }
 0xa08   :  { %v1224_v49 = vcvt.f32.s32 %v1223_v2 }
 0xa0a   :  { %v1227_v55 = vadd.s32 %v1226_v53, %v1224_v49 }
 0xa0c   :  { %1229 = vst.msk [vmem:[#allocation3] sm:$0x3] %vm109_vm0, %v1227_v55 }
 0xa0d PF:  { %v5010_v44 = vmov 0   ;;  %s2689_s24 = sld [smem:[#allocation5 + $0x2]]  ;;  %v5011_v29 = vmov 0.0   ;;  %1288 = vmatprep.subr.bf16.mxu1 %v3879_v10  ;;  %v2690_v60 = vld [vmem:[%s4885_s1 + $0x4] sm:$0x3]  ;;  %v5013_v56 = vld [vmem:[#allocation23_spill] sm:$0xff] }
 0xa0e   :  { %3540 = vset.pattern.permute.xlu0 %v5010_v44  ;;  %3101 = vmatprep.subr.bf16.mxu0 %v5011_v29  ;;  %v5012_v59 = vmov 1.0|1.0   ;;  %v5014_v54 = vld [vmem:[#allocation24_spill] sm:$0xff]  ;;  %v5015_v2 = vld [vmem:[#allocation25_spill] sm:$0xff]  ;;  %v5016_v53 = vld [vmem:[#allocation26_spill] sm:$0xff]  ;;  %s2696_s0 = sld [smem:[#allocation5 + $0x3]] }
 0xa0f   :  { %3102 = vmatpush3.bf16.msra.mxu0 %v3864_v3  ;;  %3117 = vmatprep.mubr.msk.bf16.mxu0 %vm3763_vm2, %v5011_v29  ;;  %v5017_v49 = vld [vmem:[#allocation27_spill] sm:$0xff]  ;;  %v5018_v55 = vld [vmem:[#allocation28_spill] sm:$0xff] }
 0xa10   :  { %3103 = vmatprep.subr.bf16.mxu0 %v5011_v29  ;;  %1289 = vmatpush1.bf16.msra.mxu1 %v3881_v11 }
 0xa11   :  { %1320 = vmatprep.mubr.bf16.mxu1 %v5010_v44  ;;  %1290 = vmatprep.subr.bf16.mxu1 %v3889_v13 }
 0xa13   :  { %3104 = vmatpush3.bf16.msra.mxu0 %v3867_v4  ;;  %p1231_p1 = scmp.eq.s32.totalorder %s2689_s24, 1  ;;  %v1234_v62 = vld [vmem:[#allocation3] sm:$0x3] }
 0xa14   :  { %3105 = vmatprep.subr.bf16.mxu0 %v5011_v29  ;;  %1291 = vmatpush1.bf16.msra.mxu1 %v3891_v14  ;;  %p2697_p2 = scmp.ne.s32.totalorder %s2696_s0, 0 }
 0xa15   :  { %s1235_s25 = scalar_select %p1231_p1, 1, 0  ;;  %1292 = vmatprep.subr.bf16.mxu1 %v3896_v16 }
 0xa17   :  { %3106 = vmatpush3.bf16.msra.mxu0 %v3874_v7  ;;  %v1236_v63 = vstv %s1235_s25 }
 0xa18   :  { %3107 = vmatprep.subr.bf16.mxu0 %v5011_v29  ;;  %vm1237_vm14 = vcmp.eq.s32.totalorder %v1236_v63, 1  ;;  %1293 = vmatpush1.bf16.msra.mxu1 %v3899_v17  ;;  %v5022_v63 = vld [vmem:[#allocation32_spill] sm:$0xff] }
 0xa19   :  { %v1238_v48 = vsel %vm1237_vm14, %v2690_v60, %v1234_v62  ;;  %1294 = vmatprep.subr.bf16.mxu1 %v3906_v19  ;;  %v5019_v60 = vld [vmem:[#allocation29_spill] sm:$0xff]  ;;  %v5021_v62 = vld [vmem:[#allocation31_spill] sm:$0xff] }
 0xa1a   :  { %1240 = vperm.xlu0 %3540, %v1238_v48   ;;  %v5023_v48 = vld [vmem:[#allocation33_spill] sm:$0xff] }
 0xa1b   :  { %3108 = vmatpush3.bf16.msra.mxu0 %v3884_v12 }
 0xa1c   :  { %3109 = vmatprep.subr.bf16.mxu0 %v5011_v29  ;;  %1295 = vmatpush1.bf16.msra.mxu1 %v3908_v20 }
 0xa1d   :  { %1296 = vmatprep.subr.bf16.mxu1 %v3916_v22 }
 0xa1f   :  { %3110 = vmatpush3.bf16.msra.mxu0 %v3893_v15 }
 0xa20   :  { %3111 = vmatprep.subr.bf16.mxu0 %v5011_v29  ;;  %1297 = vmatpush1.bf16.msra.mxu1 %v3918_v23 }
 0xa21   :  { %1298 = vmatprep.subr.bf16.mxu1 %v3926_v25 }
 0xa23   :  { %3112 = vmatpush3.bf16.msra.mxu0 %v3903_v18 }
 0xa24   :  { %3113 = vmatprep.subr.bf16.mxu0 %v5011_v29  ;;  %1299 = vmatpush1.bf16.msra.mxu1 %v3928_v26 }
 0xa25   :  { %1300 = vmatprep.subr.bf16.mxu1 %v3934_v27 }
 0xa27   :  { %3114 = vmatpush3.bf16.msra.mxu0 %v3913_v21 }
 0xa28   :  { %3115 = vmatprep.subr.bf16.mxu0 %v5011_v29  ;;  %1301 = vmatpush1.bf16.msra.mxu1 %v3936_v28 }
 0xa29   :  { %1302 = vmatprep.subr.bf16.mxu1 %v3977_v40 }
 0xa2b   :  { %3116 = vmatpush3.bf16.msra.mxu0 %v3923_v24 }
 0xa2c   :  { %3121 = vmatprep.subr.bf16.mxu0 %v5011_v29  ;;  %1303 = vmatpush1.bf16.msra.mxu1 %v3979_v41 }
 0xa2d   :  { %1369 = vmatprep.subr.bf16.mxu1 %v3987_v43 }
 0xa95   :  { %v1241_v31 = vpop.permute.xlu0 %1240 }
 0xa96   :  { %vm1242_vm15 = vcmp.eq.s32.totalorder %v3944_v30, %v1241_v31  ;;  %v5024_v31 = vld [vmem:[#allocation34_spill] sm:$0xff] }
 0xa97   :  { %vm2692_vm1 = vmpackc.low %vm1242_vm15, %vm1242_vm15 }
 0xa98   :  { %3118 = vmatmul.mubr.msk.bf16.vlgmr.msra.gmra.mxu0 %vm2692_vm1, %v5012_v59  ;;  %v5025_v59 = vld [vmem:[#allocation35_spill] sm:$0xff] }
 0xa99   :  { %3122 = vmatpush3.bf16.msra.mxu0 %v3946_v32  ;;  %3137 = vmatprep.mubr.msk.bf16.mxu0 %vm3763_vm2, %v5011_v29 }
 0xa9a   :  { %3123 = vmatprep.subr.bf16.mxu0 %v5011_v29 }
 0xa9d   :  { %3124 = vmatpush3.bf16.msra.mxu0 %v3951_v34 }
 0xa9e   :  { %3125 = vmatprep.subr.bf16.mxu0 %v5011_v29 }
 0xaa1   :  { %3126 = vmatpush3.bf16.msra.mxu0 %v3957_v35 }
 0xaa2   :  { %3127 = vmatprep.subr.bf16.mxu0 %v5011_v29 }
 0xaa5   :  { %3128 = vmatpush3.bf16.msra.mxu0 %v3961_v36 }
 0xaa6   :  { %3129 = vmatprep.subr.bf16.mxu0 %v5011_v29 }
 0xaa9   :  { %3130 = vmatpush3.bf16.msra.mxu0 %v3965_v37 }
 0xaaa   :  { %3131 = vmatprep.subr.bf16.mxu0 %v5011_v29 }
 0xaad   :  { %3132 = vmatpush3.bf16.msra.mxu0 %v3969_v38 }
 0xaae   :  { %3133 = vmatprep.subr.bf16.mxu0 %v5011_v29 }
 0xab1   :  { %3134 = vmatpush3.bf16.msra.mxu0 %v3974_v39 }
 0xab2   :  { %3135 = vmatprep.subr.bf16.mxu0 %v5011_v29 }
 0xab5   :  { %3136 = vmatpush3.bf16.msra.mxu0 %v3983_v42 }
 0xab6   :  { %3141 = vmatprep.subr.bf16.mxu0 %v5011_v29 }
 0xb58   :  { %v1280_v50 = vpop.f32.mrf.mxu0 }
 0xb59   :  { %v1281_v33 = vadd.f32 %v1280_v50, %v3997_v45  ;;  %v5026_v50 = vld [vmem:[#allocation36_spill] sm:$0xff] }
 0xb5a   :  { %v3119_v57 = vpop.f32.mrf.mxu0 }
 0xb5b   :  { %v1286_v46 = vmax.f32 %v1281_v33, 0.0  ;;  %v5027_v33 = vld [vmem:[#allocation37_spill] sm:$0xff]  ;;  %v5028_v57 = vld [vmem:[#allocation38_spill] sm:$0xff] }
 0xb5c   :  { %v1283_v0 = vpop.f32.mrf.mxu0 }
 0xb5d   :  { %v1287_v58 = vpack.c.bf16 %v1286_v46, %v1286_v46  ;;  %v5029_v46 = vld [vmem:[#allocation39_spill] sm:$0xff]  ;;  %v5030_v0 = vld [vmem:[#allocation40_spill] sm:$0xff] }
 0xb5e   :  { %v3120_v5 = vpop.f32.mrf.mxu0 }
 0xb5f   :  { %1321 = vmatmul.mubr.bf16.vlgmr.msra.gmra.mxu1 %v1287_v58  ;;  %3138 = vmatmul.mubr.bf16.vlgmr.msra.gmra.mxu0 %v1287_v58  ;;  %v5031_v58 = vld [vmem:[#allocation41_spill] sm:$0xff]  ;;  %v5032_v5 = vld [vmem:[#allocation42_spill] sm:$0xff] }
 0xb60   :  { %1370 = vmatpush1.bf16.msra.mxu1 %v4000_v51  ;;  %3142 = vmatpush3.bf16.msra.mxu0 %v4002_v52 }
 0xb61   :  { %1371 = vmatprep.subr.bf16.mxu1 %v5013_v56  ;;  %1401 = vmatprep.mubr.bf16.mxu1 %v5010_v44  ;;  %v5020_v44 = vld [vmem:[#allocation30_spill] sm:$0xff]  ;;  %v5033_v56 = vld [vmem:[#allocation43_spill] sm:$0xff] }
 0xb62   :  { %3143 = vmatprep.subr.bf16.mxu0 %v5011_v29  ;;  %3157 = vmatprep.mubr.msk.bf16.mxu0 %vm3763_vm2, %v5011_v29 }
 0xb64   :  { %1372 = vmatpush1.bf16.msra.mxu1 %v5014_v54  ;;  %3144 = vmatpush3.bf16.msra.mxu0 %v5015_v2  ;;  %v5034_v54 = vld [vmem:[#allocation44_spill] sm:$0xff]  ;;  %v5035_v2 = vld [vmem:[#allocation45_spill] sm:$0xff] }
 0xb65   :  { %1373 = vmatprep.subr.bf16.mxu1 %v5016_v53  ;;  %3145 = vmatprep.subr.bf16.mxu0 %v5011_v29  ;;  %v5036_v53 = vld [vmem:[#allocation46_spill] sm:$0xff] }
 0xb68   :  { %1374 = vmatpush1.bf16.msra.mxu1 %v5017_v49  ;;  %3146 = vmatpush3.bf16.msra.mxu0 %v5018_v55  ;;  %v5037_v49 = vld [vmem:[#allocation47_spill] sm:$0xff]  ;;  %v5039_v55 = vld [vmem:[#allocation49_spill] sm:$0xff] }
 0xb69   :  { %1375 = vmatprep.subr.bf16.mxu1 %v5019_v60  ;;  %3147 = vmatprep.subr.bf16.mxu0 %v5011_v29  ;;  %v5040_v60 = vld [vmem:[#allocation50_spill] sm:$0xff] }
 0xb6c   :  { %1376 = vmatpush1.bf16.msra.mxu1 %v5020_v44  ;;  %3148 = vmatpush3.bf16.msra.mxu0 %v5021_v62  ;;  %v5041_v44 = vld [vmem:[#allocation51_spill] sm:$0xff] }
 0xb6d   :  { %1377 = vmatprep.subr.bf16.mxu1 %v5022_v63  ;;  %3149 = vmatprep.subr.bf16.mxu0 %v5011_v29 }
 0xb70   :  { %1378 = vmatpush1.bf16.msra.mxu1 %v5023_v48  ;;  %3150 = vmatpush3.bf16.msra.mxu0 %v5024_v31 }
 0xb71   :  { %1379 = vmatprep.subr.bf16.mxu1 %v5025_v59  ;;  %3151 = vmatprep.subr.bf16.mxu0 %v5011_v29 }
 0xb74   :  { %1380 = vmatpush1.bf16.msra.mxu1 %v5026_v50  ;;  %3152 = vmatpush3.bf16.msra.mxu0 %v5027_v33 }
 0xb75   :  { %1381 = vmatprep.subr.bf16.mxu1 %v5028_v57  ;;  %3153 = vmatprep.subr.bf16.mxu0 %v5011_v29 }
 0xb78   :  { %1382 = vmatpush1.bf16.msra.mxu1 %v5029_v46  ;;  %3154 = vmatpush3.bf16.msra.mxu0 %v5030_v0 }
 0xb79   :  { %1383 = vmatprep.subr.bf16.mxu1 %v5031_v58  ;;  %3155 = vmatprep.subr.bf16.mxu0 %v5011_v29  ;;  %v5042_v58 = vld [vmem:[#allocation53_spill] sm:$0xff] }
 0xb7c   :  { %1384 = vmatpush1.bf16.msra.mxu1 %v5032_v5  ;;  %3156 = vmatpush3.bf16.msra.mxu0 %v5033_v56  ;;  %v5043_v56 = vld [vmem:[#allocation54_spill] sm:$0xff] }
 0xb7d   :  { %3161 = vmatprep.subr.bf16.mxu1 %v5011_v29 }
 0xb7f   :  { %1402 = vmatmul.mubr.bf16.vlgmr.msra.gmra.mxu1 %v4285_v47  ;;  %3158 = vmatmul.mubr.bf16.vlgmr.msra.gmra.mxu0 %v4285_v47  ;;  %v5038_v47 = vld [vmem:[#allocation48_spill] sm:$0xff] }
 0xb80   :  { %3162 = vmatpush3.bf16.msra.mxu1 %v5034_v54  ;;  %3177 = vmatprep.mubr.msk.bf16.mxu1 %vm3763_vm2, %v5011_v29 }
 0xb81   :  { %3163 = vmatprep.subr.bf16.mxu1 %v5011_v29 }
 0xb84   :  { %3164 = vmatpush3.bf16.msra.mxu1 %v5035_v2 }
 0xb85   :  { %3165 = vmatprep.subr.bf16.mxu1 %v5011_v29 }
 0xb88   :  { %3166 = vmatpush3.bf16.msra.mxu1 %v5036_v53 }
 0xb89   :  { %3167 = vmatprep.subr.bf16.mxu1 %v5011_v29 }
 0xb8c   :  { %3168 = vmatpush3.bf16.msra.mxu1 %v5037_v49 }
 0xb8d   :  { %3169 = vmatprep.subr.bf16.mxu1 %v5011_v29 }
 0xb90   :  { %3170 = vmatpush3.bf16.msra.mxu1 %v5038_v47 }
 0xb91   :  { %3171 = vmatprep.subr.bf16.mxu1 %v5011_v29 }
 0xb94   :  { %3172 = vmatpush3.bf16.msra.mxu1 %v5039_v55 }
 0xb95   :  { %3173 = vmatprep.subr.bf16.mxu1 %v5011_v29 }
 0xb98   :  { %3174 = vmatpush3.bf16.msra.mxu1 %v5040_v60 }
 0xb99   :  { %3175 = vmatprep.subr.bf16.mxu1 %v5011_v29 }
 0xb9c   :  { %3176 = vmatpush3.bf16.msra.mxu1 %v5041_v44 }
 0xc1f   :  { %v1322_v62 = vpop.f32.mrf.mxu1  ;;  %v1363_v63 = vpop.f32.mrf.mxu0 }
 0xc20   :  { %v1323_v5 = vadd.f32 %v1322_v62, %v5042_v58 }
 0xc21   :  { %v1324_v48 = vpop.f32.mrf.mxu1  ;;  %v3139_v31 = vpop.f32.mrf.mxu0 }
 0xc23   :  { %v1326_v59 = vpop.f32.mrf.mxu1  ;;  %v1366_v50 = vpop.f32.mrf.mxu0 }
 0xc24   :  { %v1325_v59 = vadd.f32 %v1324_v48, %v4135_v8 }
 0xc25   :  { %v1327_v33 = vpop.f32.mrf.mxu1  ;;  %v3140_v57 = vpop.f32.mrf.mxu0 }
 0xc3f   :  { %v1403_v46 = vpop.f32.mrf.mxu1  ;;  %v1444_v0 = vpop.f32.mrf.mxu0 }
 0xc40   :  { %v1404_v54 = vadd.f32 %v1403_v46, %v5043_v56 }
 0xc41   :  { %v1405_v2 = vpop.f32.mrf.mxu1  ;;  %v3159_v53 = vpop.f32.mrf.mxu0 }
 0xc42   :  { %v1450_v49 = vadd.f32 %v1404_v54, %v1323_v5  ;;  %v1406_v60 = vadd.f32 %v1405_v2, %v4133_v9  ;;  %v1445_v5 = vadd.f32 %v1444_v0, %v4139_v6  ;;  %v5044_v54 = vld [vmem:[#allocation52_spill] sm:$0xff] }
 0xc43   :  { %v1407_v29 = vpop.f32.mrf.mxu1  ;;  %v1447_v47 = vpop.f32.mrf.mxu0  ;;  %v1364_v53 = vadd.f32 %v1363_v63, %v5044_v54 }
 0xc44   :  { %v2694_v55 = vmul.f32 -1.442695, %v1450_v49  ;;  %v1457_v50 = vadd.f32 %v1406_v60, %v1325_v59 }
 0xc45   :  { %v1408_v44 = vpop.f32.mrf.mxu1  ;;  %v3160_v31 = vpop.f32.mrf.mxu0 }
 0xc46   :  { %3541 = vpow2.f32 %v2694_v55  ;;  %v2695_v33 = vmul.f32 -1.442695, %v1457_v50 }
 0xc48   :  { %3543 = vpow2.f32 %v2695_v33 }
 0xc53   :  { %v3542_v57 = vpop.eup %3541 }
 0xc54   :  { %v1454_v62 = vadd.f32 1.0, %v3542_v57 }
 0xc55   :  { %v3544_v46 = vpop.eup %3543 }
 0xc56   :  { %3545 = vrcp.f32 %v1454_v62  ;;  %v1461_v58 = vadd.f32 1.0, %v3544_v46 }
 0xc58   :  { %3547 = vrcp.f32 %v1461_v58 }
 0xc63   :  { %v3546_v56 = vpop.eup %3545 }
 0xc64   :  { %v1464_v2 = vmul.f32 %v3546_v56, %v1445_v5 }
 0xc65   :  { %v3548_v29 = vpop.eup %3547 }
 0xc66   :  { %v1465_v49 = vadd.f32 %v1464_v2, %v1364_v53  ;;  %v1467_v48 = vsub.f32 1.0, %v3548_v29  ;;  %v1469_v60 = vmul.f32 %v3548_v29, %v4281_v1 }
 0xc68   :  { %3549 = vtanh.f32 %v1465_v49 }
 0xc75   :  { %v3550_v47 = vpop.eup %3549 }
 0xc76   :  { %v1468_v55 = vmul.f32 %v3550_v47, %v1467_v48 }
 0xc78   :  { %v4413_v44 = vadd.f32 %v1469_v60, %v1468_v55 }
 0xc7a   :  { %v4417_v31 = vpack.c.bf16 %v4413_v44, %v4413_v44 }
 0xc7c   :  { %3178 = vmatmul.mubr.bf16.vlgmr.msra.gmra.mxu1 %v4417_v31 }
 0xd3c   :  { %v1506_v63 = vpop.f32.mrf.mxu1 }
 0xd3d   :  { %v1507_v0 = vadd.f32 %v4153_v61, %v1506_v63 }
 0xd3e   :  { %v3179_v59 = vpop.f32.mrf.mxu1  ;;  %1519 = sbr.rel (%p2697_p2) target bundleno = 3825 (0xef1), region = 73 }
 0xd3f   :  { %1513 = vst [vmem:[#allocation14 + $0x4] sm:$0x3] %v1507_v0 }
 0xd40   :  { %v1509_v50 = vpop.f32.mrf.mxu1 }
 0xd42   :  { %v3180_v33 = vpop.f32.mrf.mxu1 }
 0xd43   :  { %vm1520_vm3 = vcmask 1041408  }
 0xd44   :  { %v1521_v1 = vsel %vm1520_vm3, %v1507_v0, -inf }
 0xd45   :  { %1522 = vmax.xlane.f32.xlu0 %v1521_v1 }
 0xdce   :  { %v1523_v57 = vpop.xlane.xlu0 %1522 }
 0xdcf   :  { %vm1524_vm4 = vcmp.eq.f32.partialorder %v1507_v0, %v1523_v57 }
 0xdd0   :  { %v1525_v62 = vsel %vm1524_vm4, %v3944_v30, 128 }
 0xdd1   :  { %v1526_v46 = vsel %vm1520_vm3, %v1525_v62, 2147483647 }
 0xdd2   :  { %v1528_v58 = vshra.s32 %v1526_v46, 16  ;;  %v1527_v56 = vand.u32 65535, %v1526_v46 }
 0xdd4   :  { %v1530_v5 = vcvt.s32.f32 %v1528_v58  ;;  %v1529_v53 = vcvt.s32.f32 %v1527_v56 }
 0xdd6   :  { %1531 = vmin.xlane.f32.xlu0 %v1530_v5 }
 0xe5f   :  { %v1532_v54 = vpop.xlane.xlu0 %1531 }
 0xe60   :  { %vm1533_vm5 = vcmp.eq.f32.partialorder %v1530_v5, %v1532_v54  ;;  %v1538_v49 = vcvt.f32.s32 %v1532_v54 }
 0xe61   :  { %v1534_v2 = vsel %vm1533_vm5, %v1529_v53, inf }
 0xe62   :  { %1535 = vmin.xlane.f32.xlu1 %v1534_v2  ;;  %v1539_v48 = vshll.u32 %v1538_v49, 16 }
 0xeeb   :  { %v1536_v29 = vpop.xlane.xlu1 %1535 }
 0xeec   :  { %v1537_v47 = vcvt.f32.s32 %v1536_v29 }
 0xeee   :  { %v1540_v55 = vadd.s32 %v1539_v48, %v1537_v47 }
 0xef0   :  { %1542 = vst.msk [vmem:[#allocation3] sm:$0x3] %vm109_vm0, %v1540_v55 }
 0xef1 PF:  { %v5045_v60 = vmov 0   ;;  %s2698_s27 = sld [smem:[#allocation5 + $0x3]]  ;;  %v5046_v63 = vmov 0.0   ;;  %1601 = vmatprep.subr.bf16.mxu1 %v3879_v10  ;;  %v2699_v0 = vld [vmem:[%s4885_s1 + $0x6] sm:$0x3]  ;;  %v5048_v2 = vld [vmem:[#allocation23_spill] sm:$0xff] }
 0xef2   :  { %3551 = vset.pattern.permute.xlu0 %v5045_v60  ;;  %3181 = vmatprep.subr.bf16.mxu0 %v5046_v63  ;;  %v5047_v57 = vmov 1.0|1.0   ;;  %v5049_v49 = vld [vmem:[#allocation24_spill] sm:$0xff]  ;;  %v5050_v29 = vld [vmem:[#allocation25_spill] sm:$0xff]  ;;  %v5051_v48 = vld [vmem:[#allocation26_spill] sm:$0xff]  ;;  %s2705_s9 = sld [smem:[#allocation5 + $0x4]] }
 0xef3   :  { %3182 = vmatpush3.bf16.msra.mxu0 %v3864_v3  ;;  %3197 = vmatprep.mubr.msk.bf16.mxu0 %vm3763_vm2, %v5046_v63  ;;  %v5052_v47 = vld [vmem:[#allocation27_spill] sm:$0xff]  ;;  %v5053_v55 = vld [vmem:[#allocation28_spill] sm:$0xff] }
 0xef4   :  { %3183 = vmatprep.subr.bf16.mxu0 %v5046_v63  ;;  %1602 = vmatpush1.bf16.msra.mxu1 %v3881_v11 }
 0xef5   :  { %1633 = vmatprep.mubr.bf16.mxu1 %v5045_v60  ;;  %1603 = vmatprep.subr.bf16.mxu1 %v3889_v13 }
 0xef7   :  { %3184 = vmatpush3.bf16.msra.mxu0 %v3867_v4  ;;  %p1544_p3 = scmp.eq.s32.totalorder %s2698_s27, 1  ;;  %v1547_v59 = vld [vmem:[#allocation3] sm:$0x3] }
 0xef8   :  { %3185 = vmatprep.subr.bf16.mxu0 %v5046_v63  ;;  %1604 = vmatpush1.bf16.msra.mxu1 %v3891_v14  ;;  %p2706_p4 = scmp.ne.s32.totalorder %s2705_s9, 0 }
 0xef9   :  { %s1548_s30 = scalar_select %p1544_p3, 1, 0  ;;  %1605 = vmatprep.subr.bf16.mxu1 %v3896_v16 }
 0xefb   :  { %3186 = vmatpush3.bf16.msra.mxu0 %v3874_v7  ;;  %v1549_v50 = vstv %s1548_s30 }
 0xefc   :  { %3187 = vmatprep.subr.bf16.mxu0 %v5046_v63  ;;  %vm1550_vm6 = vcmp.eq.s32.totalorder %v1549_v50, 1  ;;  %1606 = vmatpush1.bf16.msra.mxu1 %v3899_v17  ;;  %v5057_v50 = vld [vmem:[#allocation32_spill] sm:$0xff] }
 0xefd   :  { %v1551_v33 = vsel %vm1550_vm6, %v2699_v0, %v1547_v59  ;;  %1607 = vmatprep.subr.bf16.mxu1 %v3906_v19  ;;  %v5054_v0 = vld [vmem:[#allocation29_spill] sm:$0xff]  ;;  %v5056_v59 = vld [vmem:[#allocation31_spill] sm:$0xff] }
 0xefe   :  { %1553 = vperm.xlu0 %3551, %v1551_v33   ;;  %v5058_v33 = vld [vmem:[#allocation33_spill] sm:$0xff] }
 0xeff   :  { %3188 = vmatpush3.bf16.msra.mxu0 %v3884_v12 }
 0xf00   :  { %3189 = vmatprep.subr.bf16.mxu0 %v5046_v63  ;;  %1608 = vmatpush1.bf16.msra.mxu1 %v3908_v20 }
 0xf01   :  { %1609 = vmatprep.subr.bf16.mxu1 %v3916_v22 }
 0xf03   :  { %3190 = vmatpush3.bf16.msra.mxu0 %v3893_v15 }
 0xf04   :  { %3191 = vmatprep.subr.bf16.mxu0 %v5046_v63  ;;  %1610 = vmatpush1.bf16.msra.mxu1 %v3918_v23 }
 0xf05   :  { %1611 = vmatprep.subr.bf16.mxu1 %v3926_v25 }
 0xf07   :  { %3192 = vmatpush3.bf16.msra.mxu0 %v3903_v18 }
 0xf08   :  { %3193 = vmatprep.subr.bf16.mxu0 %v5046_v63  ;;  %1612 = vmatpush1.bf16.msra.mxu1 %v3928_v26 }
 0xf09   :  { %1613 = vmatprep.subr.bf16.mxu1 %v3934_v27 }
 0xf0b   :  { %3194 = vmatpush3.bf16.msra.mxu0 %v3913_v21 }
 0xf0c   :  { %3195 = vmatprep.subr.bf16.mxu0 %v5046_v63  ;;  %1614 = vmatpush1.bf16.msra.mxu1 %v3936_v28 }
 0xf0d   :  { %1615 = vmatprep.subr.bf16.mxu1 %v3977_v40 }
 0xf0f   :  { %3196 = vmatpush3.bf16.msra.mxu0 %v3923_v24 }
 0xf10   :  { %3201 = vmatprep.subr.bf16.mxu0 %v5046_v63  ;;  %1616 = vmatpush1.bf16.msra.mxu1 %v3979_v41 }
 0xf11   :  { %1682 = vmatprep.subr.bf16.mxu1 %v3987_v43 }
 0xf79   :  { %v1554_v1 = vpop.permute.xlu0 %1553 }
 0xf7a   :  { %vm1555_vm7 = vcmp.eq.s32.totalorder %v3944_v30, %v1554_v1  ;;  %v5059_v1 = vld [vmem:[#allocation34_spill] sm:$0xff] }
 0xf7b   :  { %vm2701_vm8 = vmpackc.low %vm1555_vm7, %vm1555_vm7 }
 0xf7c   :  { %3198 = vmatmul.mubr.msk.bf16.vlgmr.msra.gmra.mxu0 %vm2701_vm8, %v5047_v57  ;;  %v5060_v57 = vld [vmem:[#allocation35_spill] sm:$0xff] }
 0xf7d   :  { %3202 = vmatpush3.bf16.msra.mxu0 %v3946_v32  ;;  %3217 = vmatprep.mubr.msk.bf16.mxu0 %vm3763_vm2, %v5046_v63 }
 0xf7e   :  { %3203 = vmatprep.subr.bf16.mxu0 %v5046_v63 }
 0xf81   :  { %3204 = vmatpush3.bf16.msra.mxu0 %v3951_v34 }
 0xf82   :  { %3205 = vmatprep.subr.bf16.mxu0 %v5046_v63 }
 0xf85   :  { %3206 = vmatpush3.bf16.msra.mxu0 %v3957_v35 }
 0xf86   :  { %3207 = vmatprep.subr.bf16.mxu0 %v5046_v63 }
 0xf89   :  { %3208 = vmatpush3.bf16.msra.mxu0 %v3961_v36 }
 0xf8a   :  { %3209 = vmatprep.subr.bf16.mxu0 %v5046_v63 }
 0xf8d   :  { %3210 = vmatpush3.bf16.msra.mxu0 %v3965_v37 }
 0xf8e   :  { %3211 = vmatprep.subr.bf16.mxu0 %v5046_v63 }
 0xf91   :  { %3212 = vmatpush3.bf16.msra.mxu0 %v3969_v38 }
 0xf92   :  { %3213 = vmatprep.subr.bf16.mxu0 %v5046_v63 }
 0xf95   :  { %3214 = vmatpush3.bf16.msra.mxu0 %v3974_v39 }
 0xf96   :  { %3215 = vmatprep.subr.bf16.mxu0 %v5046_v63 }
 0xf99   :  { %3216 = vmatpush3.bf16.msra.mxu0 %v3983_v42 }
 0xf9a   :  { %3221 = vmatprep.subr.bf16.mxu0 %v5046_v63 }
0x103c   :  { %v1593_v62 = vpop.f32.mrf.mxu0 }
0x103d   :  { %v1594_v46 = vadd.f32 %v1593_v62, %v3997_v45  ;;  %v5061_v62 = vld [vmem:[#allocation36_spill] sm:$0xff] }
0x103e   :  { %v3199_v58 = vpop.f32.mrf.mxu0 }
0x103f   :  { %v1599_v5 = vmax.f32 %v1594_v46, 0.0  ;;  %v5062_v46 = vld [vmem:[#allocation37_spill] sm:$0xff]  ;;  %v5063_v58 = vld [vmem:[#allocation38_spill] sm:$0xff] }
0x1040   :  { %v1596_v56 = vpop.f32.mrf.mxu0 }
0x1041   :  { %v1600_v54 = vpack.c.bf16 %v1599_v5, %v1599_v5  ;;  %v5064_v5 = vld [vmem:[#allocation39_spill] sm:$0xff]  ;;  %v5065_v56 = vld [vmem:[#allocation40_spill] sm:$0xff] }
0x1042   :  { %v3200_v53 = vpop.f32.mrf.mxu0 }
0x1043   :  { %1634 = vmatmul.mubr.bf16.vlgmr.msra.gmra.mxu1 %v1600_v54  ;;  %3218 = vmatmul.mubr.bf16.vlgmr.msra.gmra.mxu0 %v1600_v54  ;;  %v5066_v54 = vld [vmem:[#allocation41_spill] sm:$0xff]  ;;  %v5067_v53 = vld [vmem:[#allocation42_spill] sm:$0xff] }
0x1044   :  { %1683 = vmatpush1.bf16.msra.mxu1 %v4000_v51  ;;  %3222 = vmatpush3.bf16.msra.mxu0 %v4002_v52 }
0x1045   :  { %1684 = vmatprep.subr.bf16.mxu1 %v5048_v2  ;;  %1714 = vmatprep.mubr.bf16.mxu1 %v5045_v60  ;;  %v5055_v60 = vld [vmem:[#allocation30_spill] sm:$0xff]  ;;  %v5068_v2 = vld [vmem:[#allocation43_spill] sm:$0xff] }
0x1046   :  { %3223 = vmatprep.subr.bf16.mxu0 %v5046_v63  ;;  %3237 = vmatprep.mubr.msk.bf16.mxu0 %vm3763_vm2, %v5046_v63 }
0x1048   :  { %1685 = vmatpush1.bf16.msra.mxu1 %v5049_v49  ;;  %3224 = vmatpush3.bf16.msra.mxu0 %v5050_v29  ;;  %v5069_v49 = vld [vmem:[#allocation44_spill] sm:$0xff]  ;;  %v5070_v29 = vld [vmem:[#allocation45_spill] sm:$0xff] }
0x1049   :  { %1686 = vmatprep.subr.bf16.mxu1 %v5051_v48  ;;  %3225 = vmatprep.subr.bf16.mxu0 %v5046_v63  ;;  %v5071_v48 = vld [vmem:[#allocation46_spill] sm:$0xff] }
0x104c   :  { %1687 = vmatpush1.bf16.msra.mxu1 %v5052_v47  ;;  %3226 = vmatpush3.bf16.msra.mxu0 %v5053_v55  ;;  %v5072_v47 = vld [vmem:[#allocation47_spill] sm:$0xff]  ;;  %v5074_v55 = vld [vmem:[#allocation49_spill] sm:$0xff] }
0x104d   :  { %1688 = vmatprep.subr.bf16.mxu1 %v5054_v0  ;;  %3227 = vmatprep.subr.bf16.mxu0 %v5046_v63  ;;  %v5075_v0 = vld [vmem:[#allocation50_spill] sm:$0xff] }
0x1050   :  { %1689 = vmatpush1.bf16.msra.mxu1 %v5055_v60  ;;  %3228 = vmatpush3.bf16.msra.mxu0 %v5056_v59  ;;  %v5076_v60 = vld [vmem:[#allocation51_spill] sm:$0xff] }
0x1051   :  { %1690 = vmatprep.subr.bf16.mxu1 %v5057_v50  ;;  %3229 = vmatprep.subr.bf16.mxu0 %v5046_v63 }
0x1054   :  { %1691 = vmatpush1.bf16.msra.mxu1 %v5058_v33  ;;  %3230 = vmatpush3.bf16.msra.mxu0 %v5059_v1 }
0x1055   :  { %1692 = vmatprep.subr.bf16.mxu1 %v5060_v57  ;;  %3231 = vmatprep.subr.bf16.mxu0 %v5046_v63 }
0x1058   :  { %1693 = vmatpush1.bf16.msra.mxu1 %v5061_v62  ;;  %3232 = vmatpush3.bf16.msra.mxu0 %v5062_v46 }
0x1059   :  { %1694 = vmatprep.subr.bf16.mxu1 %v5063_v58  ;;  %3233 = vmatprep.subr.bf16.mxu0 %v5046_v63 }
0x105c   :  { %1695 = vmatpush1.bf16.msra.mxu1 %v5064_v5  ;;  %3234 = vmatpush3.bf16.msra.mxu0 %v5065_v56 }
0x105d   :  { %1696 = vmatprep.subr.bf16.mxu1 %v5066_v54  ;;  %3235 = vmatprep.subr.bf16.mxu0 %v5046_v63  ;;  %v5077_v54 = vld [vmem:[#allocation53_spill] sm:$0xff] }
0x1060   :  { %1697 = vmatpush1.bf16.msra.mxu1 %v5067_v53  ;;  %3236 = vmatpush3.bf16.msra.mxu0 %v5068_v2  ;;  %v5078_v2 = vld [vmem:[#allocation54_spill] sm:$0xff] }
0x1061   :  { %3241 = vmatprep.subr.bf16.mxu1 %v5046_v63 }
0x1063   :  { %1715 = vmatmul.mubr.bf16.vlgmr.msra.gmra.mxu1 %v4417_v31  ;;  %3238 = vmatmul.mubr.bf16.vlgmr.msra.gmra.mxu0 %v4417_v31  ;;  %v5073_v31 = vld [vmem:[#allocation48_spill] sm:$0xff] }
0x1064   :  { %3242 = vmatpush3.bf16.msra.mxu1 %v5069_v49  ;;  %3257 = vmatprep.mubr.msk.bf16.mxu1 %vm3763_vm2, %v5046_v63 }
0x1065   :  { %3243 = vmatprep.subr.bf16.mxu1 %v5046_v63 }
0x1068   :  { %3244 = vmatpush3.bf16.msra.mxu1 %v5070_v29 }
0x1069   :  { %3245 = vmatprep.subr.bf16.mxu1 %v5046_v63 }
0x106c   :  { %3246 = vmatpush3.bf16.msra.mxu1 %v5071_v48 }
0x106d   :  { %3247 = vmatprep.subr.bf16.mxu1 %v5046_v63 }
0x1070   :  { %3248 = vmatpush3.bf16.msra.mxu1 %v5072_v47 }
0x1071   :  { %3249 = vmatprep.subr.bf16.mxu1 %v5046_v63 }
0x1074   :  { %3250 = vmatpush3.bf16.msra.mxu1 %v5073_v31 }
0x1075   :  { %3251 = vmatprep.subr.bf16.mxu1 %v5046_v63 }
0x1078   :  { %3252 = vmatpush3.bf16.msra.mxu1 %v5074_v55 }
0x1079   :  { %3253 = vmatprep.subr.bf16.mxu1 %v5046_v63 }
0x107c   :  { %3254 = vmatpush3.bf16.msra.mxu1 %v5075_v0 }
0x107d   :  { %3255 = vmatprep.subr.bf16.mxu1 %v5046_v63 }
0x1080   :  { %3256 = vmatpush3.bf16.msra.mxu1 %v5076_v60 }
0x1103   :  { %v1635_v59 = vpop.f32.mrf.mxu1  ;;  %v1676_v50 = vpop.f32.mrf.mxu0 }
0x1104   :  { %v1636_v53 = vadd.f32 %v1635_v59, %v5077_v54 }
0x1105   :  { %v1637_v33 = vpop.f32.mrf.mxu1  ;;  %v3219_v1 = vpop.f32.mrf.mxu0 }
0x1107   :  { %v1639_v57 = vpop.f32.mrf.mxu1  ;;  %v1679_v62 = vpop.f32.mrf.mxu0 }
0x1108   :  { %v1638_v57 = vadd.f32 %v1637_v33, %v4135_v8 }
0x1109   :  { %v1640_v46 = vpop.f32.mrf.mxu1  ;;  %v3220_v58 = vpop.f32.mrf.mxu0 }
0x1123   :  { %v1716_v5 = vpop.f32.mrf.mxu1  ;;  %v1757_v56 = vpop.f32.mrf.mxu0 }
0x1124   :  { %v1717_v49 = vadd.f32 %v1716_v5, %v5078_v2 }
0x1125   :  { %v1718_v29 = vpop.f32.mrf.mxu1  ;;  %v3239_v48 = vpop.f32.mrf.mxu0 }
0x1126   :  { %v1763_v47 = vadd.f32 %v1717_v49, %v1636_v53  ;;  %v1719_v0 = vadd.f32 %v1718_v29, %v4133_v9  ;;  %v1758_v53 = vadd.f32 %v1757_v56, %v4139_v6  ;;  %v5079_v49 = vld [vmem:[#allocation52_spill] sm:$0xff] }
0x1127   :  { %v1720_v63 = vpop.f32.mrf.mxu1  ;;  %v1760_v31 = vpop.f32.mrf.mxu0  ;;  %v1677_v48 = vadd.f32 %v1676_v50, %v5079_v49 }
0x1128   :  { %v2703_v55 = vmul.f32 -1.442695, %v1763_v47  ;;  %v1770_v62 = vadd.f32 %v1719_v0, %v1638_v57 }
0x1129   :  { %v1721_v60 = vpop.f32.mrf.mxu1  ;;  %v3240_v1 = vpop.f32.mrf.mxu0 }
0x112a   :  { %3552 = vpow2.f32 %v2703_v55  ;;  %v2704_v46 = vmul.f32 -1.442695, %v1770_v62 }
0x112c   :  { %3554 = vpow2.f32 %v2704_v46 }
0x1137   :  { %v3553_v58 = vpop.eup %3552 }
0x1138   :  { %v1767_v59 = vadd.f32 1.0, %v3553_v58 }
0x1139   :  { %v3555_v5 = vpop.eup %3554 }
0x113a   :  { %3556 = vrcp.f32 %v1767_v59  ;;  %v1774_v54 = vadd.f32 1.0, %v3555_v5 }
0x113c   :  { %3558 = vrcp.f32 %v1774_v54 }
0x1147   :  { %v3557_v2 = vpop.eup %3556 }
0x1148   :  { %v1777_v29 = vmul.f32 %v3557_v2, %v1758_v53 }
0x1149   :  { %v3559_v63 = vpop.eup %3558 }
0x114a   :  { %v1778_v47 = vadd.f32 %v1777_v29, %v1677_v48  ;;  %v1780_v33 = vsub.f32 1.0, %v3559_v63  ;;  %v1782_v0 = vmul.f32 %v3559_v63, %v4413_v44 }
0x114c   :  { %3560 = vtanh.f32 %v1778_v47 }
0x1159   :  { %v3561_v31 = vpop.eup %3560 }
0x115a   :  { %v1781_v55 = vmul.f32 %v3561_v31, %v1780_v33 }
0x115c   :  { %v4545_v60 = vadd.f32 %v1782_v0, %v1781_v55 }
0x115e   :  { %v4549_v1 = vpack.c.bf16 %v4545_v60, %v4545_v60 }
0x1160   :  { %3258 = vmatmul.mubr.bf16.vlgmr.msra.gmra.mxu1 %v4549_v1 }
0x1220   :  { %v1819_v50 = vpop.f32.mrf.mxu1 }
0x1221   :  { %v1820_v56 = vadd.f32 %v4153_v61, %v1819_v50 }
0x1222   :  { %v3259_v57 = vpop.f32.mrf.mxu1  ;;  %1832 = sbr.rel (%p2706_p4) target bundleno = 5077 (0x13d5), region = 77 }
0x1223   :  { %1826 = vst [vmem:[#allocation14 + $0x6] sm:$0x3] %v1820_v56 }
0x1224   :  { %v1822_v62 = vpop.f32.mrf.mxu1 }
0x1226   :  { %v3260_v46 = vpop.f32.mrf.mxu1 }
0x1227   :  { %vm1833_vm9 = vcmask 1041408  }
0x1228   :  { %v1834_v44 = vsel %vm1833_vm9, %v1820_v56, -inf }
0x1229   :  { %1835 = vmax.xlane.f32.xlu0 %v1834_v44 }
0x12b2   :  { %v1836_v58 = vpop.xlane.xlu0 %1835 }
0x12b3   :  { %vm1837_vm10 = vcmp.eq.f32.partialorder %v1820_v56, %v1836_v58 }
0x12b4   :  { %v1838_v59 = vsel %vm1837_vm10, %v3944_v30, 128 }
0x12b5   :  { %v1839_v5 = vsel %vm1833_vm9, %v1838_v59, 2147483647 }
0x12b6   :  { %v1841_v54 = vshra.s32 %v1839_v5, 16  ;;  %v1840_v2 = vand.u32 65535, %v1839_v5 }
0x12b8   :  { %v1843_v53 = vcvt.s32.f32 %v1841_v54  ;;  %v1842_v48 = vcvt.s32.f32 %v1840_v2 }
0x12ba   :  { %1844 = vmin.xlane.f32.xlu0 %v1843_v53 }
0x1343   :  { %v1845_v49 = vpop.xlane.xlu0 %1844 }
0x1344   :  { %vm1846_vm11 = vcmp.eq.f32.partialorder %v1843_v53, %v1845_v49  ;;  %v1851_v47 = vcvt.f32.s32 %v1845_v49 }
0x1345   :  { %v1847_v29 = vsel %vm1846_vm11, %v1842_v48, inf }
0x1346   :  { %1848 = vmin.xlane.f32.xlu1 %v1847_v29  ;;  %v1852_v33 = vshll.u32 %v1851_v47, 16 }
0x13cf   :  { %v1849_v63 = vpop.xlane.xlu1 %1848 }
0x13d0   :  { %v1850_v31 = vcvt.f32.s32 %v1849_v63 }
0x13d2   :  { %v1853_v55 = vadd.s32 %v1852_v33, %v1850_v31 }
0x13d4   :  { %1855 = vst.msk [vmem:[#allocation3] sm:$0x3] %vm109_vm0, %v1853_v55 }
0x13d5 PF:  { %v5080_v0 = vmov 0   ;;  %s2707_s29 = sld [smem:[#allocation5 + $0x4]]  ;;  %v5081_v50 = vmov 0.0   ;;  %1914 = vmatprep.subr.bf16.mxu1 %v3879_v10  ;;  %v2708_v56 = vld [vmem:[%s4885_s1 + $0x8] sm:$0x3]  ;;  %v5083_v29 = vld [vmem:[#allocation23_spill] sm:$0xff] }
0x13d6   :  { %3562 = vset.pattern.permute.xlu0 %v5080_v0  ;;  %3261 = vmatprep.subr.bf16.mxu0 %v5081_v50  ;;  %v5082_v58 = vmov 1.0|1.0   ;;  %v5084_v47 = vld [vmem:[#allocation24_spill] sm:$0xff]  ;;  %v5085_v63 = vld [vmem:[#allocation25_spill] sm:$0xff]  ;;  %v5086_v33 = vld [vmem:[#allocation26_spill] sm:$0xff]  ;;  %s2714_s16 = sld [smem:[#allocation5 + $0x5]] }
0x13d7   :  { %3262 = vmatpush3.bf16.msra.mxu0 %v3864_v3  ;;  %3277 = vmatprep.mubr.msk.bf16.mxu0 %vm3763_vm2, %v5081_v50  ;;  %v5087_v31 = vld [vmem:[#allocation27_spill] sm:$0xff]  ;;  %v5088_v55 = vld [vmem:[#allocation28_spill] sm:$0xff] }
0x13d8   :  { %3263 = vmatprep.subr.bf16.mxu0 %v5081_v50  ;;  %1915 = vmatpush1.bf16.msra.mxu1 %v3881_v11 }
0x13d9   :  { %1946 = vmatprep.mubr.bf16.mxu1 %v5080_v0  ;;  %1916 = vmatprep.subr.bf16.mxu1 %v3889_v13 }
0x13db   :  { %3264 = vmatpush3.bf16.msra.mxu0 %v3867_v4  ;;  %p1857_p5 = scmp.eq.s32.totalorder %s2707_s29, 1  ;;  %v1860_v57 = vld [vmem:[#allocation3] sm:$0x3] }
0x13dc   :  { %3265 = vmatprep.subr.bf16.mxu0 %v5081_v50  ;;  %1917 = vmatpush1.bf16.msra.mxu1 %v3891_v14  ;;  %p2715_p6 = scmp.ne.s32.totalorder %s2714_s16, 0 }
0x13dd   :  { %s1861_s13 = scalar_select %p1857_p5, 1, 0  ;;  %1918 = vmatprep.subr.bf16.mxu1 %v3896_v16 }
0x13df   :  { %3266 = vmatpush3.bf16.msra.mxu0 %v3874_v7  ;;  %v1862_v62 = vstv %s1861_s13 }
0x13e0   :  { %3267 = vmatprep.subr.bf16.mxu0 %v5081_v50  ;;  %vm1863_vm12 = vcmp.eq.s32.totalorder %v1862_v62, 1  ;;  %1919 = vmatpush1.bf16.msra.mxu1 %v3899_v17  ;;  %v5092_v62 = vld [vmem:[#allocation32_spill] sm:$0xff] }
0x13e1   :  { %v1864_v46 = vsel %vm1863_vm12, %v2708_v56, %v1860_v57  ;;  %1920 = vmatprep.subr.bf16.mxu1 %v3906_v19  ;;  %v5089_v56 = vld [vmem:[#allocation29_spill] sm:$0xff]  ;;  %v5091_v57 = vld [vmem:[#allocation31_spill] sm:$0xff] }
0x13e2   :  { %1866 = vperm.xlu0 %3562, %v1864_v46   ;;  %v5093_v46 = vld [vmem:[#allocation33_spill] sm:$0xff] }
0x13e3   :  { %3268 = vmatpush3.bf16.msra.mxu0 %v3884_v12 }
0x13e4   :  { %3269 = vmatprep.subr.bf16.mxu0 %v5081_v50  ;;  %1921 = vmatpush1.bf16.msra.mxu1 %v3908_v20 }
0x13e5   :  { %1922 = vmatprep.subr.bf16.mxu1 %v3916_v22 }
0x13e7   :  { %3270 = vmatpush3.bf16.msra.mxu0 %v3893_v15 }
0x13e8   :  { %3271 = vmatprep.subr.bf16.mxu0 %v5081_v50  ;;  %1923 = vmatpush1.bf16.msra.mxu1 %v3918_v23 }
0x13e9   :  { %1924 = vmatprep.subr.bf16.mxu1 %v3926_v25 }
0x13eb   :  { %3272 = vmatpush3.bf16.msra.mxu0 %v3903_v18 }
0x13ec   :  { %3273 = vmatprep.subr.bf16.mxu0 %v5081_v50  ;;  %1925 = vmatpush1.bf16.msra.mxu1 %v3928_v26 }
0x13ed   :  { %1926 = vmatprep.subr.bf16.mxu1 %v3934_v27 }
0x13ef   :  { %3274 = vmatpush3.bf16.msra.mxu0 %v3913_v21 }
0x13f0   :  { %3275 = vmatprep.subr.bf16.mxu0 %v5081_v50  ;;  %1927 = vmatpush1.bf16.msra.mxu1 %v3936_v28 }
0x13f1   :  { %1928 = vmatprep.subr.bf16.mxu1 %v3977_v40 }
0x13f3   :  { %3276 = vmatpush3.bf16.msra.mxu0 %v3923_v24 }
0x13f4   :  { %3281 = vmatprep.subr.bf16.mxu0 %v5081_v50  ;;  %1929 = vmatpush1.bf16.msra.mxu1 %v3979_v41 }
0x13f5   :  { %1995 = vmatprep.subr.bf16.mxu1 %v3987_v43 }
0x145d   :  { %v1867_v44 = vpop.permute.xlu0 %1866 }
0x145e   :  { %vm1868_vm13 = vcmp.eq.s32.totalorder %v3944_v30, %v1867_v44  ;;  %v5094_v44 = vld [vmem:[#allocation34_spill] sm:$0xff] }
0x145f   :  { %vm2710_vm14 = vmpackc.low %vm1868_vm13, %vm1868_vm13 }
0x1460   :  { %3278 = vmatmul.mubr.msk.bf16.vlgmr.msra.gmra.mxu0 %vm2710_vm14, %v5082_v58  ;;  %v5095_v58 = vld [vmem:[#allocation35_spill] sm:$0xff] }
0x1461   :  { %3282 = vmatpush3.bf16.msra.mxu0 %v3946_v32  ;;  %3297 = vmatprep.mubr.msk.bf16.mxu0 %vm3763_vm2, %v5081_v50 }
0x1462   :  { %3283 = vmatprep.subr.bf16.mxu0 %v5081_v50 }
0x1465   :  { %3284 = vmatpush3.bf16.msra.mxu0 %v3951_v34 }
0x1466   :  { %3285 = vmatprep.subr.bf16.mxu0 %v5081_v50 }
0x1469   :  { %3286 = vmatpush3.bf16.msra.mxu0 %v3957_v35 }
0x146a   :  { %3287 = vmatprep.subr.bf16.mxu0 %v5081_v50 }
0x146d   :  { %3288 = vmatpush3.bf16.msra.mxu0 %v3961_v36 }
0x146e   :  { %3289 = vmatprep.subr.bf16.mxu0 %v5081_v50 }
0x1471   :  { %3290 = vmatpush3.bf16.msra.mxu0 %v3965_v37 }
0x1472   :  { %3291 = vmatprep.subr.bf16.mxu0 %v5081_v50 }
0x1475   :  { %3292 = vmatpush3.bf16.msra.mxu0 %v3969_v38 }
0x1476   :  { %3293 = vmatprep.subr.bf16.mxu0 %v5081_v50 }
0x1479   :  { %3294 = vmatpush3.bf16.msra.mxu0 %v3974_v39 }
0x147a   :  { %3295 = vmatprep.subr.bf16.mxu0 %v5081_v50 }
0x147d   :  { %3296 = vmatpush3.bf16.msra.mxu0 %v3983_v42 }
0x147e   :  { %3301 = vmatprep.subr.bf16.mxu0 %v5081_v50 }
0x1520   :  { %v1906_v59 = vpop.f32.mrf.mxu0 }
0x1521   :  { %v1907_v5 = vadd.f32 %v1906_v59, %v3997_v45  ;;  %v5096_v59 = vld [vmem:[#allocation36_spill] sm:$0xff] }
0x1522   :  { %v3279_v54 = vpop.f32.mrf.mxu0 }
0x1523   :  { %v1912_v53 = vmax.f32 %v1907_v5, 0.0  ;;  %v5097_v5 = vld [vmem:[#allocation37_spill] sm:$0xff]  ;;  %v5098_v54 = vld [vmem:[#allocation38_spill] sm:$0xff] }
0x1524   :  { %v1909_v2 = vpop.f32.mrf.mxu0 }
0x1525   :  { %v1913_v49 = vpack.c.bf16 %v1912_v53, %v1912_v53  ;;  %v5099_v53 = vld [vmem:[#allocation39_spill] sm:$0xff]  ;;  %v5100_v2 = vld [vmem:[#allocation40_spill] sm:$0xff] }
0x1526   :  { %v3280_v48 = vpop.f32.mrf.mxu0 }
0x1527   :  { %1947 = vmatmul.mubr.bf16.vlgmr.msra.gmra.mxu1 %v1913_v49  ;;  %3298 = vmatmul.mubr.bf16.vlgmr.msra.gmra.mxu0 %v1913_v49  ;;  %v5101_v49 = vld [vmem:[#allocation41_spill] sm:$0xff]  ;;  %v5102_v48 = vld [vmem:[#allocation42_spill] sm:$0xff] }
0x1528   :  { %1996 = vmatpush1.bf16.msra.mxu1 %v4000_v51  ;;  %3302 = vmatpush3.bf16.msra.mxu0 %v4002_v52 }
0x1529   :  { %1997 = vmatprep.subr.bf16.mxu1 %v5083_v29  ;;  %2027 = vmatprep.mubr.bf16.mxu1 %v5080_v0  ;;  %v5090_v0 = vld [vmem:[#allocation30_spill] sm:$0xff]  ;;  %v5103_v29 = vld [vmem:[#allocation43_spill] sm:$0xff] }
0x152a   :  { %3303 = vmatprep.subr.bf16.mxu0 %v5081_v50  ;;  %3317 = vmatprep.mubr.msk.bf16.mxu0 %vm3763_vm2, %v5081_v50 }
0x152c   :  { %1998 = vmatpush1.bf16.msra.mxu1 %v5084_v47  ;;  %3304 = vmatpush3.bf16.msra.mxu0 %v5085_v63  ;;  %v5104_v47 = vld [vmem:[#allocation44_spill] sm:$0xff]  ;;  %v5105_v63 = vld [vmem:[#allocation45_spill] sm:$0xff] }
0x152d   :  { %1999 = vmatprep.subr.bf16.mxu1 %v5086_v33  ;;  %3305 = vmatprep.subr.bf16.mxu0 %v5081_v50  ;;  %v5106_v33 = vld [vmem:[#allocation46_spill] sm:$0xff] }
0x1530   :  { %2000 = vmatpush1.bf16.msra.mxu1 %v5087_v31  ;;  %3306 = vmatpush3.bf16.msra.mxu0 %v5088_v55  ;;  %v5107_v31 = vld [vmem:[#allocation47_spill] sm:$0xff]  ;;  %v5109_v55 = vld [vmem:[#allocation49_spill] sm:$0xff] }
0x1531   :  { %2001 = vmatprep.subr.bf16.mxu1 %v5089_v56  ;;  %3307 = vmatprep.subr.bf16.mxu0 %v5081_v50  ;;  %v5110_v56 = vld [vmem:[#allocation50_spill] sm:$0xff] }
0x1534   :  { %2002 = vmatpush1.bf16.msra.mxu1 %v5090_v0  ;;  %3308 = vmatpush3.bf16.msra.mxu0 %v5091_v57  ;;  %v5111_v0 = vld [vmem:[#allocation51_spill] sm:$0xff] }
0x1535   :  { %2003 = vmatprep.subr.bf16.mxu1 %v5092_v62  ;;  %3309 = vmatprep.subr.bf16.mxu0 %v5081_v50 }
0x1538   :  { %2004 = vmatpush1.bf16.msra.mxu1 %v5093_v46  ;;  %3310 = vmatpush3.bf16.msra.mxu0 %v5094_v44 }
0x1539   :  { %2005 = vmatprep.subr.bf16.mxu1 %v5095_v58  ;;  %3311 = vmatprep.subr.bf16.mxu0 %v5081_v50 }
0x153c   :  { %2006 = vmatpush1.bf16.msra.mxu1 %v5096_v59  ;;  %3312 = vmatpush3.bf16.msra.mxu0 %v5097_v5 }
0x153d   :  { %2007 = vmatprep.subr.bf16.mxu1 %v5098_v54  ;;  %3313 = vmatprep.subr.bf16.mxu0 %v5081_v50 }
0x1540   :  { %2008 = vmatpush1.bf16.msra.mxu1 %v5099_v53  ;;  %3314 = vmatpush3.bf16.msra.mxu0 %v5100_v2 }
0x1541   :  { %2009 = vmatprep.subr.bf16.mxu1 %v5101_v49  ;;  %3315 = vmatprep.subr.bf16.mxu0 %v5081_v50  ;;  %v5112_v49 = vld [vmem:[#allocation53_spill] sm:$0xff] }
0x1544   :  { %2010 = vmatpush1.bf16.msra.mxu1 %v5102_v48  ;;  %3316 = vmatpush3.bf16.msra.mxu0 %v5103_v29  ;;  %v5113_v29 = vld [vmem:[#allocation54_spill] sm:$0xff] }
0x1545   :  { %3321 = vmatprep.subr.bf16.mxu1 %v5081_v50 }
0x1547   :  { %2028 = vmatmul.mubr.bf16.vlgmr.msra.gmra.mxu1 %v4549_v1  ;;  %3318 = vmatmul.mubr.bf16.vlgmr.msra.gmra.mxu0 %v4549_v1  ;;  %v5108_v1 = vld [vmem:[#allocation48_spill] sm:$0xff] }
0x1548   :  { %3322 = vmatpush3.bf16.msra.mxu1 %v5104_v47  ;;  %3337 = vmatprep.mubr.msk.bf16.mxu1 %vm3763_vm2, %v5081_v50 }
0x1549   :  { %3323 = vmatprep.subr.bf16.mxu1 %v5081_v50 }
0x154c   :  { %3324 = vmatpush3.bf16.msra.mxu1 %v5105_v63 }
0x154d   :  { %3325 = vmatprep.subr.bf16.mxu1 %v5081_v50 }
0x1550   :  { %3326 = vmatpush3.bf16.msra.mxu1 %v5106_v33 }
0x1551   :  { %3327 = vmatprep.subr.bf16.mxu1 %v5081_v50 }
0x1554   :  { %3328 = vmatpush3.bf16.msra.mxu1 %v5107_v31 }
0x1555   :  { %3329 = vmatprep.subr.bf16.mxu1 %v5081_v50 }
0x1558   :  { %3330 = vmatpush3.bf16.msra.mxu1 %v5108_v1 }
0x1559   :  { %3331 = vmatprep.subr.bf16.mxu1 %v5081_v50 }
0x155c   :  { %3332 = vmatpush3.bf16.msra.mxu1 %v5109_v55 }
0x155d   :  { %3333 = vmatprep.subr.bf16.mxu1 %v5081_v50 }
0x1560   :  { %3334 = vmatpush3.bf16.msra.mxu1 %v5110_v56 }
0x1561   :  { %3335 = vmatprep.subr.bf16.mxu1 %v5081_v50 }
0x1564   :  { %3336 = vmatpush3.bf16.msra.mxu1 %v5111_v0 }
0x15e7   :  { %v1948_v57 = vpop.f32.mrf.mxu1  ;;  %v1989_v62 = vpop.f32.mrf.mxu0 }
0x15e8   :  { %v1949_v48 = vadd.f32 %v1948_v57, %v5112_v49 }
0x15e9   :  { %v1950_v46 = vpop.f32.mrf.mxu1  ;;  %v3299_v44 = vpop.f32.mrf.mxu0 }
0x15eb   :  { %v1952_v58 = vpop.f32.mrf.mxu1  ;;  %v1992_v59 = vpop.f32.mrf.mxu0 }
0x15ec   :  { %v1951_v58 = vadd.f32 %v1950_v46, %v4135_v8 }
0x15ed   :  { %v1953_v5 = vpop.f32.mrf.mxu1  ;;  %v3300_v54 = vpop.f32.mrf.mxu0 }
0x1607   :  { %v2029_v53 = vpop.f32.mrf.mxu1  ;;  %v2070_v2 = vpop.f32.mrf.mxu0 }
0x1608   :  { %v2030_v47 = vadd.f32 %v2029_v53, %v5113_v29 }
0x1609   :  { %v2031_v63 = vpop.f32.mrf.mxu1  ;;  %v3319_v33 = vpop.f32.mrf.mxu0 }
0x160a   :  { %v2076_v31 = vadd.f32 %v2030_v47, %v1949_v48  ;;  %v2032_v56 = vadd.f32 %v2031_v63, %v4133_v9  ;;  %v2071_v48 = vadd.f32 %v2070_v2, %v4139_v6  ;;  %v5114_v47 = vld [vmem:[#allocation52_spill] sm:$0xff] }
0x160b   :  { %v2033_v50 = vpop.f32.mrf.mxu1  ;;  %v2073_v1 = vpop.f32.mrf.mxu0  ;;  %v1990_v33 = vadd.f32 %v1989_v62, %v5114_v47 }
0x160c   :  { %v2712_v55 = vmul.f32 -1.442695, %v2076_v31  ;;  %v2083_v59 = vadd.f32 %v2032_v56, %v1951_v58 }
0x160d   :  { %v2034_v0 = vpop.f32.mrf.mxu1  ;;  %v3320_v44 = vpop.f32.mrf.mxu0 }
0x160e   :  { %3563 = vpow2.f32 %v2712_v55  ;;  %v2713_v5 = vmul.f32 -1.442695, %v2083_v59 }
0x1610   :  { %3565 = vpow2.f32 %v2713_v5 }
0x161b   :  { %v3564_v54 = vpop.eup %3563 }
0x161c   :  { %v2080_v57 = vadd.f32 1.0, %v3564_v54 }
0x161d   :  { %v3566_v53 = vpop.eup %3565 }
0x161e   :  { %3567 = vrcp.f32 %v2080_v57  ;;  %v2087_v49 = vadd.f32 1.0, %v3566_v53 }
0x1620   :  { %3569 = vrcp.f32 %v2087_v49 }
0x162b   :  { %v3568_v29 = vpop.eup %3567 }
0x162c   :  { %v2090_v63 = vmul.f32 %v3568_v29, %v2071_v48 }
0x162d   :  { %v3570_v50 = vpop.eup %3569 }
0x162e   :  { %v2091_v31 = vadd.f32 %v2090_v63, %v1990_v33  ;;  %v2093_v46 = vsub.f32 1.0, %v3570_v50  ;;  %v2095_v56 = vmul.f32 %v3570_v50, %v4545_v60 }
0x1630   :  { %3571 = vtanh.f32 %v2091_v31 }
0x163d   :  { %v3572_v1 = vpop.eup %3571 }
0x163e   :  { %v2094_v55 = vmul.f32 %v3572_v1, %v2093_v46 }
0x1640   :  { %v4677_v0 = vadd.f32 %v2095_v56, %v2094_v55 }
0x1642   :  { %v4681_v44 = vpack.c.bf16 %v4677_v0, %v4677_v0 }
0x1644   :  { %3338 = vmatmul.mubr.bf16.vlgmr.msra.gmra.mxu1 %v4681_v44 }
0x1704   :  { %v2132_v62 = vpop.f32.mrf.mxu1 }
0x1705   :  { %v2133_v2 = vadd.f32 %v4153_v61, %v2132_v62 }
0x1706   :  { %v3339_v58 = vpop.f32.mrf.mxu1  ;;  %2145 = sbr.rel (%p2715_p6) target bundleno = 6329 (0x18b9), region = 81 }
0x1707   :  { %2139 = vst [vmem:[#allocation14 + $0x8] sm:$0x3] %v2133_v2 }
0x1708   :  { %v2135_v59 = vpop.f32.mrf.mxu1 }
0x170a   :  { %v3340_v5 = vpop.f32.mrf.mxu1 }
0x170b   :  { %vm2146_vm15 = vcmask 1041408  }
0x170c   :  { %v2147_v60 = vsel %vm2146_vm15, %v2133_v2, -inf }
0x170d   :  { %2148 = vmax.xlane.f32.xlu0 %v2147_v60 }
0x1796   :  { %v2149_v54 = vpop.xlane.xlu0 %2148 }
0x1797   :  { %vm2150_vm1 = vcmp.eq.f32.partialorder %v2133_v2, %v2149_v54 }
0x1798   :  { %v2151_v57 = vsel %vm2150_vm1, %v3944_v30, 128 }
0x1799   :  { %v2152_v53 = vsel %vm2146_vm15, %v2151_v57, 2147483647 }
0x179a   :  { %v2154_v49 = vshra.s32 %v2152_v53, 16  ;;  %v2153_v29 = vand.u32 65535, %v2152_v53 }
0x179c   :  { %v2156_v48 = vcvt.s32.f32 %v2154_v49  ;;  %v2155_v33 = vcvt.s32.f32 %v2153_v29 }
0x179e   :  { %2157 = vmin.xlane.f32.xlu0 %v2156_v48 }
0x1827   :  { %v2158_v47 = vpop.xlane.xlu0 %2157 }
0x1828   :  { %vm2159_vm3 = vcmp.eq.f32.partialorder %v2156_v48, %v2158_v47  ;;  %v2164_v31 = vcvt.f32.s32 %v2158_v47 }
0x1829   :  { %v2160_v63 = vsel %vm2159_vm3, %v2155_v33, inf }
0x182a   :  { %2161 = vmin.xlane.f32.xlu1 %v2160_v63  ;;  %v2165_v46 = vshll.u32 %v2164_v31, 16 }
0x18b3   :  { %v2162_v50 = vpop.xlane.xlu1 %2161 }
0x18b4   :  { %v2163_v1 = vcvt.f32.s32 %v2162_v50 }
0x18b6   :  { %v2166_v55 = vadd.s32 %v2165_v46, %v2163_v1 }
0x18b8   :  { %2168 = vst.msk [vmem:[#allocation3] sm:$0x3] %vm109_vm0, %v2166_v55 }
0x18b9 PF:  { %v5115_v56 = vmov 0   ;;  %s2716_s17 = sld [smem:[#allocation5 + $0x5]]  ;;  %v5116_v62 = vmov 0.0   ;;  %2227 = vmatprep.subr.bf16.mxu1 %v3879_v10  ;;  %v5141_v2 = vld [vmem:[#allocation46_spill] sm:$0xff]  ;;  %v5142_v58 = vld [vmem:[#allocation47_spill] sm:$0xff]  ;;  %v5144_v59 = vld [vmem:[#allocation49_spill] sm:$0xff] }
0x18ba   :  { %3573 = vset.pattern.permute.xlu0 %v5115_v56  ;;  %3341 = vmatprep.subr.bf16.mxu0 %v5116_v62  ;;  %v5145_v5 = vld [vmem:[#allocation50_spill] sm:$0xff]  ;;  %v5146_v60 = vld [vmem:[#allocation51_spill] sm:$0xff]  ;;  %v5147_v50 = vld [vmem:[#allocation53_spill] sm:$0xff] }
0x18bb   :  { %3342 = vmatpush3.bf16.msra.mxu0 %v3864_v3  ;;  %3357 = vmatprep.mubr.msk.bf16.mxu0 %vm3763_vm2, %v5116_v62  ;;  %v2717_v3 = vld [vmem:[%s4885_s1 + $0xa] sm:$0x3]  ;;  %s2723_s1 = sld [smem:[#allocation5 + $0x6]] }
0x18bc   :  { %3343 = vmatprep.subr.bf16.mxu0 %v5116_v62  ;;  %2228 = vmatpush1.bf16.msra.mxu1 %v3881_v11  ;;  %v5148_v1 = vld [vmem:[#allocation54_spill] sm:$0xff] }
0x18bd   :  { %2259 = vmatprep.mubr.bf16.mxu1 %v5115_v56  ;;  %2229 = vmatprep.subr.bf16.mxu1 %v3889_v13 }
0x18bf   :  { %3344 = vmatpush3.bf16.msra.mxu0 %v3867_v4  ;;  %p2170_p7 = scmp.eq.s32.totalorder %s2716_s17, 1  ;;  %v2173_v10 = vld [vmem:[#allocation3] sm:$0x3] }
0x18c0   :  { %3345 = vmatprep.subr.bf16.mxu0 %v5116_v62  ;;  %2230 = vmatpush1.bf16.msra.mxu1 %v3891_v14 }
0x18c1   :  { %s2174_s18 = scalar_select %p2170_p7, 1, 0  ;;  %2231 = vmatprep.subr.bf16.mxu1 %v3896_v16 }
0x18c2   :  { %p2724_p8 = scmp.ne.s32.totalorder %s2723_s1, 0 }
0x18c3   :  { %3346 = vmatpush3.bf16.msra.mxu0 %v3874_v7  ;;  %v2175_v11 = vstv %s2174_s18 }
0x18c4   :  { %3347 = vmatprep.subr.bf16.mxu0 %v5116_v62  ;;  %vm2176_vm4 = vcmp.eq.s32.totalorder %v2175_v11, 1  ;;  %2232 = vmatpush1.bf16.msra.mxu1 %v3899_v17 }
0x18c5   :  { %v2177_v4 = vsel %vm2176_vm4, %v2717_v3, %v2173_v10  ;;  %2233 = vmatprep.subr.bf16.mxu1 %v3906_v19 }
0x18c6   :  { %2179 = vperm.xlu0 %3573, %v2177_v4  }
0x18c7   :  { %3348 = vmatpush3.bf16.msra.mxu0 %v3884_v12  ;;  %v5117_v12 = vmov 1.0|1.0  }
0x18c8   :  { %3349 = vmatprep.subr.bf16.mxu0 %v5116_v62  ;;  %2234 = vmatpush1.bf16.msra.mxu1 %v3908_v20  ;;  %v5118_v20 = vld [vmem:[#allocation23_spill] sm:$0xff] }
0x18c9   :  { %2235 = vmatprep.subr.bf16.mxu1 %v3916_v22  ;;  %v5120_v22 = vld [vmem:[#allocation25_spill] sm:$0xff] }
0x18cb   :  { %3350 = vmatpush3.bf16.msra.mxu0 %v3893_v15 }
0x18cc   :  { %3351 = vmatprep.subr.bf16.mxu0 %v5116_v62  ;;  %2236 = vmatpush1.bf16.msra.mxu1 %v3918_v23  ;;  %v5121_v23 = vld [vmem:[#allocation26_spill] sm:$0xff] }
0x18cd   :  { %2237 = vmatprep.subr.bf16.mxu1 %v3926_v25  ;;  %v5123_v25 = vld [vmem:[#allocation28_spill] sm:$0xff] }
0x18cf   :  { %3352 = vmatpush3.bf16.msra.mxu0 %v3903_v18 }
0x18d0   :  { %3353 = vmatprep.subr.bf16.mxu0 %v5116_v62  ;;  %2238 = vmatpush1.bf16.msra.mxu1 %v3928_v26  ;;  %v5124_v26 = vld [vmem:[#allocation29_spill] sm:$0xff] }
0x18d1   :  { %2239 = vmatprep.subr.bf16.mxu1 %v3934_v27  ;;  %v5125_v27 = vld [vmem:[#allocation30_spill] sm:$0xff] }
0x18d3   :  { %3354 = vmatpush3.bf16.msra.mxu0 %v3913_v21  ;;  %v5119_v21 = vld [vmem:[#allocation24_spill] sm:$0xff] }
0x18d4   :  { %3355 = vmatprep.subr.bf16.mxu0 %v5116_v62  ;;  %2240 = vmatpush1.bf16.msra.mxu1 %v3936_v28  ;;  %v5126_v28 = vld [vmem:[#allocation31_spill] sm:$0xff] }
0x18d5   :  { %2241 = vmatprep.subr.bf16.mxu1 %v3977_v40  ;;  %v5134_v40 = vld [vmem:[#allocation39_spill] sm:$0xff] }
0x18d7   :  { %3356 = vmatpush3.bf16.msra.mxu0 %v3923_v24  ;;  %v5122_v24 = vld [vmem:[#allocation27_spill] sm:$0xff] }
0x18d8   :  { %3361 = vmatprep.subr.bf16.mxu0 %v5116_v62  ;;  %2242 = vmatpush1.bf16.msra.mxu1 %v3979_v41  ;;  %v5135_v41 = vld [vmem:[#allocation40_spill] sm:$0xff] }
0x18d9   :  { %2308 = vmatprep.subr.bf16.mxu1 %v3987_v43  ;;  %v5137_v43 = vld [vmem:[#allocation42_spill] sm:$0xff] }
0x1941   :  { %v2180_v7 = vpop.permute.xlu0 %2179 }
0x1942   :  { %vm2181_vm5 = vcmp.eq.s32.totalorder %v3944_v30, %v2180_v7 }
0x1943   :  { %vm2719_vm6 = vmpackc.low %vm2181_vm5, %vm2181_vm5 }
0x1944   :  { %3358 = vmatmul.mubr.msk.bf16.vlgmr.msra.gmra.mxu0 %vm2719_vm6, %v5117_v12 }
0x1945   :  { %3362 = vmatpush3.bf16.msra.mxu0 %v3946_v32  ;;  %3377 = vmatprep.mubr.msk.bf16.mxu0 %vm3763_vm2, %v5116_v62  ;;  %v5127_v32 = vld [vmem:[#allocation32_spill] sm:$0xff] }
0x1946   :  { %3363 = vmatprep.subr.bf16.mxu0 %v5116_v62 }
0x1949   :  { %3364 = vmatpush3.bf16.msra.mxu0 %v3951_v34  ;;  %v5128_v34 = vld [vmem:[#allocation33_spill] sm:$0xff] }
0x194a   :  { %3365 = vmatprep.subr.bf16.mxu0 %v5116_v62 }
0x194d   :  { %3366 = vmatpush3.bf16.msra.mxu0 %v3957_v35  ;;  %v5129_v35 = vld [vmem:[#allocation34_spill] sm:$0xff] }
0x194e   :  { %3367 = vmatprep.subr.bf16.mxu0 %v5116_v62 }
0x1951   :  { %3368 = vmatpush3.bf16.msra.mxu0 %v3961_v36  ;;  %v5130_v36 = vld [vmem:[#allocation35_spill] sm:$0xff] }
0x1952   :  { %3369 = vmatprep.subr.bf16.mxu0 %v5116_v62 }
0x1955   :  { %3370 = vmatpush3.bf16.msra.mxu0 %v3965_v37  ;;  %v5131_v37 = vld [vmem:[#allocation36_spill] sm:$0xff] }
0x1956   :  { %3371 = vmatprep.subr.bf16.mxu0 %v5116_v62 }
0x1959   :  { %3372 = vmatpush3.bf16.msra.mxu0 %v3969_v38  ;;  %v5132_v38 = vld [vmem:[#allocation37_spill] sm:$0xff] }
0x195a   :  { %3373 = vmatprep.subr.bf16.mxu0 %v5116_v62 }
0x195d   :  { %3374 = vmatpush3.bf16.msra.mxu0 %v3974_v39  ;;  %v5133_v39 = vld [vmem:[#allocation38_spill] sm:$0xff] }
0x195e   :  { %3375 = vmatprep.subr.bf16.mxu0 %v5116_v62 }
0x1961   :  { %3376 = vmatpush3.bf16.msra.mxu0 %v3983_v42  ;;  %v5136_v42 = vld [vmem:[#allocation41_spill] sm:$0xff] }
0x1962   :  { %3381 = vmatprep.subr.bf16.mxu0 %v5116_v62 }
0x1a04   :  { %v2219_v13 = vpop.f32.mrf.mxu0 }
0x1a05   :  { %v2220_v14 = vadd.f32 %v2219_v13, %v3997_v45  ;;  %v5138_v45 = vld [vmem:[#allocation43_spill] sm:$0xff] }
0x1a06   :  { %v3359_v15 = vpop.f32.mrf.mxu0 }
0x1a07   :  { %v2225_v16 = vmax.f32 %v2220_v14, 0.0 }
0x1a08   :  { %v2222_v17 = vpop.f32.mrf.mxu0 }
0x1a09   :  { %v2226_v18 = vpack.c.bf16 %v2225_v16, %v2225_v16 }
0x1a0a   :  { %v3360_v19 = vpop.f32.mrf.mxu0 }
0x1a0b   :  { %2260 = vmatmul.mubr.bf16.vlgmr.msra.gmra.mxu1 %v2226_v18  ;;  %3378 = vmatmul.mubr.bf16.vlgmr.msra.gmra.mxu0 %v2226_v18 }
0x1a0c   :  { %2309 = vmatpush1.bf16.msra.mxu1 %v4000_v51  ;;  %3382 = vmatpush3.bf16.msra.mxu0 %v4002_v52  ;;  %v5139_v51 = vld [vmem:[#allocation44_spill] sm:$0xff]  ;;  %v5140_v52 = vld [vmem:[#allocation45_spill] sm:$0xff] }
0x1a0d   :  { %2310 = vmatprep.subr.bf16.mxu1 %v5118_v20  ;;  %2340 = vmatprep.mubr.bf16.mxu1 %v5115_v56 }
0x1a0e   :  { %3383 = vmatprep.subr.bf16.mxu0 %v5116_v62  ;;  %3397 = vmatprep.mubr.msk.bf16.mxu0 %vm3763_vm2, %v5116_v62 }
0x1a10   :  { %2311 = vmatpush1.bf16.msra.mxu1 %v5119_v21  ;;  %3384 = vmatpush3.bf16.msra.mxu0 %v5120_v22 }
0x1a11   :  { %2312 = vmatprep.subr.bf16.mxu1 %v5121_v23  ;;  %3385 = vmatprep.subr.bf16.mxu0 %v5116_v62  ;;  %v5149_v23 = vld [vmem:[#allocation52_spill] sm:$0xff] }
0x1a14   :  { %2313 = vmatpush1.bf16.msra.mxu1 %v5122_v24  ;;  %3386 = vmatpush3.bf16.msra.mxu0 %v5123_v25 }
0x1a15   :  { %2314 = vmatprep.subr.bf16.mxu1 %v5124_v26  ;;  %3387 = vmatprep.subr.bf16.mxu0 %v5116_v62 }
0x1a18   :  { %2315 = vmatpush1.bf16.msra.mxu1 %v5125_v27  ;;  %3388 = vmatpush3.bf16.msra.mxu0 %v5126_v28 }
0x1a19   :  { %2316 = vmatprep.subr.bf16.mxu1 %v5127_v32  ;;  %3389 = vmatprep.subr.bf16.mxu0 %v5116_v62 }
0x1a1c   :  { %2317 = vmatpush1.bf16.msra.mxu1 %v5128_v34  ;;  %3390 = vmatpush3.bf16.msra.mxu0 %v5129_v35 }
0x1a1d   :  { %2318 = vmatprep.subr.bf16.mxu1 %v5130_v36  ;;  %3391 = vmatprep.subr.bf16.mxu0 %v5116_v62 }
0x1a20   :  { %2319 = vmatpush1.bf16.msra.mxu1 %v5131_v37  ;;  %3392 = vmatpush3.bf16.msra.mxu0 %v5132_v38 }
0x1a21   :  { %2320 = vmatprep.subr.bf16.mxu1 %v5133_v39  ;;  %3393 = vmatprep.subr.bf16.mxu0 %v5116_v62 }
0x1a24   :  { %2321 = vmatpush1.bf16.msra.mxu1 %v5134_v40  ;;  %3394 = vmatpush3.bf16.msra.mxu0 %v5135_v41 }
0x1a25   :  { %2322 = vmatprep.subr.bf16.mxu1 %v5136_v42  ;;  %3395 = vmatprep.subr.bf16.mxu0 %v5116_v62 }
0x1a28   :  { %2323 = vmatpush1.bf16.msra.mxu1 %v5137_v43  ;;  %3396 = vmatpush3.bf16.msra.mxu0 %v5138_v45 }
0x1a29   :  { %3401 = vmatprep.subr.bf16.mxu1 %v5116_v62 }
0x1a2b   :  { %2341 = vmatmul.mubr.bf16.vlgmr.msra.gmra.mxu1 %v4681_v44  ;;  %3398 = vmatmul.mubr.bf16.vlgmr.msra.gmra.mxu0 %v4681_v44  ;;  %v5143_v44 = vld [vmem:[#allocation48_spill] sm:$0xff] }
0x1a2c   :  { %3402 = vmatpush3.bf16.msra.mxu1 %v5139_v51  ;;  %3417 = vmatprep.mubr.msk.bf16.mxu1 %vm3763_vm2, %v5116_v62 }
0x1a2d   :  { %3403 = vmatprep.subr.bf16.mxu1 %v5116_v62 }
0x1a30   :  { %3404 = vmatpush3.bf16.msra.mxu1 %v5140_v52 }
0x1a31   :  { %3405 = vmatprep.subr.bf16.mxu1 %v5116_v62 }
0x1a34   :  { %3406 = vmatpush3.bf16.msra.mxu1 %v5141_v2 }
0x1a35   :  { %3407 = vmatprep.subr.bf16.mxu1 %v5116_v62 }
0x1a38   :  { %3408 = vmatpush3.bf16.msra.mxu1 %v5142_v58 }
0x1a39   :  { %3409 = vmatprep.subr.bf16.mxu1 %v5116_v62 }
0x1a3c   :  { %3410 = vmatpush3.bf16.msra.mxu1 %v5143_v44 }
0x1a3d   :  { %3411 = vmatprep.subr.bf16.mxu1 %v5116_v62 }
0x1a40   :  { %3412 = vmatpush3.bf16.msra.mxu1 %v5144_v59 }
0x1a41   :  { %3413 = vmatprep.subr.bf16.mxu1 %v5116_v62 }
0x1a44   :  { %3414 = vmatpush3.bf16.msra.mxu1 %v5145_v5 }
0x1a45   :  { %3415 = vmatprep.subr.bf16.mxu1 %v5116_v62 }
0x1a48   :  { %3416 = vmatpush3.bf16.msra.mxu1 %v5146_v60 }
0x1acb   :  { %v2261_v54 = vpop.f32.mrf.mxu1  ;;  %v2302_v57 = vpop.f32.mrf.mxu0 }
0x1acc   :  { %v2262_v46 = vadd.f32 %v2261_v54, %v5147_v50  ;;  %v2303_v24 = vadd.f32 %v2302_v57, %v5149_v23 }
0x1acd   :  { %v2263_v53 = vpop.f32.mrf.mxu1  ;;  %v3379_v49 = vpop.f32.mrf.mxu0 }
0x1ace   :  { %v2264_v14 = vadd.f32 %v2263_v53, %v4135_v8 }
0x1acf   :  { %v2265_v48 = vpop.f32.mrf.mxu1  ;;  %v2305_v29 = vpop.f32.mrf.mxu0 }
0x1ad1   :  { %v2266_v47 = vpop.f32.mrf.mxu1  ;;  %v3380_v33 = vpop.f32.mrf.mxu0 }
0x1aeb   :  { %v2342_v63 = vpop.f32.mrf.mxu1  ;;  %v2383_v31 = vpop.f32.mrf.mxu0 }
0x1aec   :  { %v2343_v55 = vadd.f32 %v2342_v63, %v5148_v1  ;;  %v2384_v21 = vadd.f32 %v2383_v31, %v4139_v6 }
0x1aed   :  { %v2344_v56 = vpop.f32.mrf.mxu1  ;;  %v3399_v3 = vpop.f32.mrf.mxu0 }
0x1aee   :  { %v2389_v10 = vadd.f32 %v2343_v55, %v2262_v46  ;;  %v2345_v7 = vadd.f32 %v2344_v56, %v4133_v9 }
0x1aef   :  { %v2346_v62 = vpop.f32.mrf.mxu1  ;;  %v2386_v11 = vpop.f32.mrf.mxu0 }
0x1af0   :  { %v2721_v4 = vmul.f32 -1.442695, %v2389_v10  ;;  %v2396_v15 = vadd.f32 %v2345_v7, %v2264_v14 }
0x1af1   :  { %v2347_v12 = vpop.f32.mrf.mxu1  ;;  %v3400_v13 = vpop.f32.mrf.mxu0 }
0x1af2   :  { %3574 = vpow2.f32 %v2721_v4  ;;  %v2722_v16 = vmul.f32 -1.442695, %v2396_v15 }
0x1af4   :  { %3576 = vpow2.f32 %v2722_v16 }
0x1aff   :  { %v3575_v17 = vpop.eup %3574 }
0x1b00   :  { %v2393_v18 = vadd.f32 1.0, %v3575_v17 }
0x1b01   :  { %v3577_v19 = vpop.eup %3576 }
0x1b02   :  { %3578 = vrcp.f32 %v2393_v18  ;;  %v2400_v20 = vadd.f32 1.0, %v3577_v19 }
0x1b04   :  { %3580 = vrcp.f32 %v2400_v20 }
0x1b0f   :  { %v3579_v22 = vpop.eup %3578 }
0x1b10   :  { %v2403_v9 = vmul.f32 %v3579_v22, %v2384_v21 }
0x1b11   :  { %v3581_v26 = vpop.eup %3580 }
0x1b12   :  { %v2404_v25 = vadd.f32 %v2403_v9, %v2303_v24  ;;  %v2406_v8 = vsub.f32 1.0, %v3581_v26  ;;  %v2408_v32 = vmul.f32 %v3581_v26, %v4677_v0 }
0x1b14   :  { %3582 = vtanh.f32 %v2404_v25 }
0x1b21   :  { %v3583_v27 = vpop.eup %3582 }
0x1b22   :  { %v2407_v28 = vmul.f32 %v3583_v27, %v2406_v8 }
0x1b24   :  { %v2409_v34 = vadd.f32 %v2408_v32, %v2407_v28 }
0x1b26   :  { %v2410_v35 = vpack.c.bf16 %v2409_v34, %v2409_v34 }
0x1b28   :  { %3418 = vmatmul.mubr.bf16.vlgmr.msra.gmra.mxu1 %v2410_v35 }
0x1be8   :  { %v2445_v36 = vpop.f32.mrf.mxu1 }
0x1be9   :  { %v2446_v6 = vadd.f32 %v4153_v61, %v2445_v36 }
0x1bea   :  { %v3419_v37 = vpop.f32.mrf.mxu1  ;;  %2458 = sbr.rel (%p2724_p8) target bundleno = 7581 (0x1d9d), region = 85 }
0x1beb   :  { %2452 = vst [vmem:[#allocation14 + $0xa] sm:$0x3] %v2446_v6 }
0x1bec   :  { %v2448_v38 = vpop.f32.mrf.mxu1 }
0x1bee   :  { %v3420_v39 = vpop.f32.mrf.mxu1 }
0x1bef   :  { %vm2459_vm2 = vcmask 1041408  }
0x1bf0   :  { %v2460_v40 = vsel %vm2459_vm2, %v2446_v6, -inf }
0x1bf1   :  { %2461 = vmax.xlane.f32.xlu0 %v2460_v40 }
0x1c7a   :  { %v2462_v41 = vpop.xlane.xlu0 %2461 }
0x1c7b   :  { %vm2463_vm7 = vcmp.eq.f32.partialorder %v2446_v6, %v2462_v41 }
0x1c7c   :  { %v2464_v0 = vsel %vm2463_vm7, %v3944_v30, 128 }
0x1c7d   :  { %v2465_v42 = vsel %vm2459_vm2, %v2464_v0, 2147483647 }
0x1c7e   :  { %v2467_v43 = vshra.s32 %v2465_v42, 16  ;;  %v2466_v51 = vand.u32 65535, %v2465_v42 }
0x1c80   :  { %v2469_v45 = vcvt.s32.f32 %v2467_v43  ;;  %v2468_v61 = vcvt.s32.f32 %v2466_v51 }
0x1c82   :  { %2470 = vmin.xlane.f32.xlu0 %v2469_v45 }
0x1d0b   :  { %v2471_v52 = vpop.xlane.xlu0 %2470 }
0x1d0c   :  { %vm2472_vm8 = vcmp.eq.f32.partialorder %v2469_v45, %v2471_v52  ;;  %v2477_v58 = vcvt.f32.s32 %v2471_v52 }
0x1d0d   :  { %v2473_v2 = vsel %vm2472_vm8, %v2468_v61, inf }
0x1d0e   :  { %2474 = vmin.xlane.f32.xlu1 %v2473_v2  ;;  %v2478_v59 = vshll.u32 %v2477_v58, 16 }
0x1d97   :  { %v2475_v44 = vpop.xlane.xlu1 %2474 }
0x1d98   :  { %v2476_v5 = vcvt.f32.s32 %v2475_v44 }
0x1d9a   :  { %v2479_v60 = vadd.s32 %v2478_v59, %v2476_v5 }
0x1d9c   :  { %2481 = vst.msk [vmem:[#allocation3] sm:$0x3] %vm109_vm0, %v2479_v60 }
0x1d9d PF:  { %v4812_v54 = vld [vmem:[#allocation14] sm:$0x3]  ;;  %vm2490_vm9 = vcmask 1041408   ;;  %v4814_v30 = vld [vmem:[#allocation14 + $0x4] sm:$0x3]  ;;  %s3765_s19 = smov [#allocation15]  }
0x1d9e   :  { %2482 = vst [vmem:[#allocation2] sm:$0x3] %v2409_v34  ;;  %2483 = vst [vmem:[#allocation15] sm:$0x3] %v2409_v34  ;;  %v2491_v57 = vsel %vm2490_vm9, %v4812_v54, -inf  ;;  %v2497_v53 = vsel %vm2490_vm9, %v4814_v30, -inf }
0x1d9f   :  { %v4820_v49 = vld [vmem:[#allocation14 + $0x2] sm:$0x3]  ;;  %v4822_v48 = vld [vmem:[#allocation14 + $0x6] sm:$0x3]  ;;  %2492 = vmax.xlane.f32.xlu0 %v2491_v57  ;;  %2498 = vmax.xlane.f32.xlu1 %v2497_v53  ;;  %v4828_v33 = vld [vmem:[#allocation14 + $0x8] sm:$0x3] }
0x1da0   :  { %v2494_v29 = vsel %vm2490_vm9, %v4820_v49, -inf  ;;  %v2500_v47 = vsel %vm2490_vm9, %v4822_v48, -inf  ;;  %v4830_v63 = vld [vmem:[#allocation14 + $0xa] sm:$0x3]  ;;  %v2503_v31 = vsel %vm2490_vm9, %v4828_v33, -inf  ;;  %s2593_s20 = sshll.u32 %s3765_s19, 4  ;;  %s2594_s20 = int_to_ptr.vmem [resolvable:$true] %s2593_s20 }
0x1da1   :  { %v2506_v50 = vsel %vm2490_vm9, %v4830_v63, -inf  ;;  %s3700_s6 = scalar_lea.vmem %s2594_s20, 32  ;;  %p3705_p10 = scmp.lt.s32.totalorder %s2594_s20, %s2594_s20 }
0x1da2   :  { %p3701_p9 = scmp.ne.s32.totalorder %s2594_s20, %s3700_s6  ;;  %p3706_p11 = scmp.lt.s32.totalorder %s3700_s6, %s3700_s6 }
0x1da3   :  { %2495 = vmax.xlane.f32.xlu0 %v2494_v29  ;;  %2501 = vmax.xlane.f32.xlu1 %v2500_v47 }
0x1da4   :  { %p3707_p12 = por %p3706_p11, %p3705_p10 }
0x1da6   :  { %p3708_p13 = pnand %p3707_p12, %p3701_p9 }
0x1da7   :  { %2504 = vmax.xlane.f32.xlu0 %v2503_v31  ;;  %2507 = vmax.xlane.f32.xlu1 %v2506_v50 }
0x1e28   :  { %v4836_v46 = vpop.xlane.xlu0 %2492  ;;  %v4838_v1 = vpop.xlane.xlu1 %2498 }
0x1e29   :  { %v2509_v55 = vsub.f32 %v4812_v54, %v4836_v46  ;;  %v2511_v56 = vsub.f32 %v4814_v30, %v4838_v1 }
0x1e2b   :  { %v2515_v3 = vmul.f32 1.442695, %v2509_v55  ;;  %v2519_v10 = vmul.f32 1.442695, %v2511_v56 }
0x1e2c   :  { %v4844_v62 = vpop.xlane.xlu0 %2495  ;;  %v4846_v11 = vpop.xlane.xlu1 %2501 }
0x1e2d   :  { %3584 = vpow2.f32 %v2515_v3  ;;  %v2510_v4 = vsub.f32 %v4820_v49, %v4844_v62  ;;  %v2512_v7 = vsub.f32 %v4822_v48, %v4846_v11 }
0x1e2e   :  { %3586 = vpow2.f32 %v2519_v10 }
0x1e2f   :  { %v2517_v12 = vmul.f32 1.442695, %v2510_v4  ;;  %v2521_v13 = vmul.f32 1.442695, %v2512_v7 }
0x1e30   :  { %v4852_v14 = vpop.xlane.xlu0 %2504  ;;  %v4854_v15 = vpop.xlane.xlu1 %2507 }
0x1e31   :  { %3588 = vpow2.f32 %v2517_v12  ;;  %v2513_v16 = vsub.f32 %v4828_v33, %v4852_v14  ;;  %v2514_v17 = vsub.f32 %v4830_v63, %v4854_v15 }
0x1e32   :  { %3590 = vpow2.f32 %v2521_v13 }
0x1e33   :  { %v2523_v18 = vmul.f32 1.442695, %v2513_v16  ;;  %v2525_v19 = vmul.f32 1.442695, %v2514_v17 }
0x1e35   :  { %3592 = vpow2.f32 %v2523_v18 }
0x1e36   :  { %3594 = vpow2.f32 %v2525_v19 }
0x1e3a   :  { %v3585_v20 = vpop.eup %3584 }
0x1e3b   :  { %v3587_v21 = vpop.eup %3586  ;;  %v2527_v22 = vsel %vm2490_vm9, %v3585_v20, 0.0 }
0x1e3c   :  { %2528 = vadd.xlane.f32.xlu0 %v2527_v22  ;;  %v2533_v23 = vsel %vm2490_vm9, %v3587_v21, 0.0 }
0x1e3e   :  { %v3589_v24 = vpop.eup %3588 }
0x1e3f   :  { %v3591_v9 = vpop.eup %3590  ;;  %v2530_v25 = vsel %vm2490_vm9, %v3589_v24, 0.0 }
0x1e40   :  { %2534 = vadd.xlane.f32.xlu0 %v2533_v23  ;;  %2531 = vadd.xlane.f32.xlu1 %v2530_v25  ;;  %v2536_v26 = vsel %vm2490_vm9, %v3591_v9, 0.0 }
0x1e42   :  { %v3593_v8 = vpop.eup %3592 }
0x1e43   :  { %v3595_v27 = vpop.eup %3594  ;;  %v2539_v28 = vsel %vm2490_vm9, %v3593_v8, 0.0 }
0x1e44   :  { %2537 = vadd.xlane.f32.xlu1 %v2536_v26  ;;  %2540 = vadd.xlane.f32.xlu0 %v2539_v28  ;;  %v2542_v32 = vsel %vm2490_vm9, %v3595_v27, 0.0 }
0x1e48   :  { %2543 = vadd.xlane.f32.xlu1 %v2542_v32 }
0x1e49   :  { %3711 = shalt.err (!%p3708_p13)
}
0x1e4a   :  { %2596 = dma.vmem_to_hbm [thread:$0]  %s2594_s20, 32, %s4896_s12, [#allocation16]  }
0x1e4b   :  { %s3766_s12 = smov [#allocation14]  }
0x1e4c   :  { %s2580_s21 = sshll.u32 %s3766_s12, 4  ;;  %s2581_s21 = int_to_ptr.vmem [resolvable:$true] %s2580_s21 }
0x1e4d   :  { %s3720_s22 = scalar_lea.vmem %s2581_s21, 192  ;;  %p3725_p1 = scmp.lt.s32.totalorder %s2581_s21, %s2581_s21 }
0x1e4e   :  { %p3721_p0 = scmp.ne.s32.totalorder %s2581_s21, %s3720_s22  ;;  %p3726_p2 = scmp.lt.s32.totalorder %s3720_s22, %s3720_s22 }
0x1e50   :  { %p3727_p3 = por %p3726_p2, %p3725_p1 }
0x1e52   :  { %p3728_p4 = pnand %p3727_p3, %p3721_p0 }
0x1ec5   :  { %v2529_v34 = vpop.xlane.xlu0 %2528 }
0x1ec6   :  { %3596 = vlog2.f32 %v2529_v34 }
0x1ec9   :  { %v2532_v35 = vpop.xlane.xlu1 %2531  ;;  %v2535_v36 = vpop.xlane.xlu0 %2534 }
0x1eca   :  { %3598 = vlog2.f32 %v2532_v35 }
0x1ecb   :  { %3600 = vlog2.f32 %v2535_v36 }
0x1ecd   :  { %v2538_v6 = vpop.xlane.xlu1 %2537  ;;  %v2541_v37 = vpop.xlane.xlu0 %2540 }
0x1ece   :  { %3602 = vlog2.f32 %v2538_v6 }
0x1ecf   :  { %3604 = vlog2.f32 %v2541_v37 }
0x1ed1   :  { %v2544_v38 = vpop.xlane.xlu1 %2543 }
0x1ed2   :  { %3606 = vlog2.f32 %v2544_v38 }
0x1ed3   :  { %v3597_v39 = vpop.eup %3596 }
0x1ed4   :  { %v2546_v40 = vmul.f32 0.6931472, %v3597_v39 }
0x1ed6   :  { %v2557_v41 = vadd.f32 %v2546_v40, %v4836_v46 }
0x1ed7   :  { %v3599_v0 = vpop.eup %3598 }
0x1ed8   :  { %v3601_v42 = vpop.eup %3600  ;;  %v2563_v43 = vsub.f32 %v4812_v54, %v2557_v41  ;;  %v2548_v45 = vmul.f32 0.6931472, %v3599_v0 }
0x1ed9   :  { %v2550_v51 = vmul.f32 0.6931472, %v3601_v42 }
0x1eda   :  { %2569 = vst [vmem:[#allocation14] sm:$0x3] %v2563_v43  ;;  %v2558_v52 = vadd.f32 %v2548_v45, %v4844_v62 }
0x1edb   :  { %v3603_v61 = vpop.eup %3602  ;;  %v2559_v2 = vadd.f32 %v2550_v51, %v4838_v1 }
0x1edc   :  { %v3605_v58 = vpop.eup %3604  ;;  %v2564_v44 = vsub.f32 %v4820_v49, %v2558_v52  ;;  %v2552_v59 = vmul.f32 0.6931472, %v3603_v61 }
0x1edd   :  { %v2565_v5 = vsub.f32 %v4814_v30, %v2559_v2  ;;  %v2554_v60 = vmul.f32 0.6931472, %v3605_v58 }
0x1ede   :  { %2570 = vst [vmem:[#allocation14 + $0x2] sm:$0x3] %v2564_v44  ;;  %v2560_v57 = vadd.f32 %v2552_v59, %v4846_v11 }
0x1edf   :  { %v3607_v53 = vpop.eup %3606  ;;  %2571 = vst [vmem:[#allocation14 + $0x4] sm:$0x3] %v2565_v5  ;;  %v2561_v54 = vadd.f32 %v2554_v60, %v4852_v14 }
0x1ee0   :  { %v2566_v29 = vsub.f32 %v4822_v48, %v2560_v57  ;;  %v2556_v47 = vmul.f32 0.6931472, %v3607_v53 }
0x1ee1   :  { %v2567_v31 = vsub.f32 %v4828_v33, %v2561_v54 }
0x1ee2   :  { %2572 = vst [vmem:[#allocation14 + $0x6] sm:$0x3] %v2566_v29  ;;  %v2562_v49 = vadd.f32 %v2556_v47, %v4854_v15 }
0x1ee3   :  { %2573 = vst [vmem:[#allocation14 + $0x8] sm:$0x3] %v2567_v31 }
0x1ee4   :  { %v2568_v30 = vsub.f32 %v4830_v63, %v2562_v49 }
0x1ee6   :  { %2574 = vst [vmem:[#allocation14 + $0xa] sm:$0x3] %v2568_v30 }
0x1ee7   :  { %3731 = shalt.err (!%p3728_p4)
}
0x1ee8   :  { %s3767_s23 = smov 32   ;;  %s3768_s5 = smov 2  }
0x1ee9   :  { %2586 = dma.vmem_to_hbm [thread:$0]  %s2581_s21, 192, %s4895_s11, [#allocation8], %s3767_s23, %s3767_s23, %s3768_s5  }
0x1eea   :  { %3748 = dma.done.wait [#allocation8], 192  }
0x1eeb   :  { %3749 = vsyncadd [#allocation8], 4294967104 }
0x1eec   :  { %3750 = dma.done.wait [#allocation16], 32  }
0x1eed   :  { %3751 = vsyncadd [#allocation16], 4294967264 }
0x1eee   :  { %2603 = vsyncpa [#allocation7], 1 }
0x1eef   :  { %2604 = vsyncpa [#allocation10], 1 }
0x1ef0   :  { %2605 = vsyncpa [#allocation13], 1 }
0x1ef1   :  { %2606 = vsyncpa [#allocation8], 1 }
0x1ef2   :  { %2607 = vsyncpa [#allocation16], 1 }

</bundles_post_ra>
